<compile_context>
chip_gen: v7x
topology: tpu7x:2x2x1
jax: 0.10.0
libtpu: 0.0.40
codegen_flags: <defaults>
</compile_context>

<pallas_src>
import math
import functools

import jax
import jax.numpy as jnp
from jax.experimental import pallas as pl
from jax.experimental.pallas import tpu as pltpu


# ----------------------------------------------------------------------------
# Small helpers
# ----------------------------------------------------------------------------
def _layer_norm_f32(v, g, b, eps=1e-6):
    # single-pass stats in fp32, eps=1e-6 (matches the PyTorch module)
    vf = v.astype(jnp.float32)
    mu = jnp.mean(vf, axis=-1, keepdims=True)
    var = jnp.mean(vf * vf, axis=-1, keepdims=True) - mu * mu
    return (vf - mu) * jax.lax.rsqrt(var + eps) * g + b


@functools.lru_cache(maxsize=None)
def _tpu_vmem_capacity_bytes():
    try:
        return int(pltpu.get_tpu_info().vmem_capacity_bytes)
    except Exception:
        return 64 * 1024 * 1024          # conservative fallback (v7x-sized)


def _vmem_limit_bytes():
    cap = _tpu_vmem_capacity_bytes()
    # leave headroom for compiler temporaries (einshape copies, fp32 scores):
    # ~54 MiB on v7x (64 MiB), ~109 MiB on v5e/v6e (128 MiB).
    return max(32 * 1024 * 1024, min(int(cap * 0.85), cap - (8 << 20)))


@functools.lru_cache(maxsize=None)
def _single_buffer_supported():
    """Probe once whether pipeline_mode=pl.Buffered(1) is accepted here."""
    def _probe(x_ref, o_ref):
        o_ref[...] = x_ref[...] + 1.0
    try:
        spec = pl.BlockSpec((8, 128), lambda i: (0, 0),
                            pipeline_mode=pl.Buffered(1))
        out = pl.pallas_call(
            _probe,
            grid=(2,),
            in_specs=[spec],
            out_specs=pl.BlockSpec((8, 128), lambda i: (0, 0)),
            out_shape=jax.ShapeDtypeStruct((8, 128), jnp.float32),
        )(jnp.zeros((8, 128), jnp.float32))
        jax.block_until_ready(out)
        return True
    except Exception:
        return False


def _const_spec(arr, single_buffer):
    # Grid-constant parameter block: DMA'd once.  Single-buffer it when the
    # runtime supports it so weight VMEM is not doubled (matters most on v7x).
    n = arr.ndim
    index_map = lambda *_, n=n: (0,) * n
    if single_buffer:
        return pl.BlockSpec(arr.shape, index_map, pipeline_mode=pl.Buffered(1))
    return pl.BlockSpec(arr.shape, index_map)


# ----------------------------------------------------------------------------
# Stage 1: LayerNorm + fused Q|K|V projection, head-major outputs.
# ----------------------------------------------------------------------------
def qkv_projection_kernel(x_ref, g1_ref, be1_ref, wqkv_ref, bqkv_ref,
                          q_ref, k_ref, v_ref,
                          *, heads, dim_per_head, apply_first_ln, compute_dtype):
    D = heads * dim_per_head
    C = x_ref.shape[1]

    x = x_ref[0]                                                     # (C, D)
    if apply_first_ln:
        xn = _layer_norm_f32(x, g1_ref[0], be1_ref[0]).astype(compute_dtype)
    else:
        xn = x.astype(compute_dtype)

    # fused (D, 3D) projection; 1/sqrt(dh) pre-folded into the Q columns.
    qkv = jnp.dot(xn, wqkv_ref[...],
                  preferred_element_type=jnp.float32) + bqkv_ref[0]  # (C, 3D)
    qkv = qkv.astype(compute_dtype)

    q = qkv[:, :D].reshape(C, heads, dim_per_head)
    k = qkv[:, D:2 * D].reshape(C, heads, dim_per_head)
    v = qkv[:, 2 * D:].reshape(C, heads, dim_per_head)
    q_ref[0] = pltpu.einshape("shd->hsd", q)                          # (H, C, dh)
    k_ref[0] = pltpu.einshape("shd->hsd", k)
    v_ref[0] = pltpu.einshape("shd->hsd", v)


# ----------------------------------------------------------------------------
# Stage 2: flash-style attention + output projection + FFN (per query tile).
# ----------------------------------------------------------------------------
def attention_ffn_kernel(x_ref, q_ref, k_ref, v_ref, bias_ref,
                         wo_ref, bo_ref, g2_ref, be2_ref,
                         w1_ref, bf1_ref, w2_ref, bf2_ref,
                         o_ref,
                         *, heads, dim_per_head, key_tile, compute_dtype):
    H, dh = heads, dim_per_head
    D = H * dh
    TQ = x_ref.shape[1]
    S = k_ref.shape[2]
    n_key_tiles = S // key_tile

    q3 = q_ref[0]                                       # (H, TQ, dh), compute dtype

    m0 = jnp.full((H, TQ, 1), -jnp.inf, jnp.float32)
    l0 = jnp.zeros((H, TQ, 1), jnp.float32)
    a0 = jnp.zeros((H, TQ, dh), jnp.float32)

    def kv_step(i, carry):
        m, l, acc = carry
        k0 = pl.multiple_of(i * key_tile, key_tile)
        k_blk = k_ref[0, :, pl.ds(k0, key_tile), :]      # (H, TK, dh)
        v_blk = v_ref[0, :, pl.ds(k0, key_tile), :]      # (H, TK, dh)
        b_blk = bias_ref[0, :, pl.ds(k0, key_tile)]      # (1, TK) fp32

        s = jnp.einsum("hqd,hkd->hqk", q3, k_blk,
                       preferred_element_type=jnp.float32)           # (H, TQ, TK)
        s = s + b_blk[None, :, :]                        # additive mask bias (fp32)

        m_new = jnp.maximum(m, jnp.max(s, axis=-1, keepdims=True))
        alpha = jnp.exp(m - m_new)
        p = jnp.exp(s - m_new)
        l_new = alpha * l + jnp.sum(p, axis=-1, keepdims=True)
        acc_new = alpha * acc + jnp.einsum(
            "hqk,hkd->hqd", p.astype(compute_dtype), v_blk,
            preferred_element_type=jnp.float32)
        return m_new, l_new, acc_new

    m, l, acc = jax.lax.fori_loop(0, n_key_tiles, kv_step, (m0, l0, a0))
    # TODO(synk): attention dropout omitted (inference / identity).

    ctx = acc * pl.reciprocal(l, approx=True)                        # (H, TQ, dh)
    context = pltpu.einshape("hqd->qhd", ctx.astype(compute_dtype)).reshape(TQ, D)

    attn_out = jnp.dot(context, wo_ref[...],
                       preferred_element_type=jnp.float32) + bo_ref[0]
    out = attn_out + x_ref[0].astype(jnp.float32)        # residual (dropout = identity)

    # ---- position-wise feed-forward with residual --------------------------
    on = _layer_norm_f32(out, g2_ref[0], be2_ref[0]).astype(compute_dtype)
    inter = jnp.dot(on, w1_ref[...],
                    preferred_element_type=jnp.float32) + bf1_ref[0]
    c = math.sqrt(2.0 / math.pi)
    inter = 0.5 * inter * (1.0 + jnp.tanh(c * (inter + 0.044715 * inter ** 3)))
    ffn = jnp.dot(inter.astype(compute_dtype), w2_ref[...],
                  preferred_element_type=jnp.float32) + bf2_ref[0]

    o_ref[0] = (ffn + out).astype(o_ref.dtype)


# ----------------------------------------------------------------------------
# Wrapper: host-side packing, per-chip tile/VMEM derivation, two pallas_calls.
# ----------------------------------------------------------------------------
def transformer_encoder_layer(inputs, mask, params, *, heads, iter_,
                              q_tile=None, key_tile=None, proj_chunk=None,
                              compute_dtype=jnp.bfloat16):
    B, S, D = inputs.shape
    assert D % heads == 0
    dh = D // heads
    d_ff = params["w1"].shape[1]

    vmem_cap = _tpu_vmem_capacity_bytes()
    vmem_limit = _vmem_limit_bytes()
    single_buf = _single_buffer_supported()
    cdt = jax.dtypes.canonicalize_dtype(compute_dtype)
    f32 = jnp.float32

    # tile selection (re-derived per generation: bigger query tiles when VMEM allows)
    if q_tile is None:
        q_tile = 256 if vmem_cap >= 96 * 1024 * 1024 else 128
        q_tile = S if S <= q_tile else q_tile
    if key_tile is None:
        key_tile = S if S <= 512 else 512
    if proj_chunk is None:
        proj_chunk = S if S <= 512 else 512
    assert S % q_tile == 0 and (q_tile % 8 == 0 or q_tile == S)
    assert S % key_tile == 0 and (key_tile % 128 == 0 or key_tile == S)
    assert S % proj_chunk == 0 and (proj_chunk % 128 == 0 or proj_chunk == S)

    # host-side packing: fold 1/sqrt(dh) into Q, fuse Q|K|V into one (D, 3D)
    # matmul, cast matmul weights to the compute dtype, biases stay fp32.
    scale = 1.0 / math.sqrt(dh)
    wqkv = jnp.concatenate([params["wq"] * scale, params["wk"], params["wv"]],
                           axis=1).astype(cdt)
    bqkv = jnp.concatenate([params["bq"] * scale, params["bk"], params["bv"]],
                           axis=1).astype(f32)
    wo = params["wo"].astype(cdt)
    w1 = params["w1"].astype(cdt)
    w2 = params["w2"].astype(cdt)
    bo, bf1, bf2 = (params["bo"].astype(f32), params["b1"].astype(f32),
                    params["b2"].astype(f32))
    g1, be1 = params["ln1_g"].astype(f32), params["ln1_b"].astype(f32)
    g2, be2 = params["ln2_g"].astype(f32), params["ln2_b"].astype(f32)

    # additive attention-mask bias (fp32: -1e18 must stay in the fp32 domain)
    mask_bias = jnp.where(mask.astype(f32) > 0.0,
                          jnp.float32(-1e18), jnp.float32(0.0)).reshape(B, 1, S)

    # ---- stage 1: LayerNorm + fused QKV projection --------------------------
    proj_kernel = functools.partial(
        qkv_projection_kernel, heads=heads, dim_per_head=dh,
        apply_first_ln=(iter_ != 0), compute_dtype=cdt)
    proj_cost = pl.CostEstimate(
        flops=int(2 * B * S * D * 3 * D),
        transcendentals=int(B * S),
        bytes_accessed=int(inputs.size * inputs.dtype.itemsize
                           + 3 * B * S * D * cdt.itemsize
                           + wqkv.size * cdt.itemsize),
    )
    head_shape = jax.ShapeDtypeStruct((B, heads, S, dh), cdt)
    q_hm, k_hm, v_hm = pl.pallas_call(
        proj_kernel,
        out_shape=(head_shape, head_shape, head_shape),
        grid_spec=pltpu.PrefetchScalarGridSpec(
            num_scalar_prefetch=0,
            grid=(B, S // proj_chunk),
            in_specs=[
                pl.BlockSpec((1, proj_chunk, D), lambda b, c: (b, c, 0)),
                _const_spec(g1, single_buf),
                _const_spec(be1, single_buf),
                _const_spec(wqkv, single_buf),
                _const_spec(bqkv, single_buf),
            ],
            out_specs=[
                pl.BlockSpec((1, heads, proj_chunk, dh), lambda b, c: (b, 0, c, 0)),
                pl.BlockSpec((1, heads, proj_chunk, dh), lambda b, c: (b, 0, c, 0)),
                pl.BlockSpec((1, heads, proj_chunk, dh), lambda b, c: (b, 0, c, 0)),
            ],
        ),
        compiler_params=pltpu.CompilerParams(
            dimension_semantics=("parallel", "parallel"),
            vmem_limit_bytes=vmem_limit,
        ),
        cost_estimate=proj_cost,
    )(inputs, g1, be1, wqkv, bqkv)

    # ---- stage 2: flash attention + output projection + FFN -----------------
    attn_kernel = functools.partial(
        attention_ffn_kernel, heads=heads, dim_per_head=dh,
        key_tile=key_tile, compute_dtype=cdt)
    attn_cost = pl.CostEstimate(
        flops=int(4 * B * heads * S * S * dh
                  + 2 * B * S * D * D + 4 * B * S * D * d_ff),
        transcendentals=int(B * heads * S * S + B * S * d_ff + 2 * B * S),
        bytes_accessed=int(2 * inputs.size * inputs.dtype.itemsize
                           + 3 * B * S * D * cdt.itemsize + B * S * 4
                           + (wo.size + w1.size + w2.size) * cdt.itemsize),
    )
    return pl.pallas_call(
        attn_kernel,
        out_shape=jax.ShapeDtypeStruct((B, S, D), inputs.dtype),
        grid_spec=pltpu.PrefetchScalarGridSpec(
            num_scalar_prefetch=0,
            grid=(B, S // q_tile),
            in_specs=[
                pl.BlockSpec((1, q_tile, D), lambda b, t: (b, t, 0)),            # x (residual)
                pl.BlockSpec((1, heads, q_tile, dh), lambda b, t: (b, 0, t, 0)), # Q tile
                pl.BlockSpec((1, heads, S, dh), lambda b, t: (b, 0, 0, 0)),      # K (per batch)
                pl.BlockSpec((1, heads, S, dh), lambda b, t: (b, 0, 0, 0)),      # V (per batch)
                pl.BlockSpec((1, 1, S), lambda b, t: (b, 0, 0)),                 # mask bias
                _const_spec(wo, single_buf), _const_spec(bo, single_buf),
                _const_spec(g2, single_buf), _const_spec(be2, single_buf),
                _const_spec(w1, single_buf), _const_spec(bf1, single_buf),
                _const_spec(w2, single_buf), _const_spec(bf2, single_buf),
            ],
            out_specs=pl.BlockSpec((1, q_tile, D), lambda b, t: (b, t, 0)),
        ),
        compiler_params=pltpu.CompilerParams(
            dimension_semantics=("parallel", "parallel"),
            vmem_limit_bytes=vmem_limit,
        ),
        cost_estimate=attn_cost,
    )(inputs, q_hm, k_hm, v_hm, mask_bias,
      wo, bo, g2, be2, w1, bf1, w2, bf2)


# ----------------------------------------------------------------------------
# Pure-JAX reference (mirrors the PyTorch module, eval mode, unpacked weights).
# ----------------------------------------------------------------------------
def reference_forward(inputs, mask, params, *, heads, iter_):
    B, S, D = inputs.shape
    dh = D // heads
    x = inputs.astype(jnp.float32)

    def layer_norm(v, g, b):
        mu = jnp.mean(v, axis=-1, keepdims=True)
        var = jnp.mean((v - mu) ** 2, axis=-1, keepdims=True)
        return (v - mu) / jnp.sqrt(var + 1e-6) * g[0] + b[0]

    xn = layer_norm(x, params["ln1_g"], params["ln1_b"]) if iter_ != 0 else x

    def lin(v, w, b):
        return v @ w + b[0]

    q = lin(xn, params["wq"], params["bq"]).reshape(B, S, heads, dh).transpose(0, 2, 1, 3)
    k = lin(xn, params["wk"], params["bk"]).reshape(B, S, heads, dh).transpose(0, 2, 1, 3)
    v = lin(xn, params["wv"], params["bv"]).reshape(B, S, heads, dh).transpose(0, 2, 1, 3)
    q = q / math.sqrt(dh)
    scores = jnp.einsum("bhqd,bhkd->bhqk", q, k)
    m = mask.astype(jnp.float32).reshape(B, 1, 1, S)
    scores = jnp.where(m > 0.0, -1e18, scores)
    attn = jax.nn.softmax(scores, axis=-1)
    ctx = jnp.einsum("bhqk,bhkd->bhqd", attn, v).transpose(0, 2, 1, 3).reshape(B, S, D)
    attn_out = lin(ctx, params["wo"], params["bo"])
    out = attn_out + x

    on = layer_norm(out, params["ln2_g"], params["ln2_b"])
    inter = lin(on, params["w1"], params["b1"])
    c = math.sqrt(2.0 / math.pi)
    inter = 0.5 * inter * (1.0 + jnp.tanh(c * (inter + 0.044715 * inter ** 3)))
    return lin(inter, params["w2"], params["b2"]) + out


# ----------------------------------------------------------------------------
# Deterministic parameter construction.
# ----------------------------------------------------------------------------
def make_params(key, d_model, d_ff):
    ks = jax.random.split(key, 8)
    init = lambda k, shape: (0.02 * jax.random.normal(k, shape)).astype(jnp.float32)
    return {
        "ln1_g": jnp.ones((1, d_model), jnp.float32),
        "ln1_b": jnp.zeros((1, d_model), jnp.float32),
        "wq": init(ks[0], (d_model, d_model)), "bq": jnp.zeros((1, d_model), jnp.float32),
        "wk": init(ks[1], (d_model, d_model)), "bk": jnp.zeros((1, d_model), jnp.float32),
        "wv": init(ks[2], (d_model, d_model)), "bv": jnp.zeros((1, d_model), jnp.float32),
        "wo": init(ks[3], (d_model, d_model)), "bo": jnp.zeros((1, d_model), jnp.float32),
        "ln2_g": jnp.ones((1, d_model), jnp.float32),
        "ln2_b": jnp.zeros((1, d_model), jnp.float32),
        "w1": init(ks[4], (d_model, d_ff)), "b1": jnp.zeros((1, d_ff), jnp.float32),
        "w2": init(ks[5], (d_ff, d_model)), "b2": jnp.zeros((1, d_model), jnp.float32),
    }


if __name__ == "__main__":
    # small but tiling-exercising shapes: 2 query tiles, 2 key tiles, 2 proj chunks.
    B, S, D, H, D_FF = 2, 256, 32, 4, 64
    TQ = TK = PC = 128

    key = jax.random.PRNGKey(0)
    k_x, k_p = jax.random.split(key)
    inputs = jax.random.normal(k_x, (B, S, D), dtype=jnp.float32)

    # mask (1.0 = masked key position):
    #   batch 0: entire first key tile masked (exercises the online-softmax edge)
    #   batch 1: ragged tail padding crossing into the second key tile
    mask = jnp.zeros((B, S), jnp.float32)
    mask = mask.at[0, :128].set(1.0)
    mask = mask.at[1, -37:].set(1.0)

    params = make_params(k_p, D, D_FF)

    for it in (0, 1):   # iter==0 skips the first LayerNorm, iter!=0 applies it
        ref = reference_forward(inputs, mask, params, heads=H, iter_=it)

        # fp32 compute path: exactness check against the fp32 reference.
        out = transformer_encoder_layer(
            inputs, mask, params, heads=H, iter_=it,
            q_tile=TQ, key_tile=TK, proj_chunk=PC, compute_dtype=jnp.float32)
        out = jax.block_until_ready(out)
        assert out.shape == (B, S, D)
        assert jnp.allclose(out, ref, atol=2e-3, rtol=2e-3), \
            f"fp32 mismatch vs reference (iter={it})"

        # bf16 MXU path (production default): looser tolerance.
        out_bf16 = transformer_encoder_layer(
            inputs, mask, params, heads=H, iter_=it,
            q_tile=TQ, key_tile=TK, proj_chunk=PC, compute_dtype=jnp.bfloat16)
        out_bf16 = jax.block_until_ready(out_bf16)
        assert jnp.allclose(out_bf16, ref, atol=3e-2, rtol=3e-2), \
            f"bf16 mismatch vs reference (iter={it})"

    print("KERNEL_OK")
</pallas_src>

<mosaic_0001>
module attributes {stable_mosaic.version = 11 : i64} {
  func.func @_probe(%arg0: i32, %arg1: memref<8x128xf32, #tpu.memory_space<vmem>>, %arg2: memref<8x128xf32, #tpu.memory_space<vmem>>) attributes {dimension_semantics = [#tpu.dimension_semantics<arbitrary>], iteration_bounds = array<i64: 2>, scalar_prefetch = 0 : i64, scratch_operands = 0 : i64, tpu.core_type = #tpu.core_type<tc>, window_params = [{pipeline_mode = #tpu.pipeline_mode<synchronous>, transform_indices = @transform_0, window_bounds = array<i64: 8, 128>}, {pipeline_mode = #tpu.pipeline_mode<synchronous>, transform_indices = @transform_1, window_bounds = array<i64: 8, 128>}]} {
    %c0 = arith.constant 0 : index
    %c0_0 = arith.constant 0 : index
    %0 = vector.load %arg1[%c0, %c0_0] : memref<8x128xf32, #tpu.memory_space<vmem>>, vector<8x128xf32>
    %cst = arith.constant 1.000000e+00 : f32
    %1 = vector.broadcast %cst : f32 to vector<8x128xf32>
    %2 = arith.addf %0, %1 : vector<8x128xf32>
    %c0_1 = arith.constant 0 : index
    %c0_2 = arith.constant 0 : index
    %3 = vector.load %arg2[%c0_1, %c0_2] : memref<8x128xf32, #tpu.memory_space<vmem>>, vector<8x128xf32>
    tpu.vector_store %arg2[%c0_1, %c0_2], %2 {strides = array<i32>} : memref<8x128xf32, #tpu.memory_space<vmem>>, vector<8x128xf32>,
    return
  }
  func.func @transform_0(%arg0: i32) -> (i32, i32) {
    %c0_i32 = arith.constant 0 : i32
    %c0_i32_0 = arith.constant 0 : i32
    %c0_i32_1 = arith.constant 0 : i32
    return %c0_i32, %c0_i32_0 : i32, i32
  }
  func.func @transform_1(%arg0: i32) -> (i32, i32) {
    %c0_i32 = arith.constant 0 : i32
    %c0_i32_0 = arith.constant 0 : i32
    %c0_i32_1 = arith.constant 0 : i32
    return %c0_i32, %c0_i32_0 : i32, i32
  }
}

module attributes {stable_mosaic.version = 11 : i64} {
  func.func @qkv_projection_kernel(%arg0: i32, %arg1: i32, %arg2: memref<1x128x32xf32, #tpu.memory_space<vmem>>, %arg3: memref<1x32xf32, #tpu.memory_space<vmem>>, %arg4: memref<1x32xf32, #tpu.memory_space<vmem>>, %arg5: memref<32x96xf32, #tpu.memory_space<vmem>>, %arg6: memref<1x96xf32, #tpu.memory_space<vmem>>, %arg7: memref<1x4x128x8xf32, #tpu.memory_space<vmem>>, %arg8: memref<1x4x128x8xf32, #tpu.memory_space<vmem>>, %arg9: memref<1x4x128x8xf32, #tpu.memory_space<vmem>>) attributes {dimension_semantics = [#tpu.dimension_semantics<parallel>, #tpu.dimension_semantics<parallel>], iteration_bounds = array<i64: 2, 2>, scalar_prefetch = 0 : i64, scratch_operands = 0 : i64, tpu.core_type = #tpu.core_type<tc>, window_params = [{transform_indices = @transform_0, window_bounds = array<i64: 1, 128, 32>}, {pipeline_mode = #tpu.pipeline_mode<synchronous>, transform_indices = @transform_1, window_bounds = array<i64: 1, 32>}, {pipeline_mode = #tpu.pipeline_mode<synchronous>, transform_indices = @transform_2, window_bounds = array<i64: 1, 32>}, {pipeline_mode = #tpu.pipeline_mode<synchronous>, transform_indices = @transform_3, window_bounds = array<i64: 32, 96>}, {pipeline_mode = #tpu.pipeline_mode<synchronous>, transform_indices = @transform_4, window_bounds = array<i64: 1, 96>}, {transform_indices = @transform_5, window_bounds = array<i64: 1, 4, 128, 8>}, {transform_indices = @transform_6, window_bounds = array<i64: 1, 4, 128, 8>}, {transform_indices = @transform_7, window_bounds = array<i64: 1, 4, 128, 8>}]} {
    %c0 = arith.constant 0 : index
    %c0_0 = arith.constant 0 : index
    %c0_1 = arith.constant 0 : index
    %0 = vector.load %arg2[%c0, %c0_0, %c0_1] : memref<1x128x32xf32, #tpu.memory_space<vmem>>, vector<1x128x32xf32>
    %1 = vector.shape_cast %0 : vector<1x128x32xf32> to vector<128x32xf32>
    %c0_2 = arith.constant 0 : index
    %c0_3 = arith.constant 0 : index
    %2 = vector.load %arg5[%c0_2, %c0_3] : memref<32x96xf32, #tpu.memory_space<vmem>>, vector<32x96xf32>
    %cst = arith.constant dense<0.000000e+00> : vector<128x96xf32>
    %3 = tpu.matmul %1, %2, %cst {dimension_numbers = #tpu.dot_dimension_numbers<[1], [0], [0], [1], [0, 0, 1, 1], [], []>} : vector<128x32xf32>, vector<32x96xf32>, vector<128x96xf32> -> vector<128x96xf32>
    %c0_4 = arith.constant 0 : index
    %c0_5 = arith.constant 0 : index
    %4 = vector.load %arg6[%c0_4, %c0_5] : memref<1x96xf32, #tpu.memory_space<vmem>>, vector<1x96xf32>
    %5 = vector.shape_cast %4 : vector<1x96xf32> to vector<96xf32>
    %6 = vector.shape_cast %5 : vector<96xf32> to vector<1x96xf32>
    %7 = vector.broadcast %6 : vector<1x96xf32> to vector<128x96xf32>
    %8 = arith.addf %3, %7 : vector<128x96xf32>
    %9 = vector.extract_strided_slice %8 {offsets = [0, 0], sizes = [128, 32], strides = [1, 1]} : vector<128x96xf32> to vector<128x32xf32>
    %10 = vector.shape_cast %9 : vector<128x32xf32> to vector<128x4x8xf32>
    %11 = vector.extract_strided_slice %8 {offsets = [0, 32], sizes = [128, 32], strides = [1, 1]} : vector<128x96xf32> to vector<128x32xf32>
    %12 = vector.shape_cast %11 : vector<128x32xf32> to vector<128x4x8xf32>
    %13 = vector.extract_strided_slice %8 {offsets = [0, 64], sizes = [128, 32], strides = [1, 1]} : vector<128x96xf32> to vector<128x32xf32>
    %14 = vector.shape_cast %13 : vector<128x32xf32> to vector<128x4x8xf32>
    %15 = tpu.transpose %10, [1, 0, 2] : vector<128x4x8xf32> -> vector<4x128x8xf32>
    %c0_6 = arith.constant 0 : index
    %c0_7 = arith.constant 0 : index
    %c0_8 = arith.constant 0 : index
    %c0_9 = arith.constant 0 : index
    %16 = vector.load %arg7[%c0_6, %c0_7, %c0_8, %c0_9] : memref<1x4x128x8xf32, #tpu.memory_space<vmem>>, vector<1x4x128x8xf32>
    %17 = vector.shape_cast %16 : vector<1x4x128x8xf32> to vector<4x128x8xf32>
    %18 = vector.shape_cast %15 : vector<4x128x8xf32> to vector<1x4x128x8xf32>
    tpu.vector_store %arg7[%c0_6, %c0_7, %c0_8, %c0_9], %18 {strides = array<i32>} : memref<1x4x128x8xf32, #tpu.memory_space<vmem>>, vector<1x4x128x8xf32>,
    %19 = tpu.transpose %12, [1, 0, 2] : vector<128x4x8xf32> -> vector<4x128x8xf32>
    %c0_10 = arith.constant 0 : index
    %c0_11 = arith.constant 0 : index
    %c0_12 = arith.constant 0 : index
    %c0_13 = arith.constant 0 : index
    %20 = vector.load %arg8[%c0_10, %c0_11, %c0_12, %c0_13] : memref<1x4x128x8xf32, #tpu.memory_space<vmem>>, vector<1x4x128x8xf32>
    %21 = vector.shape_cast %20 : vector<1x4x128x8xf32> to vector<4x128x8xf32>
    %22 = vector.shape_cast %19 : vector<4x128x8xf32> to vector<1x4x128x8xf32>
    tpu.vector_store %arg8[%c0_10, %c0_11, %c0_12, %c0_13], %22 {strides = array<i32>} : memref<1x4x128x8xf32, #tpu.memory_space<vmem>>, vector<1x4x128x8xf32>,
    %23 = tpu.transpose %14, [1, 0, 2] : vector<128x4x8xf32> -> vector<4x128x8xf32>
    %c0_14 = arith.constant 0 : index
    %c0_15 = arith.constant 0 : index
    %c0_16 = arith.constant 0 : index
    %c0_17 = arith.constant 0 : index
    %24 = vector.load %arg9[%c0_14, %c0_15, %c0_16, %c0_17] : memref<1x4x128x8xf32, #tpu.memory_space<vmem>>, vector<1x4x128x8xf32>
    %25 = vector.shape_cast %24 : vector<1x4x128x8xf32> to vector<4x128x8xf32>
    %26 = vector.shape_cast %23 : vector<4x128x8xf32> to vector<1x4x128x8xf32>
    tpu.vector_store %arg9[%c0_14, %c0_15, %c0_16, %c0_17], %26 {strides = array<i32>} : memref<1x4x128x8xf32, #tpu.memory_space<vmem>>, vector<1x4x128x8xf32>,
    return
  }
  func.func @transform_0(%arg0: i32, %arg1: i32) -> (i32, i32, i32) {
    %c0_i32 = arith.constant 0 : i32
    %c0_i32_0 = arith.constant 0 : i32
    return %arg0, %arg1, %c0_i32 : i32, i32, i32
  }
  func.func @transform_1(%arg0: i32, %arg1: i32) -> (i32, i32) {
    %c0_i32 = arith.constant 0 : i32
    %c0_i32_0 = arith.constant 0 : i32
    %c0_i32_1 = arith.constant 0 : i32
    return %c0_i32, %c0_i32_0 : i32, i32
  }
  func.func @transform_2(%arg0: i32, %arg1: i32) -> (i32, i32) {
    %c0_i32 = arith.constant 0 : i32
    %c0_i32_0 = arith.constant 0 : i32
    %c0_i32_1 = arith.constant 0 : i32
    return %c0_i32, %c0_i32_0 : i32, i32
  }
  func.func @transform_3(%arg0: i32, %arg1: i32) -> (i32, i32) {
    %c0_i32 = arith.constant 0 : i32
    %c0_i32_0 = arith.constant 0 : i32
    %c0_i32_1 = arith.constant 0 : i32
    return %c0_i32, %c0_i32_0 : i32, i32
  }
  func.func @transform_4(%arg0: i32, %arg1: i32) -> (i32, i32) {
    %c0_i32 = arith.constant 0 : i32
    %c0_i32_0 = arith.constant 0 : i32
    %c0_i32_1 = arith.constant 0 : i32
    return %c0_i32, %c0_i32_0 : i32, i32
  }
  func.func @transform_5(%arg0: i32, %arg1: i32) -> (i32, i32, i32, i32) {
    %c0_i32 = arith.constant 0 : i32
    %c0_i32_0 = arith.constant 0 : i32
    %c0_i32_1 = arith.constant 0 : i32
    return %arg0, %c0_i32, %arg1, %c0_i32_0 : i32, i32, i32, i32
  }
  func.func @transform_6(%arg0: i32, %arg1: i32) -> (i32, i32, i32, i32) {
    %c0_i32 = arith.constant 0 : i32
    %c0_i32_0 = arith.constant 0 : i32
    %c0_i32_1 = arith.constant 0 : i32
    return %arg0, %c0_i32, %arg1, %c0_i32_0 : i32, i32, i32, i32
  }
  func.func @transform_7(%arg0: i32, %arg1: i32) -> (i32, i32, i32, i32) {
    %c0_i32 = arith.constant 0 : i32
    %c0_i32_0 = arith.constant 0 : i32
    %c0_i32_1 = arith.constant 0 : i32
    return %arg0, %c0_i32, %arg1, %c0_i32_0 : i32, i32, i32, i32
  }
}

</mosaic_0001>

<bundles_post_ra>
// kernel: tpu_custom_call.1
= control target key start
LH: loop header
LB: loop body
LE: loop exit
PB: predicated region body
PF: predicated region fallthrough
CT: control target
= control target key end

     0   :  { %6 = vsyncpa [#allocation3], 0  ;;  %s341_s0 = inlined_call_operand.hbm [shape: f32[8,128], index: 0, kind: input, shape index: {}]   ;;  %s342_s1 = inlined_call_operand.hbm [shape: f32[8,128], index: 1, kind: output, shape index: {}]  }
   0x1   :  { %7 = vsyncpa [#allocation4], 0  ;;  %s262_s6 = smov 0  }
   0x2 LB: > { %s145_s7 = sadd.s32 4294967295, %s248_s6   ;;  %p146_p0 = scmp.ge.s32.totalorder %s248_s6, 1  ;;  %s248_s6 = sphi %s262_s6, %s13_s6  }
   0x3   : > { %p60_p1 = scmp.lt.s32.totalorder %s248_s6, 3  ;;  %p276_p3 = scmp.eq.s32.totalorder %s145_s7, 0 }
   0x4   : > { %s250_s10 = smov [#allocation2]   ;;  %s180_s15 = scalar_lea.hbm %s341_s0, 128 }
   0x5   : > { %p270_p2 = pnand %p146_p0, %p60_p1  ;;  %s73_s11 = sshll.u32 %s250_s10, 4  ;;  %s74_s11 = int_to_ptr.vmem [resolvable:$true] %s73_s11 }
   0x6   : > { %s347_s9 = scalar_select %p276_p3, 1, 0 }
   0x7   : > { %s346_s8 = scalar_select %p270_p2, 1, 0 }
   0x8   : > { %p162_p4 = pneg %p270_p2  ;;  %p181_p6 = scmp.ne.s32.totalorder %s341_s0, %s180_s15 }
   0x9   : > { %p187_p10 = scmp.lt.u32.totalorder %s180_s15, %s341_s0 }
   0xa   : > { %p284_p5 = pnand %p276_p3, %p162_p4 }
   0xc   : > { %p182_p7 = pneg %p284_p5 }
   0xe   : > { %p183_p8 = pnand %p182_p7, %p181_p6 }
  0x10   : > { %p184_p9 = pneg %p183_p8 }
  0x12   : > { %p189_p11 = pnand %p187_p10, %p184_p9 }
  0x14   : > { %192 = shalt.err (!%p189_p11)
}
  0x15   : > { %s193_s20 = scalar_lea.vmem %s74_s11, 128  ;;  %p201_p1 = scmp.lt.s32.totalorder %s74_s11, %s74_s11 }
  0x16   : > { %p194_p12 = scmp.ne.s32.totalorder %s74_s11, %s193_s20  ;;  %p202_p4 = scmp.lt.s32.totalorder %s193_s20, %s193_s20 }
  0x18   : > { %p196_p13 = pnand %p194_p12, %p182_p7  ;;  %p203_p3 = por %p202_p4, %p201_p1 }
  0x1a   : > { %p197_p0 = pneg %p196_p13 }
  0x1c   : > { %p204_p2 = pnand %p203_p3, %p197_p0 }
  0x1e   : > { %207 = shalt.err (!%p204_p2)
}
  0x1f   : > { %165 = dma.hbm_to_vmem [thread:$0]  (!%p284_p5), %s341_s0, 128, %s74_s11, [#allocation3]  }
  0x20   : > { %p349_p6 = scmp.ne.s32.totalorder %s346_s8, 0 }
  0x21   : > { %p350_p8 = scmp.ne.s32.totalorder (!%p349_p6), %s347_s9, 0 }
  0x22   : > { %86 = sbr.rel (%p349_p6) target bundleno = 67 (0x43), region = 24 }
  0x29   : > { %239 = dma.done.wait (%p350_p8), [#allocation3], 128  }
  0x2a   : > { %241 = vsyncadd (%p350_p8), [#allocation3], 4294967168  ;;  %s251_s23 = smov [#allocation5]   ;;  %v96_v0 = vld [vmem:[#allocation2] sm:$0xff]  ;;  %p312_p2 = scmp.eq.s32.totalorder %s145_s7, 1 }
  0x2b   : > { %s106_s24 = sshll.u32 %s251_s23, 4  ;;  %v97_v1 = vadd.f32 1.0, %v96_v0  ;;  %s107_s24 = int_to_ptr.vmem [resolvable:$true] %s106_s24 }
  0x2c   : > { %s208_s26 = scalar_lea.vmem %s107_s24, 128  ;;  %p215_p9 = scmp.lt.s32.totalorder %s107_s24, %s107_s24 }
  0x2d   : > { %98 = vst [vmem:[#allocation5] sm:$0xff] %v97_v1  ;;  %p209_p3 = scmp.ne.s32.totalorder %s107_s24, %s208_s26  ;;  %p216_p10 = scmp.lt.s32.totalorder %s208_s26, %s208_s26 }
  0x2f   : > { %p210_p5 = pnand %p209_p3, %p312_p2  ;;  %p217_p11 = por %p216_p10, %p215_p9 }
  0x31   : > { %p211_p7 = pneg %p210_p5 }
  0x33   : > { %p218_p12 = pnand %p217_p11, %p211_p7 }
  0x35   : > { %221 = shalt.err (!%p218_p12)
}
  0x36   : > { %s222_s29 = scalar_lea.hbm %s342_s1, 128 }
  0x37   : > { %p223_p13 = scmp.ne.s32.totalorder %s342_s1, %s222_s29  ;;  %p228_p4 = scmp.lt.u32.totalorder %s222_s29, %s342_s1 }
  0x39   : > { %p224_p0 = pnand %p223_p13, %p312_p2 }
  0x3b   : > { %p225_p1 = pneg %p224_p0 }
  0x3d   : > { %p230_p6 = pnand %p228_p4, %p225_p1 }
  0x3f   : > { %233 = shalt.err (!%p230_p6)
}
  0x40   : > { %159 = dma.vmem_to_hbm [thread:$0]  (%p312_p2), %s107_s24, 128, %s342_s1, [#allocation4]  }
  0x41   : > { %243 = dma.done.wait (%p312_p2), [#allocation4], 128  }
  0x42   : > { %245 = vsyncadd (%p312_p2), [#allocation4], 4294967168 }
  0x43 PF: > { %s13_s6 = sadd.s32 1, %s248_s6  }
  0x44   : > { %p10_p8 = scmp.ge.s32.totalorder %s13_s6, 4  }
  0x46   :  { %12 = sbr.rel (!%p10_p8) target bundleno = 2 (0x2), region = 53 }
  0x4d   :  { %119 = vsyncpa [#allocation3], 1 }
  0x4e   :  { %121 = vsyncpa [#allocation3 + $0x1], 1 }
  0x4f   :  { %122 = vsyncpa [#allocation4], 1 }
  0x50   :  { %124 = vsyncpa [#allocation4 + $0x1], 1 }

// kernel: tpu_custom_call.1
= control target key start
LH: loop header
LB: loop body
LE: loop exit
PB: predicated region body
PF: predicated region fallthrough
CT: control target
= control target key end

     0   :  { %s9198_s24 = smov 0   ;;  %s9200_s1 = smov 0   ;;  %s12285_s0 = inlined_call_operand.vmem [shape: f32[2,256,32], index: 0, kind: input, shape index: {}]   ;;  %s12286_s1 = inlined_call_operand.vmem [shape: f32[1,32], index: 1, kind: input, shape index: {}]   ;;  %s12287_s2 = inlined_call_operand.vmem [shape: f32[1,32], index: 2, kind: input, shape index: {}]   ;;  %s12288_s3 = inlined_call_operand.vmem [shape: f32[32,96], index: 3, kind: input, shape index: {}]   ;;  %s12289_s4 = inlined_call_operand.vmem [shape: f32[1,96], index: 4, kind: input, shape index: {}]   ;;  %s12290_s5 = inlined_call_operand.vmem [shape: f32[2,4,256,8], index: 5, kind: output, shape index: {0}]   ;;  %s12291_s6 = inlined_call_operand.vmem [shape: f32[2,4,256,8], index: 6, kind: output, shape index: {1}]   ;;  %s12292_s7 = inlined_call_operand.vmem [shape: f32[2,4,256,8], index: 7, kind: output, shape index: {2}]  }
   0x1   :  { %s9202_s2 = smov 0   ;;  %s9204_s25 = smov 0  }
   0x2   :  { %s9206_s26 = smov 0   ;;  %s9208_s27 = smov 0  }
   0x3   :  { %s9210_s28 = smov 0  }
   0x4 LB: > { %s27_s29 = sadd.s32 1, %s9141_s26  ;;  %s30_s30 = sadd.s32 1, %s9145_s27  ;;  %s9149_s28 = sphi %s9210_s28, %s18_s28   ;;  %s9145_s27 = sphi %s9208_s27, %s12366_s27   ;;  %s9141_s26 = sphi %s9206_s26, %s12365_s26   ;;  %s9137_s25 = sphi %s9204_s25, %s12364_s25   ;;  %s9133_s2 = sphi %s9202_s2, %s12363_s2   ;;  %s9129_s1 = sphi %s9200_s1, %s12362_s1   ;;  %s9125_s24 = sphi %s9198_s24, %s12361_s24  }
   0x5   : > { %p28_p0 = scmp.ge.s32.totalorder %s27_s29, 2  ;;  %s8830_s8 = sadd.s32 4294967295, %s9149_s28  }
   0x6   : > { %p161_p1 = scmp.ne.s32.totalorder %s9129_s1, %s9125_s24  ;;  %p162_p2 = scmp.eq.s32.totalorder %s8830_s8, 3 }
   0x7   : > { %s12368_s29 = smov (%p28_p0, %s27_s29), 0  ;;  %s12370_s30 = smov (!%p28_p0, %s30_s30), %s9145_s27 }
   0x8   : > { %s147_s9 = ssub.s32 %s9141_s26, %s12368_s29  ;;  %p32_p3 = scmp.ge.s32.totalorder %s12370_s30, 2 }
   0x9   : > { %p8834_p4 = scmp.ge.s32.totalorder %s9149_s28, 1  ;;  %p9242_p5 = por %p162_p2, %p161_p1 }
   0xa   : > { %p267_p6 = scmp.lt.s32.totalorder %s9149_s28, 5  ;;  %s12372_s30 = smov (%p32_p3, %s12370_s30), 0 }
   0xb   : > { %s146_s11 = ssub.s32 %s9145_s27, %s12372_s30  ;;  %s151_s13 = sadd.s32 1, %s9129_s1 }
   0xc   : > { %p268_p7 = pnand %p8834_p4, %p267_p6  ;;  %s148_s12 = sor.u32 %s147_s9, %s146_s11 }
   0xd   : > { %p149_p8 = scmp.eq.s32.totalorder %s148_s12, 0 }
   0xe   : > { %271 = sbr.rel (%p268_p7) target bundleno = 942 (0x3ae), region = 40 }
   0xf   : > { %s9253_s14 = scalar_select %p149_p8, %s9129_s1, %s151_s13  }
  0x15   : > { %v339_v0 = vld [vmem:[%s12288_s3] sm:$0xff]  ;;  %v340_v1 = vld [vmem:[%s12288_s3 + $0x8] sm:$0xff]  ;;  %v341_v2 = vld [vmem:[%s12288_s3 + $0x10] sm:$0xff]  ;;  %s9264_s21 = sshll.u32 %s9133_s2, 4  ;;  %p311_p9 = scmp.lt.s32.totalorder %s9137_s25, 1  ;;  %vm350_vm0 = vcmask 261120   ;;  %v709_v59 = vlaneseq }
  0x16   : > { %v9020_v3 = vpack.c.bf16 %v340_v1, %v339_v0  ;;  %v342_v4 = vld [vmem:[%s12288_s3 + $0x18] sm:$0xff]  ;;  %p313_p10 = scmp.lt.s32.totalorder %s9264_s21, 31  ;;  %v8841_v22 = vld [vmem:[%s12289_s4] ss:$0 sm:$0xff]  ;;  %s9151_s19 = smov 120   ;;  %vm5440_vm1 = vcmask 64512  }
  0x17   : > { %v9024_v5 = vpack.c.bf16 %v342_v4, %v341_v2  ;;  %s312_s8 = scalar_select %p311_p9, %s9137_s25, 1  ;;  %v9156_v57 = vmov 1983009808   ;;  %v9157_v62 = vmov 1934713408   ;;  %v710_v1 = vshrl.u32 %v709_v59, 7 }
  0x18   : > { %9021 = vmatprep.subr.bf16.mxu0 %v9020_v3  ;;  %9028 = vmatprep.subr.bf16.mxu1 %v9020_v3  ;;  %s314_s9 = scalar_select %p313_p10, %s9264_s21, 31  ;;  %v707_v58 = vunpack.c.l.s4 %v9156_v57  ;;  %v739_v63 = vunpack.c.l.s4 %v9157_v62 }
  0x19   : > { %9023 = vmatpush3.bf16.msra.mxu0 %v9020_v3  ;;  %9030 = vmatpush3.bf16.msra.mxu1 %v9020_v3  ;;  %s8839_s11 = sshll.u32 %s312_s8, 5  ;;  %s9152_s20 = smov 112  }
  0x1a   : > { %9025 = vmatprep.subr.bf16.mxu0 %v9024_v5  ;;  %9029 = vmatprep.subr.bf16.mxu1 %v9024_v5  ;;  %s316_s2 = sadd.s32 %s8839_s11, %s314_s9  ;;  %s9153_s22 = smov 104   ;;  %v708_v0 = vunpack.c.0.s8 %v707_v58  ;;  %v740_v4 = vunpack.c.0.s8 %v739_v63 }
  0x1b   : > { %s8840_s12 = sshll.u32 %s316_s2, 3  ;;  %s9154_s23 = smov 96  }
  0x1c   : > { %s9276_s16 = scalar_lea.vmem %s12285_s0, %s8840_s12  ;;  %s9155_s8 = smov 64  }
  0x1d   : > { %9027 = vmatpush3.bf16.msra.mxu0 %v9024_v5  ;;  %9031 = vmatpush3.bf16.msra.mxu1 %v9024_v5  ;;  %v323_v6 = vld [vmem:[%s9276_s16] sm:$0xff]  ;;  %v324_v8 = vld [vmem:[%s9276_s16 + $0x8] sm:$0xff]  ;;  %v325_v10 = vld [vmem:[%s9276_s16 + $0x10] sm:$0xff]  ;;  %v9485_v5 = vsub.s32 %v708_v0, %v710_v1  ;;  %s295_s9 = sand.u32 1, %s9125_s24   ;;  %s8958_s13 = sshll.u32 (%p9242_p5), %s9137_s25, 7 }
  0x1e   : > { %v331_v7 = vld [vmem:[%s9276_s16 + $0x40] sm:$0xff]  ;;  %8996 = vmatprep.mubr.msk.f32.mxu0 %vm350_vm0, %v323_v6  ;;  %v332_v9 = vld [vmem:[%s9276_s16 + $0x48] sm:$0xff]  ;;  %v333_v11 = vld [vmem:[%s9276_s16 + $0x50] sm:$0xff]  ;;  %s9574_s24 = sshll.u32 %s295_s9, 9  ;;  %s7826_s15 = sadd.s32 (%p9242_p5), %s8958_s13, %s9264_s21 }
  0x1f   : > { %9008 = vmatprep.mubr.msk.f32.mxu1 %vm350_vm0, %v331_v7  ;;  %v326_v12 = vld [vmem:[%s9276_s16 + $0x18] sm:$0xff]  ;;  %v327_v14 = vld [vmem:[%s9276_s16 + $0x20] sm:$0xff]  ;;  %v328_v16 = vld [vmem:[%s9276_s16 + $0x28] sm:$0xff]  ;;  %s9595_s11 = scalar_lea.vmem [#allocation2], %s9574_s24  ;;  %s10460_s2 = scalar_lea.vmem [#allocation3], %s9574_s24 }
  0x20   : > { %8997 = vmatmul.mubr.msk.f32.vlgmr.msra.gmra.mrb[0].mxu0 %vm350_vm0, %v324_v8  ;;  %9009 = vmatmul.mubr.msk.f32.vlgmr.msra.gmra.mrb[0].mxu1 %vm350_vm0, %v332_v9  ;;  %v334_v13 = vld [vmem:[%s9276_s16 + $0x58] sm:$0xff]  ;;  %v335_v15 = vld [vmem:[%s9276_s16 + $0x60] sm:$0xff]  ;;  %v336_v17 = vld [vmem:[%s9276_s16 + $0x68] sm:$0xff]  ;;  %s10681_s12 = scalar_lea.vmem [#allocation4], %s9574_s24 }
  0x21   : > { %8999 = vmatprep.mubr.msk.f32.mxu0 %vm350_vm0, %v325_v10  ;;  %9011 = vmatprep.mubr.msk.f32.mxu1 %vm350_vm0, %v333_v11  ;;  %v329_v18 = vld [vmem:[%s9276_s16 + $0x30] sm:$0xff]  ;;  %v330_v20 = vld [vmem:[%s9276_s16 + $0x38] sm:$0xff] }
  0x22   : > { %v337_v19 = vld [vmem:[%s9276_s16 + $0x70] sm:$0xff]  ;;  %v338_v21 = vld [vmem:[%s9276_s16 + $0x78] sm:$0xff]  ;;  %s8959_s16 = sshll.u32 (%p9242_p5), %s7826_s15, 3 }
  0x24   : > { %9000 = vmatmul.mubr.msk.f32.gmra.mrb[2].mxu0 %vm350_vm0, %v326_v12  ;;  %9012 = vmatmul.mubr.msk.f32.gmra.mrb[2].mxu1 %vm350_vm0, %v334_v13 }
  0x25   : > { %9002 = vmatprep.mubr.msk.f32.mxu0 %vm350_vm0, %v327_v14  ;;  %9014 = vmatprep.mubr.msk.f32.mxu1 %vm350_vm0, %v335_v15 }
  0x28   : > { %9003 = vmatmul.mubr.msk.f32.gmra.mrb[4].mxu0 %vm350_vm0, %v328_v16  ;;  %9015 = vmatmul.mubr.msk.f32.gmra.mrb[4].mxu1 %vm350_vm0, %v336_v17  ;;  %v9507_v16 = vsub.s32 %v740_v4, %v710_v1 }
  0x29   : > { %9005 = vmatprep.mubr.msk.f32.mxu0 %vm350_vm0, %v329_v18  ;;  %9017 = vmatprep.mubr.msk.f32.mxu1 %vm350_vm0, %v337_v19 }
  0x2c   : > { %9006 = vmatmul.mubr.msk.f32.gmra.mrb[6].mxu0 %vm350_vm0, %v330_v20  ;;  %9018 = vmatmul.mubr.msk.f32.gmra.mrb[6].mxu1 %vm350_vm0, %v338_v21 }
  0xf3   : > { %v8998_v23 = vpop.f32.mrb[0].mxu0  ;;  %v9010_v24 = vpop.f32.mrb[0].mxu1 }
  0xf4   : > { %v9313_v25 = vadd.f32 %v8998_v23, %v8841_v22  ;;  %v9315_v26 = vadd.f32 %v9010_v24, %v8841_v22  ;;  %v465_v27 = vpop.f32.mrb[1].mxu0  ;;  %v505_v28 = vpop.f32.mrb[1].mxu1 }
  0xf5   : > { %v9321_v31 = vadd.f32 %v8841_v22, %v465_v27  ;;  %v9327_v36 = vadd.f32 %v8841_v22, %v505_v28 }
  0xf6   : > { %578 = vrot.lane.b32.xlu1 %v9315_v26, %s9151_s19  ;;  %562 = vrot.lane.b32.xlu0 %v9313_v25, %s9151_s19 }
  0xf7   : > { %v9001_v29 = vpop.f32.mrb[2].mxu0  ;;  %v9013_v30 = vpop.f32.mrb[2].mxu1 }
  0xf8   : > { %v475_v32 = vpop.f32.mrb[3].mxu0  ;;  %v515_v33 = vpop.f32.mrb[3].mxu1  ;;  %v9371_v51 = vadd.f32 %v9001_v29, %v8841_v22  ;;  %v9375_v52 = vadd.f32 %v9013_v30, %v8841_v22 }
  0xf9   : > { %v9385_v53 = vadd.f32 %v8841_v22, %v515_v33  ;;  %v9391_v54 = vadd.f32 %v8841_v22, %v475_v32 }
  0xfa   : > { %610 = vrot.lane.b32.xlu1 %v9313_v25, %s9152_s20  ;;  %560 = vrot.lane.b32.xlu0 %v9321_v31, %s9151_s19 }
  0xfb   : > { %v9004_v34 = vpop.f32.mrb[4].mxu0  ;;  %v9016_v35 = vpop.f32.mrb[4].mxu1 }
  0xfc   : > { %v9329_v37 = vadd.f32 %v9004_v34, %v8841_v22  ;;  %v485_v38 = vpop.f32.mrb[5].mxu0  ;;  %v9331_v39 = vadd.f32 %v9016_v35, %v8841_v22  ;;  %v525_v40 = vpop.f32.mrb[5].mxu1 }
  0xfd   : > { %v9333_v41 = vadd.f32 %v8841_v22, %v485_v38  ;;  %v9335_v42 = vadd.f32 %v8841_v22, %v525_v40 }
  0xfe   : > { %626 = vrot.lane.b32.xlu1 %v9315_v26, %s9152_s20  ;;  %576 = vrot.lane.b32.xlu0 %v9327_v36, %s9151_s19 }
  0xff   : > { %v9007_v43 = vpop.f32.mrb[6].mxu0  ;;  %v9019_v44 = vpop.f32.mrb[6].mxu1 }
 0x100   : > { %v9341_v45 = vadd.f32 %v9007_v43, %v8841_v22  ;;  %v495_v46 = vpop.f32.mrb[7].mxu0  ;;  %v9343_v47 = vadd.f32 %v9019_v44, %v8841_v22  ;;  %v535_v48 = vpop.f32.mrb[7].mxu1 }
 0x101   : > { %v9345_v49 = vadd.f32 %v8841_v22, %v495_v46  ;;  %v9347_v50 = vadd.f32 %v8841_v22, %v535_v48 }
 0x102   : > { %658 = vrot.lane.b32.xlu1 %v9313_v25, %s9153_s22  ;;  %608 = vrot.lane.b32.xlu0 %v9321_v31, %s9152_s20 }
 0x106   : > { %674 = vrot.lane.b32.xlu1 %v9315_v26, %s9153_s22  ;;  %624 = vrot.lane.b32.xlu0 %v9327_v36, %s9152_s20 }
 0x10a   : > { %1794 = vrot.lane.b32.xlu1 %v9313_v25, %s9154_s23  ;;  %656 = vrot.lane.b32.xlu0 %v9321_v31, %s9153_s22 }
 0x10e   : > { %1810 = vrot.lane.b32.xlu1 %v9315_v26, %s9154_s23  ;;  %672 = vrot.lane.b32.xlu0 %v9327_v36, %s9153_s22 }
 0x112   : > { %3074 = vrot.lane.b32.xlu1 %v9313_v25, %s9155_s8  ;;  %1792 = vrot.lane.b32.xlu0 %v9321_v31, %s9154_s23 }
 0x116   : > { %3090 = vrot.lane.b32.xlu1 %v9315_v26, %s9155_s8  ;;  %1808 = vrot.lane.b32.xlu0 %v9327_v36, %s9154_s23 }
 0x11a   : > { %566 = vrot.lane.b32.xlu1 %v9371_v51, %s9151_s19  ;;  %3072 = vrot.lane.b32.xlu0 %v9321_v31, %s9155_s8 }
 0x11e   : > { %582 = vrot.lane.b32.xlu1 %v9375_v52, %s9151_s19  ;;  %3088 = vrot.lane.b32.xlu0 %v9327_v36, %s9155_s8 }
 0x122   : > { %614 = vrot.lane.b32.xlu1 %v9371_v51, %s9152_s20  ;;  %580 = vrot.lane.b32.xlu0 %v9385_v53, %s9151_s19 }
 0x126   : > { %630 = vrot.lane.b32.xlu1 %v9375_v52, %s9152_s20  ;;  %612 = vrot.lane.b32.xlu0 %v9391_v54, %s9152_s20 }
 0x12a   : > { %662 = vrot.lane.b32.xlu1 %v9371_v51, %s9153_s22  ;;  %628 = vrot.lane.b32.xlu0 %v9385_v53, %s9152_s20 }
 0x12e   : > { %678 = vrot.lane.b32.xlu1 %v9375_v52, %s9153_s22  ;;  %660 = vrot.lane.b32.xlu0 %v9391_v54, %s9153_s22 }
 0x132   : > { %1798 = vrot.lane.b32.xlu1 %v9371_v51, %s9154_s23  ;;  %676 = vrot.lane.b32.xlu0 %v9385_v53, %s9153_s22 }
 0x136   : > { %1814 = vrot.lane.b32.xlu1 %v9375_v52, %s9154_s23  ;;  %1796 = vrot.lane.b32.xlu0 %v9391_v54, %s9154_s23 }
 0x13a   : > { %3078 = vrot.lane.b32.xlu1 %v9371_v51, %s9155_s8  ;;  %1812 = vrot.lane.b32.xlu0 %v9385_v53, %s9154_s23 }
 0x13e   : > { %3094 = vrot.lane.b32.xlu1 %v9375_v52, %s9155_s8  ;;  %3076 = vrot.lane.b32.xlu0 %v9391_v54, %s9155_s8 }
 0x142   : > { %564 = vrot.lane.b32.xlu1 %v9391_v54, %s9151_s19  ;;  %3092 = vrot.lane.b32.xlu0 %v9385_v53, %s9155_s8 }
 0x146   : > { %570 = vrot.lane.b32.xlu1 %v9329_v37, %s9151_s19  ;;  %568 = vrot.lane.b32.xlu0 %v9333_v41, %s9151_s19 }
 0x14a   : > { %586 = vrot.lane.b32.xlu1 %v9331_v39, %s9151_s19  ;;  %584 = vrot.lane.b32.xlu0 %v9335_v42, %s9151_s19 }
 0x14e   : > { %618 = vrot.lane.b32.xlu1 %v9329_v37, %s9152_s20  ;;  %616 = vrot.lane.b32.xlu0 %v9333_v41, %s9152_s20 }
 0x152   : > { %634 = vrot.lane.b32.xlu1 %v9331_v39, %s9152_s20  ;;  %632 = vrot.lane.b32.xlu0 %v9335_v42, %s9152_s20 }
 0x156   : > { %666 = vrot.lane.b32.xlu1 %v9329_v37, %s9153_s22  ;;  %664 = vrot.lane.b32.xlu0 %v9333_v41, %s9153_s22 }
 0x15a   : > { %682 = vrot.lane.b32.xlu1 %v9331_v39, %s9153_s22  ;;  %680 = vrot.lane.b32.xlu0 %v9335_v42, %s9153_s22 }
 0x15e   : > { %1802 = vrot.lane.b32.xlu1 %v9329_v37, %s9154_s23  ;;  %1800 = vrot.lane.b32.xlu0 %v9333_v41, %s9154_s23 }
 0x162   : > { %1818 = vrot.lane.b32.xlu1 %v9331_v39, %s9154_s23  ;;  %1816 = vrot.lane.b32.xlu0 %v9335_v42, %s9154_s23 }
 0x166   : > { %3082 = vrot.lane.b32.xlu1 %v9329_v37, %s9155_s8  ;;  %3080 = vrot.lane.b32.xlu0 %v9333_v41, %s9155_s8 }
 0x168   : > { %v9461_v55 = vpop.permute.xlu1 %578  ;;  %v9463_v56 = vpop.permute.xlu0 %562 }
 0x16a   : > { %3098 = vrot.lane.b32.xlu1 %v9331_v39, %s9155_s8  ;;  %3096 = vrot.lane.b32.xlu0 %v9335_v42, %s9155_s8 }
 0x16c   : > { %v9469_v60 = vpop.permute.xlu1 %610  ;;  %v9471_v61 = vpop.permute.xlu0 %560 }
 0x16d   : > { %v772_v6 = vcombine.low %v9313_v25, %v9469_v60  ;;  %v773_v7 = vcombine.high %v9313_v25, %v9469_v60 }
 0x16e   : > { %574 = vrot.lane.b32.xlu1 %v9341_v45, %s9151_s19  ;;  %572 = vrot.lane.b32.xlu0 %v9345_v49, %s9151_s19 }
 0x16f   : > { %v780_v17 = vrot.slane %v772_v6, %v9485_v5  ;;  %v787_v18 = vrot.slane %v773_v7, %v9485_v5 }
 0x170   : > { %v9477_v2 = vpop.permute.xlu1 %626  ;;  %v9479_v3 = vpop.permute.xlu0 %576 }
 0x171   : > { %v1316_v8 = vcombine.low %v9315_v26, %v9477_v2  ;;  %v1317_v9 = vcombine.high %v9315_v26, %v9477_v2 }
 0x172   : > { %590 = vrot.lane.b32.xlu1 %v9343_v47, %s9151_s19  ;;  %588 = vrot.lane.b32.xlu0 %v9347_v50, %s9151_s19  ;;  %s11869_s19 = scalar_lea.vmem (%p9242_p5), %s12290_s5, %s8959_s16 }
 0x173   : > { %v1324_v21 = vrot.slane %v1316_v8, %v9485_v5  ;;  %v1331_v22 = vrot.slane %v1317_v9, %v9485_v5 }
 0x174   : > { %v9495_v10 = vpop.permute.xlu1 %658  ;;  %v9497_v11 = vpop.permute.xlu0 %608 }
 0x175   : > { %v788_v12 = vcombine.low %v9463_v56, %v9495_v10  ;;  %v789_v13 = vcombine.high %v9463_v56, %v9495_v10  ;;  %v704_v14 = vcombine.low %v9321_v31, %v9497_v11  ;;  %v705_v15 = vcombine.high %v9321_v31, %v9497_v11 }
 0x176   : > { %622 = vrot.lane.b32.xlu1 %v9341_v45, %s9152_s20  ;;  %620 = vrot.lane.b32.xlu0 %v9345_v49, %s9152_s20 }
 0x177   : > { %v796_v19 = vrot.slane %v788_v12, %v9485_v5  ;;  %v803_v20 = vrot.slane %v789_v13, %v9485_v5  ;;  %v9520_v23 = vrot.slane %v704_v14, %v9485_v5  ;;  %v9523_v24 = vrot.slane %v705_v15, %v9485_v5 }
 0x178   : > { %v9525_v25 = vpop.permute.xlu1 %674  ;;  %v9527_v26 = vpop.permute.xlu0 %624 }
 0x179   : > { %v804_v27 = vcombine.low %v780_v17, %v796_v19  ;;  %v805_v28 = vcombine.high %v780_v17, %v796_v19  ;;  %v820_v29 = vcombine.low %v787_v18, %v803_v20  ;;  %v821_v30 = vcombine.high %v787_v18, %v803_v20 }
 0x17a   : > { %v1332_v31 = vcombine.low %v9461_v55, %v9525_v25  ;;  %v1333_v32 = vcombine.high %v9461_v55, %v9525_v25  ;;  %v1248_v33 = vcombine.low %v9327_v36, %v9527_v26  ;;  %v1249_v34 = vcombine.high %v9327_v36, %v9527_v26  ;;  %638 = vrot.lane.b32.xlu1 %v9343_v47, %s9152_s20 }
 0x17b   : > { %v812_v35 = vrot.slane %v804_v27, %v9507_v16  ;;  %v819_v38 = vrot.slane %v805_v28, %v9507_v16  ;;  %v828_v40 = vrot.slane %v820_v29, %v9507_v16  ;;  %v835_v43 = vrot.slane %v821_v30, %v9507_v16  ;;  %636 = vrot.lane.b32.xlu0 %v9347_v50, %s9152_s20 }
 0x17c   : > { %v1340_v44 = vrot.slane %v1332_v31, %v9485_v5  ;;  %v1347_v36 = vrot.slane %v1333_v32, %v9485_v5  ;;  %v9548_v46 = vrot.slane %v1248_v33, %v9485_v5  ;;  %v9551_v48 = vrot.slane %v1249_v34, %v9485_v5  ;;  %v9553_v57 = vpop.permute.xlu1 %1794  ;;  %v9555_v58 = vpop.permute.xlu0 %656 }
 0x17d   : > { %v4420_v59 = vcombine.low %v812_v35, %v819_v38  ;;  %v8860_v62 = vcombine.high %v812_v35, %v819_v38  ;;  %v4436_v63 = vcombine.low %v828_v40, %v835_v43  ;;  %v8861_v0 = vcombine.high %v828_v40, %v835_v43 }
 0x17e   : > { %v1348_v1 = vcombine.low %v1324_v21, %v1340_v44  ;;  %v1349_v4 = vcombine.high %v1324_v21, %v1340_v44  ;;  %v1364_v6 = vcombine.low %v1331_v22, %v1347_v36  ;;  %v1365_v7 = vcombine.high %v1331_v22, %v1347_v36  ;;  %670 = vrot.lane.b32.xlu1 %v9341_v45, %s9153_s22 }
 0x17f   : > { %v4427_v8 = vrot.slane %v4420_v59, %v9485_v5  ;;  %v4435_v9 = vrot.slane %v8860_v62, %v9485_v5  ;;  %v4443_v12 = vrot.slane %v4436_v63, %v9485_v5  ;;  %v4451_v13 = vrot.slane %v8861_v0, %v9485_v5  ;;  %668 = vrot.lane.b32.xlu0 %v9345_v49, %s9153_s22 }
 0x180   : > { %v1356_v14 = vrot.slane %v1348_v1, %v9507_v16  ;;  %v1363_v15 = vrot.slane %v1349_v4, %v9507_v16  ;;  %v1372_v17 = vrot.slane %v1364_v6, %v9507_v16  ;;  %v1379_v18 = vrot.slane %v1365_v7, %v9507_v16  ;;  %v9570_v19 = vpop.permute.xlu1 %1810  ;;  %v9572_v20 = vpop.permute.xlu0 %672 }
 0x181   : > { %v4452_v21 = vcombine.low %v4427_v8, %v4435_v9  ;;  %v4453_v22 = vcombine.high %v4427_v8, %v4435_v9  ;;  %v4468_v27 = vcombine.low %v4443_v12, %v4451_v13  ;;  %v4469_v28 = vcombine.high %v4443_v12, %v4451_v13 }
 0x182   : > { %v4964_v29 = vcombine.low %v1356_v14, %v1363_v15  ;;  %v8876_v30 = vcombine.high %v1356_v14, %v1363_v15  ;;  %v4980_v31 = vcombine.low %v1372_v17, %v1379_v18  ;;  %v8877_v32 = vcombine.high %v1372_v17, %v1379_v18  ;;  %686 = vrot.lane.b32.xlu1 %v9343_v47, %s9153_s22 }
 0x183   : > { %v4460_v33 = vrot.slane %v4452_v21, %v9507_v16  ;;  %v4467_v34 = vrot.slane %v4453_v22, %v9507_v16  ;;  %v4476_v35 = vrot.slane %v4468_v27, %v9507_v16  ;;  %v4483_v38 = vrot.slane %v4469_v28, %v9507_v16  ;;  %684 = vrot.lane.b32.xlu0 %v9347_v50, %s9153_s22 }
 0x184   : > { %v4971_v40 = vrot.slane %v4964_v29, %v9485_v5  ;;  %v4979_v43 = vrot.slane %v8876_v30, %v9485_v5  ;;  %v4987_v44 = vrot.slane %v4980_v31, %v9485_v5  ;;  %v4995_v36 = vrot.slane %v8877_v32, %v9485_v5  ;;  %v9588_v59 = vpop.permute.xlu1 %3074  ;;  %v9590_v62 = vpop.permute.xlu0 %1792 }
 0x185   : > { %v4484_v63 = vcombine.low %v4460_v33, %v4476_v35  ;;  %v4485_v0 = vcombine.high %v4460_v33, %v4476_v35  ;;  %v4486_v1 = vcombine.low %v4467_v34, %v4483_v38  ;;  %v4487_v4 = vcombine.high %v4467_v34, %v4483_v38 }
 0x186   : > { %v4996_v6 = vcombine.low %v4971_v40, %v4979_v43  ;;  %v4997_v7 = vcombine.high %v4971_v40, %v4979_v43  ;;  %v5012_v8 = vcombine.low %v4987_v44, %v4995_v36  ;;  %v5013_v9 = vcombine.high %v4987_v44, %v4995_v36  ;;  %1806 = vrot.lane.b32.xlu1 %v9341_v45, %s9154_s23 }
 0x187   : > { %5442 = vst.msk [vmem:[%s9595_s11 + $0x8] sm:$0xff] %vm5440_vm1, %v4484_v63  ;;  %5458 = vst.msk [vmem:[%s9595_s11 + $0x88] sm:$0xff] %vm5440_vm1, %v4485_v0  ;;  %v720_v12 = vcombine.low %v9471_v61, %v9555_v58  ;;  %v721_v13 = vcombine.high %v9471_v61, %v9555_v58  ;;  %v1264_v14 = vcombine.low %v9479_v3, %v9572_v20  ;;  %1804 = vrot.lane.b32.xlu0 %v9345_v49, %s9154_s23 }
 0x188   : > { %5474 = vst.msk [vmem:[%s9595_s11 + $0x108] sm:$0xff] %vm5440_vm1, %v4486_v1  ;;  %5490 = vst.msk [vmem:[%s9595_s11 + $0x188] sm:$0xff] %vm5440_vm1, %v4487_v4  ;;  %v1265_v15 = vcombine.high %v9479_v3, %v9572_v20  ;;  %v5004_v17 = vrot.slane %v4996_v6, %v9507_v16  ;;  %v5011_v18 = vrot.slane %v4997_v7, %v9507_v16  ;;  %v9619_v27 = vpop.permute.xlu1 %3090  ;;  %v9621_v28 = vpop.permute.xlu0 %1808 }
 0x189   : > { %v5020_v21 = vrot.slane %v5012_v8, %v9507_v16  ;;  %v5027_v22 = vrot.slane %v5013_v9, %v9507_v16  ;;  %v728_v29 = vrot.slane %v720_v12, %v9485_v5  ;;  %v735_v30 = vrot.slane %v721_v13, %v9485_v5 }
 0x18a   : > { %v1272_v31 = vrot.slane %v1264_v14, %v9485_v5  ;;  %v1279_v32 = vrot.slane %v1265_v15, %v9485_v5  ;;  %1822 = vrot.lane.b32.xlu1 %v9343_v47, %s9154_s23 }
 0x18b   : > { %v5028_v33 = vcombine.low %v5004_v17, %v5020_v21  ;;  %v5029_v34 = vcombine.high %v5004_v17, %v5020_v21  ;;  %v5030_v35 = vcombine.low %v5011_v18, %v5027_v22  ;;  %v5031_v38 = vcombine.high %v5011_v18, %v5027_v22  ;;  %1820 = vrot.lane.b32.xlu0 %v9347_v50, %s9154_s23 }
 0x18c   : > { %v736_v40 = vcombine.low %v9520_v23, %v728_v29  ;;  %v737_v43 = vcombine.high %v9520_v23, %v728_v29  ;;  %v752_v44 = vcombine.low %v9523_v24, %v735_v30  ;;  %v753_v36 = vcombine.high %v9523_v24, %v735_v30  ;;  %v9647_v24 = vpop.permute.xlu1 %566  ;;  %v9649_v4 = vpop.permute.xlu0 %3072 }
 0x18d   : > { %5450 = vst.msk [vmem:[%s9595_s11 + $0x48] sm:$0xff] %vm5440_vm1, %v5028_v33  ;;  %5466 = vst.msk [vmem:[%s9595_s11 + $0xc8] sm:$0xff] %vm5440_vm1, %v5029_v34  ;;  %v1280_v63 = vcombine.low %v9548_v46, %v1272_v31  ;;  %v1281_v0 = vcombine.high %v9548_v46, %v1272_v31  ;;  %v1296_v23 = vcombine.low %v9551_v48, %v1279_v32 }
 0x18e   : > { %5482 = vst.msk [vmem:[%s9595_s11 + $0x148] sm:$0xff] %vm5440_vm1, %v5030_v35  ;;  %5498 = vst.msk [vmem:[%s9595_s11 + $0x1c8] sm:$0xff] %vm5440_vm1, %v5031_v38  ;;  %v1297_v1 = vcombine.high %v9551_v48, %v1279_v32  ;;  %v744_v6 = vrot.slane %v736_v40, %v9507_v16  ;;  %v751_v7 = vrot.slane %v737_v43, %v9507_v16  ;;  %3086 = vrot.lane.b32.xlu1 %v9341_v45, %s9155_s8 }
 0x18f   : > { %v760_v8 = vrot.slane %v752_v44, %v9507_v16  ;;  %v767_v9 = vrot.slane %v753_v36, %v9507_v16  ;;  %v1288_v12 = vrot.slane %v1280_v63, %v9507_v16  ;;  %v1295_v46 = vrot.slane %v1281_v0, %v9507_v16  ;;  %3084 = vrot.lane.b32.xlu0 %v9345_v49, %s9155_s8 }
 0x190   : > { %v1304_v13 = vrot.slane %v1296_v23, %v9507_v16  ;;  %v1311_v48 = vrot.slane %v1297_v1, %v9507_v16  ;;  %v4352_v14 = vcombine.low %v744_v6, %v751_v7  ;;  %v8858_v15 = vcombine.high %v744_v6, %v751_v7  ;;  %v9663_v31 = vpop.permute.xlu1 %582  ;;  %v9665_v32 = vpop.permute.xlu0 %3088 }
 0x191   : > { %v4368_v17 = vcombine.low %v760_v8, %v767_v9  ;;  %v8859_v18 = vcombine.high %v760_v8, %v767_v9  ;;  %v4896_v21 = vcombine.low %v1288_v12, %v1295_v46  ;;  %v8874_v22 = vcombine.high %v1288_v12, %v1295_v46  ;;  %12313 = vst [vmem:[#allocation5_spill] sm:$0xff] %v9665_v32 }
 0x192   : > { %v4912_v29 = vcombine.low %v1304_v13, %v1311_v48  ;;  %v8875_v30 = vcombine.high %v1304_v13, %v1311_v48  ;;  %v4359_v33 = vrot.slane %v4352_v14, %v9485_v5  ;;  %v4367_v34 = vrot.slane %v8858_v15, %v9485_v5  ;;  %3102 = vrot.lane.b32.xlu1 %v9343_v47, %s9155_s8 }
 0x193   : > { %v4375_v35 = vrot.slane %v4368_v17, %v9485_v5  ;;  %v4383_v38 = vrot.slane %v8859_v18, %v9485_v5  ;;  %v4903_v40 = vrot.slane %v4896_v21, %v9485_v5  ;;  %v4911_v43 = vrot.slane %v8874_v22, %v9485_v5  ;;  %3100 = vrot.lane.b32.xlu0 %v9347_v50, %s9155_s8 }
 0x194   : > { %v4919_v44 = vrot.slane %v4912_v29, %v9485_v5  ;;  %v4927_v36 = vrot.slane %v8875_v30, %v9485_v5  ;;  %v4384_v63 = vcombine.low %v4359_v33, %v4367_v34  ;;  %v4385_v0 = vcombine.high %v4359_v33, %v4367_v34  ;;  %v9679_v12 = vpop.permute.xlu1 %614  ;;  %v9681_v46 = vpop.permute.xlu0 %580 }
 0x195   : > { %v4400_v23 = vcombine.low %v4375_v35, %v4383_v38  ;;  %v4401_v1 = vcombine.high %v4375_v35, %v4383_v38  ;;  %v4928_v6 = vcombine.low %v4903_v40, %v4911_v43  ;;  %v4929_v7 = vcombine.high %v4903_v40, %v4911_v43 }
 0x196   : > { %v4944_v8 = vcombine.low %v4919_v44, %v4927_v36  ;;  %v4945_v9 = vcombine.high %v4919_v44, %v4927_v36  ;;  %v4392_v13 = vrot.slane %v4384_v63, %v9507_v16  ;;  %v4399_v48 = vrot.slane %v4385_v0, %v9507_v16  ;;  %1826 = vrot.lane.b32.xlu1 %v9463_v56, %s9154_s23 }
 0x197   : > { %v4408_v14 = vrot.slane %v4400_v23, %v9507_v16  ;;  %v4415_v15 = vrot.slane %v4401_v1, %v9507_v16  ;;  %v4936_v17 = vrot.slane %v4928_v6, %v9507_v16  ;;  %v4943_v18 = vrot.slane %v4929_v7, %v9507_v16  ;;  %1824 = vrot.lane.b32.xlu0 %v9471_v61, %s9154_s23 }
 0x198   : > { %v4952_v21 = vrot.slane %v4944_v8, %v9507_v16  ;;  %v4959_v22 = vrot.slane %v4945_v9, %v9507_v16  ;;  %v9695_v44 = vpop.permute.xlu1 %630  ;;  %v9697_v36 = vpop.permute.xlu0 %612  ;;  %v908_v63 = vcombine.low %v9371_v51, %v9679_v12  ;;  %v909_v0 = vcombine.high %v9371_v51, %v9679_v12 }
 0x199   : > { %v4416_v29 = vcombine.low %v4392_v13, %v4408_v14  ;;  %v4417_v30 = vcombine.high %v4392_v13, %v4408_v14  ;;  %v4418_v33 = vcombine.low %v4399_v48, %v4415_v15  ;;  %v4419_v34 = vcombine.high %v4399_v48, %v4415_v15 }
 0x19a   : > { %v4960_v35 = vcombine.low %v4936_v17, %v4952_v21  ;;  %v4961_v38 = vcombine.high %v4936_v17, %v4952_v21  ;;  %v4962_v40 = vcombine.low %v4943_v18, %v4959_v22  ;;  %v4963_v43 = vcombine.high %v4943_v18, %v4959_v22  ;;  %1842 = vrot.lane.b32.xlu1 %v9461_v55, %s9154_s23 }
 0x19b   : > { %5441 = vst.msk [vmem:[%s9595_s11] sm:$0xff] %vm5440_vm1, %v4416_v29  ;;  %5457 = vst.msk [vmem:[%s9595_s11 + $0x80] sm:$0xff] %vm5440_vm1, %v4417_v30  ;;  %1840 = vrot.lane.b32.xlu0 %v9479_v3, %s9154_s23  ;;  %v1452_v8 = vcombine.low %v9375_v52, %v9695_v44  ;;  %v1453_v9 = vcombine.high %v9375_v52, %v9695_v44  ;;  %v916_v51 = vrot.slane %v908_v63, %v9485_v5 }
 0x19c   : > { %5473 = vst.msk [vmem:[%s9595_s11 + $0x100] sm:$0xff] %vm5440_vm1, %v4418_v33  ;;  %5489 = vst.msk [vmem:[%s9595_s11 + $0x180] sm:$0xff] %vm5440_vm1, %v4419_v34  ;;  %v9723_v23 = vpop.permute.xlu1 %662  ;;  %v9725_v1 = vpop.permute.xlu0 %628  ;;  %v923_v13 = vrot.slane %v909_v0, %v9485_v5 }
 0x19d   : > { %5449 = vst.msk [vmem:[%s9595_s11 + $0x40] sm:$0xff] %vm5440_vm1, %v4960_v35  ;;  %5465 = vst.msk [vmem:[%s9595_s11 + $0xc0] sm:$0xff] %vm5440_vm1, %v4961_v38  ;;  %v924_v6 = vcombine.low %v9647_v24, %v9723_v23  ;;  %v925_v7 = vcombine.high %v9647_v24, %v9723_v23  ;;  %v1460_v29 = vrot.slane %v1452_v8, %v9485_v5 }
 0x19e   : > { %5481 = vst.msk [vmem:[%s9595_s11 + $0x140] sm:$0xff] %vm5440_vm1, %v4962_v40  ;;  %5497 = vst.msk [vmem:[%s9595_s11 + $0x1c0] sm:$0xff] %vm5440_vm1, %v4963_v43  ;;  %1858 = vrot.lane.b32.xlu1 %v9469_v60, %s9154_s23  ;;  %v1467_v30 = vrot.slane %v1453_v9, %v9485_v5 }
 0x19f   : > { %v932_v48 = vrot.slane %v924_v6, %v9485_v5  ;;  %v939_v14 = vrot.slane %v925_v7, %v9485_v5  ;;  %1856 = vrot.lane.b32.xlu0 %v9497_v11, %s9154_s23 }
 0x1a0   : > { %v9743_v15 = vpop.permute.xlu1 %678  ;;  %v9745_v17 = vpop.permute.xlu0 %660 }
 0x1a1   : > { %v940_v18 = vcombine.low %v916_v51, %v932_v48  ;;  %v941_v52 = vcombine.high %v916_v51, %v932_v48  ;;  %v956_v21 = vcombine.low %v923_v13, %v939_v14  ;;  %v957_v22 = vcombine.high %v923_v13, %v939_v14 }
 0x1a2   : > { %v1468_v33 = vcombine.low %v9663_v31, %v9743_v15  ;;  %v1469_v34 = vcombine.high %v9663_v31, %v9743_v15  ;;  %1874 = vrot.lane.b32.xlu1 %v9477_v2, %s9154_s23 }
 0x1a3   : > { %v948_v35 = vrot.slane %v940_v18, %v9507_v16  ;;  %v955_v38 = vrot.slane %v941_v52, %v9507_v16  ;;  %v964_v40 = vrot.slane %v956_v21, %v9507_v16  ;;  %v971_v43 = vrot.slane %v957_v22, %v9507_v16  ;;  %1872 = vrot.lane.b32.xlu0 %v9527_v26, %s9154_s23 }
 0x1a4   : > { %v1476_v6 = vrot.slane %v1468_v33, %v9485_v5  ;;  %v1483_v7 = vrot.slane %v1469_v34, %v9485_v5  ;;  %v9767_v8 = vpop.permute.xlu1 %1798  ;;  %v9769_v9 = vpop.permute.xlu0 %676 }
 0x1a5   : > { %12314 = vst [vmem:[#allocation6_spill] sm:$0xff] %v9767_v8  ;;  %v4556_v51 = vcombine.low %v948_v35, %v955_v38  ;;  %v8864_v13 = vcombine.high %v948_v35, %v955_v38  ;;  %v4572_v48 = vcombine.low %v964_v40, %v971_v43  ;;  %v8865_v14 = vcombine.high %v964_v40, %v971_v43 }
 0x1a6   : > { %v1484_v18 = vcombine.low %v1460_v29, %v1476_v6  ;;  %v1485_v52 = vcombine.high %v1460_v29, %v1476_v6  ;;  %v1500_v21 = vcombine.low %v1467_v30, %v1483_v7  ;;  %v1501_v22 = vcombine.high %v1467_v30, %v1483_v7  ;;  %1890 = vrot.lane.b32.xlu1 %v9495_v10, %s9154_s23 }
 0x1a7   : > { %v4563_v0 = vrot.slane %v4556_v51, %v9485_v5  ;;  %v4571_v33 = vrot.slane %v8864_v13, %v9485_v5  ;;  %v4579_v34 = vrot.slane %v4572_v48, %v9485_v5  ;;  %v4587_v63 = vrot.slane %v8865_v14, %v9485_v5  ;;  %1888 = vrot.lane.b32.xlu0 %v9555_v58, %s9154_s23 }
 0x1a8   : > { %v1492_v35 = vrot.slane %v1484_v18, %v9507_v16  ;;  %v1499_v29 = vrot.slane %v1485_v52, %v9507_v16  ;;  %v1508_v30 = vrot.slane %v1500_v21, %v9507_v16  ;;  %v1515_v38 = vrot.slane %v1501_v22, %v9507_v16  ;;  %v9783_v40 = vpop.permute.xlu1 %1814  ;;  %v9785_v43 = vpop.permute.xlu0 %1796 }
 0x1a9   : > { %12315 = vst [vmem:[#allocation7_spill] sm:$0xff] %v9783_v40  ;;  %v4588_v6 = vcombine.low %v4563_v0, %v4571_v33  ;;  %v4589_v7 = vcombine.high %v4563_v0, %v4571_v33  ;;  %v4604_v51 = vcombine.low %v4579_v34, %v4587_v63  ;;  %v4605_v13 = vcombine.high %v4579_v34, %v4587_v63 }
 0x1aa   : > { %v5100_v48 = vcombine.low %v1492_v35, %v1499_v29  ;;  %v8880_v14 = vcombine.high %v1492_v35, %v1499_v29  ;;  %v5116_v8 = vcombine.low %v1508_v30, %v1515_v38  ;;  %v8881_v32 = vcombine.high %v1508_v30, %v1515_v38  ;;  %1906 = vrot.lane.b32.xlu1 %v9525_v25, %s9154_s23 }
 0x1ab   : > { %v4596_v18 = vrot.slane %v4588_v6, %v9507_v16  ;;  %v4603_v52 = vrot.slane %v4589_v7, %v9507_v16  ;;  %v4612_v21 = vrot.slane %v4604_v51, %v9507_v16  ;;  %v4619_v22 = vrot.slane %v4605_v13, %v9507_v16  ;;  %1904 = vrot.lane.b32.xlu0 %v9572_v20, %s9154_s23 }
 0x1ac   : > { %v5107_v63 = vrot.slane %v5100_v48, %v9485_v5  ;;  %v5115_v0 = vrot.slane %v8880_v14, %v9485_v5  ;;  %v5123_v33 = vrot.slane %v5116_v8, %v9485_v5  ;;  %v5131_v34 = vrot.slane %v8881_v32, %v9485_v5  ;;  %v9799_v35 = vpop.permute.xlu1 %3078  ;;  %v9801_v29 = vpop.permute.xlu0 %1812 }
 0x1ad   : > { %v4620_v30 = vcombine.low %v4596_v18, %v4612_v21  ;;  %v4621_v38 = vcombine.high %v4596_v18, %v4612_v21  ;;  %v4622_v6 = vcombine.low %v4603_v52, %v4619_v22  ;;  %v4623_v7 = vcombine.high %v4603_v52, %v4619_v22 }
 0x1ae   : > { %v5132_v51 = vcombine.low %v5107_v63, %v5115_v0  ;;  %v5133_v13 = vcombine.high %v5107_v63, %v5115_v0  ;;  %v5148_v48 = vcombine.low %v5123_v33, %v5131_v34  ;;  %v5149_v40 = vcombine.high %v5123_v33, %v5131_v34  ;;  %3106 = vrot.lane.b32.xlu1 %v9463_v56, %s9155_s8 }
 0x1af   : > { %5444 = vst.msk [vmem:[%s9595_s11 + $0x18] sm:$0xff] %vm5440_vm1, %v4620_v30  ;;  %5460 = vst.msk [vmem:[%s9595_s11 + $0x98] sm:$0xff] %vm5440_vm1, %v4621_v38  ;;  %v1400_v32 = vcombine.low %v9681_v46, %v9769_v9  ;;  %v1401_v8 = vcombine.high %v9681_v46, %v9769_v9  ;;  %3104 = vrot.lane.b32.xlu0 %v9471_v61, %s9155_s8  ;;  %v12318_v63 = vcombine.low %v9385_v53, %v9725_v1 }
 0x1b0   : > { %5476 = vst.msk [vmem:[%s9595_s11 + $0x118] sm:$0xff] %vm5440_vm1, %v4622_v6  ;;  %5492 = vst.msk [vmem:[%s9595_s11 + $0x198] sm:$0xff] %vm5440_vm1, %v4623_v7  ;;  %v5140_v14 = vrot.slane %v5132_v51, %v9507_v16  ;;  %v5147_v56 = vrot.slane %v5133_v13, %v9507_v16  ;;  %v5156_v18 = vrot.slane %v5148_v48, %v9507_v16  ;;  %v9823_v21 = vpop.permute.xlu1 %3094  ;;  %v9825_v22 = vpop.permute.xlu0 %3076 }
 0x1b1   : > { %v5163_v52 = vrot.slane %v5149_v40, %v9507_v16  ;;  %12316 = vst [vmem:[#allocation8_spill] sm:$0xff] %v9823_v21  ;;  %12317 = vst [vmem:[#allocation9_spill] sm:$0xff] %v9825_v22  ;;  %v1392_v0 = vrot.slane %v12318_v63, %v9485_v5  ;;  %v12319_v61 = vcombine.high %v9385_v53, %v9725_v1 }
 0x1b2   : > { %v1408_v34 = vrot.slane %v1400_v32, %v9485_v5  ;;  %v1415_v40 = vrot.slane %v1401_v8, %v9485_v5  ;;  %v5164_v30 = vcombine.low %v5140_v14, %v5156_v18  ;;  %v5165_v38 = vcombine.high %v5140_v14, %v5156_v18  ;;  %3122 = vrot.lane.b32.xlu1 %v9461_v55, %s9155_s8 }
 0x1b3   : > { %v1399_v33 = vrot.slane %v12319_v61, %v9485_v5  ;;  %v5166_v6 = vcombine.low %v5147_v56, %v5163_v52  ;;  %v5167_v7 = vcombine.high %v5147_v56, %v5163_v52  ;;  %3120 = vrot.lane.b32.xlu0 %v9479_v3, %s9155_s8  ;;  %v840_v32 = vcombine.low %v9391_v54, %v9697_v36 }
 0x1b4   : > { %v1416_v51 = vcombine.low %v1392_v0, %v1408_v34  ;;  %v1417_v13 = vcombine.high %v1392_v0, %v1408_v34  ;;  %v841_v8 = vcombine.high %v9391_v54, %v9697_v36  ;;  %5452 = vst.msk [vmem:[%s9595_s11 + $0x58] sm:$0xff] %vm5440_vm1, %v5164_v30  ;;  %5468 = vst.msk [vmem:[%s9595_s11 + $0xd8] sm:$0xff] %vm5440_vm1, %v5165_v38  ;;  %v9853_v55 = vpop.permute.xlu1 %564  ;;  %v9855_v14 = vpop.permute.xlu0 %3092 }
 0x1b5   : > { %v1432_v48 = vcombine.low %v1399_v33, %v1415_v40  ;;  %v1433_v53 = vcombine.high %v1399_v33, %v1415_v40  ;;  %5484 = vst.msk [vmem:[%s9595_s11 + $0x158] sm:$0xff] %vm5440_vm1, %v5166_v6  ;;  %5500 = vst.msk [vmem:[%s9595_s11 + $0x1d8] sm:$0xff] %vm5440_vm1, %v5167_v7  ;;  %v856_v52 = vcombine.low %v9853_v55, %v9745_v17 }
 0x1b6   : > { %12320 = vst [vmem:[#allocation10_spill] sm:$0xff] %v9855_v14  ;;  %v1424_v3 = vrot.slane %v1416_v51, %v9507_v16  ;;  %v1431_v56 = vrot.slane %v1417_v13, %v9507_v16  ;;  %v857_v63 = vcombine.high %v9853_v55, %v9745_v17  ;;  %3138 = vrot.lane.b32.xlu1 %v9469_v60, %s9155_s8 }
 0x1b7   : > { %v1440_v18 = vrot.slane %v1432_v48, %v9507_v16  ;;  %v1447_v54 = vrot.slane %v1433_v53, %v9507_v16  ;;  %3136 = vrot.lane.b32.xlu0 %v9497_v11, %s9155_s8  ;;  %v848_v40 = vrot.slane %v840_v32, %v9485_v5  ;;  %v855_v30 = vrot.slane %v841_v8, %v9485_v5 }
 0x1b8   : > { %v5032_v0 = vcombine.low %v1424_v3, %v1431_v56  ;;  %v8878_v61 = vcombine.high %v1424_v3, %v1431_v56  ;;  %v864_v38 = vrot.slane %v856_v52, %v9485_v5  ;;  %v871_v6 = vrot.slane %v857_v63, %v9485_v5  ;;  %v9873_v7 = vpop.permute.xlu1 %570  ;;  %v9875_v51 = vpop.permute.xlu0 %568 }
 0x1b9   : > { %v5048_v33 = vcombine.low %v1440_v18, %v1447_v54  ;;  %v8879_v34 = vcombine.high %v1440_v18, %v1447_v54 }
 0x1ba   : > { %v5039_v60 = vrot.slane %v5032_v0, %v9485_v5  ;;  %v5047_v13 = vrot.slane %v8878_v61, %v9485_v5  ;;  %v872_v53 = vcombine.low %v848_v40, %v864_v38  ;;  %v873_v32 = vcombine.high %v848_v40, %v864_v38  ;;  %3154 = vrot.lane.b32.xlu1 %v9477_v2, %s9155_s8 }
 0x1bb   : > { %v5055_v48 = vrot.slane %v5048_v33, %v9485_v5  ;;  %v5063_v11 = vrot.slane %v8879_v34, %v9485_v5  ;;  %v888_v3 = vcombine.low %v855_v30, %v871_v6  ;;  %v889_v8 = vcombine.high %v855_v30, %v871_v6  ;;  %3152 = vrot.lane.b32.xlu0 %v9527_v26, %s9155_s8 }
 0x1bc   : > { %v5064_v56 = vcombine.low %v5039_v60, %v5047_v13  ;;  %v5065_v18 = vcombine.high %v5039_v60, %v5047_v13  ;;  %v880_v63 = vrot.slane %v872_v53, %v9507_v16  ;;  %v887_v0 = vrot.slane %v873_v32, %v9507_v16  ;;  %v9889_v34 = vpop.permute.xlu1 %586  ;;  %v9891_v40 = vpop.permute.xlu0 %584 }
 0x1bd   : > { %v5080_v54 = vcombine.low %v5055_v48, %v5063_v11  ;;  %v5081_v52 = vcombine.high %v5055_v48, %v5063_v11  ;;  %v896_v61 = vrot.slane %v888_v3, %v9507_v16  ;;  %v903_v33 = vrot.slane %v889_v8, %v9507_v16 }
 0x1be   : > { %v5072_v2 = vrot.slane %v5064_v56, %v9507_v16  ;;  %v5079_v30 = vrot.slane %v5065_v18, %v9507_v16  ;;  %v4488_v6 = vcombine.low %v880_v63, %v887_v0  ;;  %v8862_v60 = vcombine.high %v880_v63, %v887_v0  ;;  %3170 = vrot.lane.b32.xlu1 %v9495_v10, %s9155_s8 }
 0x1bf   : > { %v5088_v38 = vrot.slane %v5080_v54, %v9507_v16  ;;  %v5095_v26 = vrot.slane %v5081_v52, %v9507_v16  ;;  %v4504_v13 = vcombine.low %v896_v61, %v903_v33  ;;  %v8863_v48 = vcombine.high %v896_v61, %v903_v33  ;;  %3168 = vrot.lane.b32.xlu0 %v9555_v58, %s9155_s8 }
 0x1c0   : > { %v4495_v8 = vrot.slane %v4488_v6, %v9485_v5  ;;  %v4503_v56 = vrot.slane %v8862_v60, %v9485_v5  ;;  %v9905_v52 = vpop.permute.xlu1 %618  ;;  %v9907_v63 = vpop.permute.xlu0 %616 }
 0x1c1   : > { %v5096_v11 = vcombine.low %v5072_v2, %v5088_v38  ;;  %v5097_v53 = vcombine.high %v5072_v2, %v5088_v38  ;;  %v5098_v32 = vcombine.low %v5079_v30, %v5095_v26  ;;  %v5099_v3 = vcombine.high %v5079_v30, %v5095_v26 }
 0x1c2   : > { %v4511_v18 = vrot.slane %v4504_v13, %v9485_v5  ;;  %v4519_v54 = vrot.slane %v8863_v48, %v9485_v5  ;;  %v4520_v10 = vcombine.low %v4495_v8, %v4503_v56  ;;  %v4521_v58 = vcombine.high %v4495_v8, %v4503_v56  ;;  %3186 = vrot.lane.b32.xlu1 %v9525_v25, %s9155_s8 }
 0x1c3   : > { %5451 = vst.msk [vmem:[%s9595_s11 + $0x50] sm:$0xff] %vm5440_vm1, %v5096_v11  ;;  %5467 = vst.msk [vmem:[%s9595_s11 + $0xd0] sm:$0xff] %vm5440_vm1, %v5097_v53  ;;  %3184 = vrot.lane.b32.xlu0 %v9572_v20, %s9155_s8  ;;  %v1044_v25 = vcombine.low %v9329_v37, %v9905_v52  ;;  %v1045_v20 = vcombine.high %v9329_v37, %v9905_v52  ;;  %v976_v60 = vcombine.low %v9333_v41, %v9907_v63 }
 0x1c4   : > { %5483 = vst.msk [vmem:[%s9595_s11 + $0x150] sm:$0xff] %vm5440_vm1, %v5098_v32  ;;  %5499 = vst.msk [vmem:[%s9595_s11 + $0x1d0] sm:$0xff] %vm5440_vm1, %v5099_v3  ;;  %v4536_v0 = vcombine.low %v4511_v18, %v4519_v54  ;;  %v4537_v61 = vcombine.high %v4511_v18, %v4519_v54  ;;  %v4528_v33 = vrot.slane %v4520_v10, %v9507_v16  ;;  %v9925_v26 = vpop.permute.xlu1 %634  ;;  %v9927_v6 = vpop.permute.xlu0 %632 }
 0x1c5   : > { %v4535_v2 = vrot.slane %v4521_v58, %v9507_v16  ;;  %v977_v13 = vcombine.high %v9333_v41, %v9907_v63  ;;  %v1052_v54 = vrot.slane %v1044_v25, %v9485_v5  ;;  %v1059_v10 = vrot.slane %v1045_v20, %v9485_v5 }
 0x1c6   : > { %v4544_v30 = vrot.slane %v4536_v0, %v9507_v16  ;;  %v4551_v38 = vrot.slane %v4537_v61, %v9507_v16  ;;  %1830 = vrot.lane.b32.xlu1 %v9647_v24, %s9154_s23  ;;  %v984_v58 = vrot.slane %v976_v60, %v9485_v5 }
 0x1c7   : > { %1828 = vrot.lane.b32.xlu0 %v9853_v55, %s9154_s23  ;;  %v991_v0 = vrot.slane %v977_v13, %v9485_v5 }
 0x1c8   : > { %v4552_v48 = vcombine.low %v4528_v33, %v4544_v30  ;;  %v4553_v11 = vcombine.high %v4528_v33, %v4544_v30  ;;  %v4554_v53 = vcombine.low %v4535_v2, %v4551_v38  ;;  %v4555_v32 = vcombine.high %v4535_v2, %v4551_v38  ;;  %v9949_v37 = vpop.permute.xlu1 %666  ;;  %v9951_v41 = vpop.permute.xlu0 %664 }
 0x1c9   : > { %v1060_v3 = vcombine.low %v9873_v7, %v9949_v37  ;;  %v1061_v8 = vcombine.high %v9873_v7, %v9949_v37  ;;  %v992_v56 = vcombine.low %v9875_v51, %v9951_v41  ;;  %v993_v18 = vcombine.high %v9875_v51, %v9951_v41 }
 0x1ca   : > { %5443 = vst.msk [vmem:[%s9595_s11 + $0x10] sm:$0xff] %vm5440_vm1, %v4552_v48  ;;  %5459 = vst.msk [vmem:[%s9595_s11 + $0x90] sm:$0xff] %vm5440_vm1, %v4553_v11  ;;  %1846 = vrot.lane.b32.xlu1 %v9663_v31, %s9154_s23 }
 0x1cb   : > { %5475 = vst.msk [vmem:[%s9595_s11 + $0x110] sm:$0xff] %vm5440_vm1, %v4554_v53  ;;  %5491 = vst.msk [vmem:[%s9595_s11 + $0x190] sm:$0xff] %vm5440_vm1, %v4555_v32  ;;  %v1068_v61 = vrot.slane %v1060_v3, %v9485_v5  ;;  %v1075_v33 = vrot.slane %v1061_v8, %v9485_v5  ;;  %v1000_v2 = vrot.slane %v992_v56, %v9485_v5  ;;  %1844 = vrot.lane.b32.xlu0 %v9681_v46, %s9154_s23 }
 0x1cc   : > { %v1007_v30 = vrot.slane %v993_v18, %v9485_v5  ;;  %v9981_v13 = vpop.permute.xlu1 %682  ;;  %v9983_v48 = vpop.permute.xlu0 %680 }
 0x1cd   : > { %v1076_v11 = vcombine.low %v1052_v54, %v1068_v61  ;;  %v1077_v53 = vcombine.high %v1052_v54, %v1068_v61  ;;  %v1092_v32 = vcombine.low %v1059_v10, %v1075_v33  ;;  %v1093_v3 = vcombine.high %v1059_v10, %v1075_v33 }
 0x1ce   : > { %v1008_v8 = vcombine.low %v984_v58, %v1000_v2  ;;  %v1009_v56 = vcombine.high %v984_v58, %v1000_v2  ;;  %v1024_v18 = vcombine.low %v991_v0, %v1007_v30  ;;  %v1025_v38 = vcombine.high %v991_v0, %v1007_v30  ;;  %1862 = vrot.lane.b32.xlu1 %v9679_v12, %s9154_s23 }
 0x1cf   : > { %v1084_v20 = vrot.slane %v1076_v11, %v9507_v16  ;;  %v1091_v25 = vrot.slane %v1077_v53, %v9507_v16  ;;  %v1100_v60 = vrot.slane %v1092_v32, %v9507_v16  ;;  %v1107_v14 = vrot.slane %v1093_v3, %v9507_v16  ;;  %1860 = vrot.lane.b32.xlu0 %v9697_v36, %s9154_s23 }
 0x1d0   : > { %v1016_v54 = vrot.slane %v1008_v8, %v9507_v16  ;;  %v1023_v10 = vrot.slane %v1009_v56, %v9507_v16  ;;  %v1032_v58 = vrot.slane %v1024_v18, %v9507_v16  ;;  %v1039_v0 = vrot.slane %v1025_v38, %v9507_v16  ;;  %v9997_v61 = vpop.permute.xlu1 %1802  ;;  %v9999_v33 = vpop.permute.xlu0 %1800 }
 0x1d1   : > { %12321 = vst [vmem:[#allocation11_spill] sm:$0xff] %v9997_v61  ;;  %12322 = vst [vmem:[#allocation12_spill] sm:$0xff] %v9999_v33  ;;  %v4692_v2 = vcombine.low %v1084_v20, %v1091_v25  ;;  %v8868_v30 = vcombine.high %v1084_v20, %v1091_v25  ;;  %v4708_v11 = vcombine.low %v1100_v60, %v1107_v14 }
 0x1d2   : > { %v8869_v53 = vcombine.high %v1100_v60, %v1107_v14  ;;  %v4624_v32 = vcombine.low %v1016_v54, %v1023_v10  ;;  %v8866_v3 = vcombine.high %v1016_v54, %v1023_v10  ;;  %v4640_v21 = vcombine.low %v1032_v58, %v1039_v0  ;;  %1878 = vrot.lane.b32.xlu1 %v9695_v44, %s9154_s23 }
 0x1d3   : > { %v8867_v22 = vcombine.high %v1032_v58, %v1039_v0  ;;  %v4699_v8 = vrot.slane %v4692_v2, %v9485_v5  ;;  %v4707_v56 = vrot.slane %v8868_v30, %v9485_v5  ;;  %v4715_v38 = vrot.slane %v4708_v11, %v9485_v5  ;;  %1876 = vrot.lane.b32.xlu0 %v9725_v1, %s9154_s23 }
 0x1d4   : > { %v4723_v18 = vrot.slane %v8869_v53, %v9485_v5  ;;  %v4631_v14 = vrot.slane %v4624_v32, %v9485_v5  ;;  %v4639_v25 = vrot.slane %v8866_v3, %v9485_v5  ;;  %v4647_v20 = vrot.slane %v4640_v21, %v9485_v5  ;;  %v10013_v54 = vpop.permute.xlu1 %1818  ;;  %v10015_v10 = vpop.permute.xlu0 %1816 }
 0x1d5   : > { %v4655_v60 = vrot.slane %v8867_v22, %v9485_v5  ;;  %v4724_v58 = vcombine.low %v4699_v8, %v4707_v56  ;;  %v4725_v0 = vcombine.high %v4699_v8, %v4707_v56 }
 0x1d6   : > { %v4740_v2 = vcombine.low %v4715_v38, %v4723_v18  ;;  %v4741_v30 = vcombine.high %v4715_v38, %v4723_v18  ;;  %v4656_v11 = vcombine.low %v4631_v14, %v4639_v25  ;;  %v4657_v53 = vcombine.high %v4631_v14, %v4639_v25  ;;  %1894 = vrot.lane.b32.xlu1 %v9723_v23, %s9154_s23 }
 0x1d7   : > { %v4672_v33 = vcombine.low %v4647_v20, %v4655_v60  ;;  %v4673_v61 = vcombine.high %v4647_v20, %v4655_v60  ;;  %v4732_v32 = vrot.slane %v4724_v58, %v9507_v16  ;;  %v4739_v21 = vrot.slane %v4725_v0, %v9507_v16  ;;  %1892 = vrot.lane.b32.xlu0 %v9745_v17, %s9154_s23 }
 0x1d8   : > { %v4748_v22 = vrot.slane %v4740_v2, %v9507_v16  ;;  %v4755_v3 = vrot.slane %v4741_v30, %v9507_v16  ;;  %v4664_v8 = vrot.slane %v4656_v11, %v9507_v16  ;;  %v4671_v56 = vrot.slane %v4657_v53, %v9507_v16  ;;  %v10029_v14 = vpop.permute.xlu1 %3082  ;;  %v10031_v25 = vpop.permute.xlu0 %3080 }
 0x1d9   : > { %v4680_v38 = vrot.slane %v4672_v33, %v9507_v16  ;;  %v4687_v18 = vrot.slane %v4673_v61, %v9507_v16  ;;  %12323 = vst [vmem:[#allocation13_spill] sm:$0xff] %v10031_v25  ;;  %v1604_v61 = vcombine.low %v9889_v34, %v9981_v13  ;;  %v1605_v33 = vcombine.high %v9889_v34, %v9981_v13 }
 0x1da   : > { %v4756_v20 = vcombine.low %v4732_v32, %v4748_v22  ;;  %v4757_v60 = vcombine.high %v4732_v32, %v4748_v22  ;;  %v4758_v58 = vcombine.low %v4739_v21, %v4755_v3  ;;  %v4759_v0 = vcombine.high %v4739_v21, %v4755_v3  ;;  %1910 = vrot.lane.b32.xlu1 %v9743_v15, %s9154_s23 }
 0x1db   : > { %v4688_v2 = vcombine.low %v4664_v8, %v4680_v38  ;;  %v4689_v30 = vcombine.high %v4664_v8, %v4680_v38  ;;  %v4690_v11 = vcombine.low %v4671_v56, %v4687_v18  ;;  %v4691_v53 = vcombine.high %v4671_v56, %v4687_v18  ;;  %1908 = vrot.lane.b32.xlu0 %v9769_v9, %s9154_s23 }
 0x1dc   : > { %5446 = vst.msk [vmem:[%s9595_s11 + $0x28] sm:$0xff] %vm5440_vm1, %v4756_v20  ;;  %5462 = vst.msk [vmem:[%s9595_s11 + $0xa8] sm:$0xff] %vm5440_vm1, %v4757_v60  ;;  %v1536_v32 = vcombine.low %v9891_v40, %v9983_v48  ;;  %v1537_v21 = vcombine.high %v9891_v40, %v9983_v48  ;;  %v12324_v22 = vcombine.low %v9331_v39, %v9925_v26  ;;  %v10069_v38 = vpop.permute.xlu1 %3098  ;;  %v10071_v18 = vpop.permute.xlu0 %3096 }
 0x1dd   : > { %5478 = vst.msk [vmem:[%s9595_s11 + $0x128] sm:$0xff] %vm5440_vm1, %v4758_v58  ;;  %5494 = vst.msk [vmem:[%s9595_s11 + $0x1a8] sm:$0xff] %vm5440_vm1, %v4759_v0  ;;  %v12325_v8 = vcombine.high %v9331_v39, %v9925_v26  ;;  %v1612_v20 = vrot.slane %v1604_v61, %v9485_v5  ;;  %v1619_v60 = vrot.slane %v1605_v33, %v9485_v5 }
 0x1de   : > { %v1596_v3 = vrot.slane %v12324_v22, %v9485_v5  ;;  %5445 = vst.msk [vmem:[%s9595_s11 + $0x20] sm:$0xff] %vm5440_vm1, %v4688_v2  ;;  %5461 = vst.msk [vmem:[%s9595_s11 + $0xa0] sm:$0xff] %vm5440_vm1, %v4689_v30  ;;  %v1544_v58 = vrot.slane %v1536_v32, %v9485_v5  ;;  %v1551_v39 = vrot.slane %v1537_v21, %v9485_v5  ;;  %3110 = vrot.lane.b32.xlu1 %v9647_v24, %s9155_s8 }
 0x1df   : > { %v1603_v56 = vrot.slane %v12325_v8, %v9485_v5  ;;  %5477 = vst.msk [vmem:[%s9595_s11 + $0x120] sm:$0xff] %vm5440_vm1, %v4690_v11  ;;  %5493 = vst.msk [vmem:[%s9595_s11 + $0x1a0] sm:$0xff] %vm5440_vm1, %v4691_v53  ;;  %v12328_v0 = vcombine.low %v9335_v42, %v9927_v6  ;;  %v12329_v30 = vcombine.high %v9335_v42, %v9927_v6  ;;  %3108 = vrot.lane.b32.xlu0 %v9853_v55, %s9155_s8 }
 0x1e0   : > { %12326 = vst [vmem:[#allocation14_spill] sm:$0xff] %v10069_v38  ;;  %12327 = vst [vmem:[#allocation15_spill] sm:$0xff] %v10071_v18  ;;  %v1620_v53 = vcombine.low %v1596_v3, %v1612_v20  ;;  %v1621_v61 = vcombine.high %v1596_v3, %v1612_v20  ;;  %v10091_v38 = vpop.permute.xlu0 %572 }
 0x1e1   : > { %v1528_v2 = vrot.slane %v12328_v0, %v9485_v5  ;;  %v1535_v11 = vrot.slane %v12329_v30, %v9485_v5  ;;  %v1636_v33 = vcombine.low %v1603_v56, %v1619_v60  ;;  %v1637_v22 = vcombine.high %v1603_v56, %v1619_v60  ;;  %v10089_v0 = vpop.permute.xlu1 %574 }
 0x1e2   : > { %v1628_v42 = vrot.slane %v1620_v53, %v9507_v16  ;;  %v1635_v30 = vrot.slane %v1621_v61, %v9507_v16  ;;  %3126 = vrot.lane.b32.xlu1 %v9663_v31, %s9155_s8 }
 0x1e3   : > { %v1552_v32 = vcombine.low %v1528_v2, %v1544_v58  ;;  %v1553_v21 = vcombine.high %v1528_v2, %v1544_v58  ;;  %v1568_v8 = vcombine.low %v1535_v11, %v1551_v39  ;;  %v1569_v18 = vcombine.high %v1535_v11, %v1551_v39  ;;  %3124 = vrot.lane.b32.xlu0 %v9681_v46, %s9155_s8 }
 0x1e4   : > { %v1644_v24 = vrot.slane %v1636_v33, %v9507_v16  ;;  %v1651_v3 = vrot.slane %v1637_v22, %v9507_v16  ;;  %v5236_v58 = vcombine.low %v1628_v42, %v1635_v30  ;;  %v8884_v39 = vcombine.high %v1628_v42, %v1635_v30 }
 0x1e5   : > { %v1560_v56 = vrot.slane %v1552_v32, %v9507_v16  ;;  %v1567_v55 = vrot.slane %v1553_v21, %v9507_v16  ;;  %v1576_v20 = vrot.slane %v1568_v8, %v9507_v16  ;;  %v1583_v60 = vrot.slane %v1569_v18, %v9507_v16  ;;  %v10105_v32 = vpop.permute.xlu1 %590  ;;  %v10107_v21 = vpop.permute.xlu0 %588 }
 0x1e6   : > { %v5252_v2 = vcombine.low %v1644_v24, %v1651_v3  ;;  %v8885_v11 = vcombine.high %v1644_v24, %v1651_v3  ;;  %v5243_v18 = vrot.slane %v5236_v58, %v9485_v5  ;;  %v5251_v8 = vrot.slane %v8884_v39, %v9485_v5  ;;  %3142 = vrot.lane.b32.xlu1 %v9679_v12, %s9155_s8 }
 0x1e7   : > { %v5168_v53 = vcombine.low %v1560_v56, %v1567_v55  ;;  %v8882_v61 = vcombine.high %v1560_v56, %v1567_v55  ;;  %v5184_v33 = vcombine.low %v1576_v20, %v1583_v60  ;;  %v8883_v22 = vcombine.high %v1576_v20, %v1583_v60  ;;  %3140 = vrot.lane.b32.xlu0 %v9697_v36, %s9155_s8 }
 0x1e8   : > { %v5259_v31 = vrot.slane %v5252_v2, %v9485_v5  ;;  %v5267_v42 = vrot.slane %v8885_v11, %v9485_v5  ;;  %v5268_v56 = vcombine.low %v5243_v18, %v5251_v8  ;;  %v5269_v55 = vcombine.high %v5243_v18, %v5251_v8 }
 0x1e9   : > { %v5175_v30 = vrot.slane %v5168_v53, %v9485_v5  ;;  %v5183_v46 = vrot.slane %v8882_v61, %v9485_v5  ;;  %v5191_v24 = vrot.slane %v5184_v33, %v9485_v5  ;;  %v5199_v3 = vrot.slane %v8883_v22, %v9485_v5  ;;  %v10121_v53 = vpop.permute.xlu1 %622  ;;  %v10123_v61 = vpop.permute.xlu0 %620 }
 0x1ea   : > { %v5284_v20 = vcombine.low %v5259_v31, %v5267_v42  ;;  %v5285_v60 = vcombine.high %v5259_v31, %v5267_v42  ;;  %v5276_v33 = vrot.slane %v5268_v56, %v9507_v16  ;;  %v5283_v22 = vrot.slane %v5269_v55, %v9507_v16  ;;  %3158 = vrot.lane.b32.xlu1 %v9695_v44, %s9155_s8 }
 0x1eb   : > { %v5200_v58 = vcombine.low %v5175_v30, %v5183_v46  ;;  %v5201_v39 = vcombine.high %v5175_v30, %v5183_v46  ;;  %v5216_v2 = vcombine.low %v5191_v24, %v5199_v3  ;;  %v5217_v11 = vcombine.high %v5191_v24, %v5199_v3  ;;  %3156 = vrot.lane.b32.xlu0 %v9725_v1, %s9155_s8 }
 0x1ec   : > { %v5292_v12 = vrot.slane %v5284_v20, %v9507_v16  ;;  %v5299_v18 = vrot.slane %v5285_v60, %v9507_v16  ;;  %v1180_v1 = vcombine.low %v9341_v45, %v10121_v53 }
 0x1ed   : > { %v5208_v8 = vrot.slane %v5200_v58, %v9507_v16  ;;  %v5215_v36 = vrot.slane %v5201_v39, %v9507_v16  ;;  %v5224_v31 = vrot.slane %v5216_v2, %v9507_v16  ;;  %v5231_v42 = vrot.slane %v5217_v11, %v9507_v16  ;;  %v10137_v58 = vpop.permute.xlu1 %638  ;;  %v10147_v44 = vpop.permute.xlu0 %636 }
 0x1ee   : > { %v5300_v30 = vcombine.low %v5276_v33, %v5292_v12  ;;  %v5301_v46 = vcombine.high %v5276_v33, %v5292_v12  ;;  %v5302_v24 = vcombine.low %v5283_v22, %v5299_v18  ;;  %v5303_v3 = vcombine.high %v5283_v22, %v5299_v18  ;;  %3174 = vrot.lane.b32.xlu1 %v9723_v23, %s9155_s8 }
 0x1ef   : > { %v5232_v56 = vcombine.low %v5208_v8, %v5224_v31  ;;  %v5233_v55 = vcombine.high %v5208_v8, %v5224_v31  ;;  %v5234_v20 = vcombine.low %v5215_v36, %v5231_v42  ;;  %v5235_v60 = vcombine.high %v5215_v36, %v5231_v42  ;;  %3172 = vrot.lane.b32.xlu0 %v9745_v17, %s9155_s8 }
 0x1f0   : > { %5454 = vst.msk [vmem:[%s9595_s11 + $0x68] sm:$0xff] %vm5440_vm1, %v5300_v30  ;;  %5470 = vst.msk [vmem:[%s9595_s11 + $0xe8] sm:$0xff] %vm5440_vm1, %v5301_v46  ;;  %v1181_v39 = vcombine.high %v9341_v45, %v10121_v53  ;;  %v1112_v2 = vcombine.low %v9345_v49, %v10123_v61  ;;  %v1113_v11 = vcombine.high %v9345_v49, %v10123_v61 }
 0x1f1   : > { %5486 = vst.msk [vmem:[%s9595_s11 + $0x168] sm:$0xff] %vm5440_vm1, %v5302_v24  ;;  %5502 = vst.msk [vmem:[%s9595_s11 + $0x1e8] sm:$0xff] %vm5440_vm1, %v5303_v3  ;;  %v10169_v33 = vpop.permute.xlu1 %670  ;;  %v10179_v12 = vpop.permute.xlu0 %668  ;;  %v1188_v31 = vrot.slane %v1180_v1, %v9485_v5 }
 0x1f2   : > { %5453 = vst.msk [vmem:[%s9595_s11 + $0x60] sm:$0xff] %vm5440_vm1, %v5232_v56  ;;  %5469 = vst.msk [vmem:[%s9595_s11 + $0xe0] sm:$0xff] %vm5440_vm1, %v5233_v55  ;;  %v1196_v45 = vcombine.low %v10089_v0, %v10169_v33  ;;  %v1197_v17 = vcombine.high %v10089_v0, %v10169_v33  ;;  %v1128_v8 = vcombine.low %v10091_v38, %v10179_v12  ;;  %3190 = vrot.lane.b32.xlu1 %v9743_v15, %s9155_s8 }
 0x1f3   : > { %5485 = vst.msk [vmem:[%s9595_s11 + $0x160] sm:$0xff] %vm5440_vm1, %v5234_v20  ;;  %5501 = vst.msk [vmem:[%s9595_s11 + $0x1e0] sm:$0xff] %vm5440_vm1, %v5235_v60  ;;  %v1129_v36 = vcombine.high %v10091_v38, %v10179_v12  ;;  %v1195_v42 = vrot.slane %v1181_v39, %v9485_v5  ;;  %3188 = vrot.lane.b32.xlu0 %v9769_v9, %s9155_s8  ;;  %v1120_v24 = vrot.slane %v1112_v2, %v9485_v5 }
 0x1f4   : > { %v1204_v30 = vrot.slane %v1196_v45, %v9485_v5  ;;  %v1211_v46 = vrot.slane %v1197_v17, %v9485_v5  ;;  %v1127_v3 = vrot.slane %v1113_v11, %v9485_v5  ;;  %v1136_v56 = vrot.slane %v1128_v8, %v9485_v5 }
 0x1f5   : > { %v1143_v55 = vrot.slane %v1129_v36, %v9485_v5  ;;  %v10201_v15 = vpop.permute.xlu1 %686  ;;  %v10203_v45 = vpop.permute.xlu0 %684 }
 0x1f6   : > { %v1212_v20 = vcombine.low %v1188_v31, %v1204_v30  ;;  %v1213_v60 = vcombine.high %v1188_v31, %v1204_v30  ;;  %v1228_v1 = vcombine.low %v1195_v42, %v1211_v46  ;;  %v1229_v39 = vcombine.high %v1195_v42, %v1211_v46  ;;  %1834 = vrot.lane.b32.xlu1 %v9873_v7, %s9154_s23 }
 0x1f7   : > { %v1144_v17 = vcombine.low %v1120_v24, %v1136_v56  ;;  %v1145_v49 = vcombine.high %v1120_v24, %v1136_v56  ;;  %v1160_v18 = vcombine.low %v1127_v3, %v1143_v55  ;;  %v1161_v9 = vcombine.high %v1127_v3, %v1143_v55  ;;  %1832 = vrot.lane.b32.xlu0 %v9875_v51, %s9154_s23 }
 0x1f8   : > { %v1220_v2 = vrot.slane %v1212_v20, %v9507_v16  ;;  %v1227_v11 = vrot.slane %v1213_v60, %v9507_v16  ;;  %v1236_v8 = vrot.slane %v1228_v1, %v9507_v16  ;;  %v1243_v36 = vrot.slane %v1229_v39, %v9507_v16 }
 0x1f9   : > { %v1152_v31 = vrot.slane %v1144_v17, %v9507_v16  ;;  %v1159_v42 = vrot.slane %v1145_v49, %v9507_v16  ;;  %v1168_v30 = vrot.slane %v1160_v18, %v9507_v16  ;;  %v1175_v46 = vrot.slane %v1161_v9, %v9507_v16  ;;  %v10217_v24 = vpop.permute.xlu1 %1806  ;;  %v10219_v60 = vpop.permute.xlu0 %1804 }
 0x1fa   : > { %12330 = vst [vmem:[#allocation16_spill] sm:$0xff] %v10217_v24  ;;  %v4828_v3 = vcombine.low %v1220_v2, %v1227_v11  ;;  %v8872_v56 = vcombine.high %v1220_v2, %v1227_v11  ;;  %v4844_v55 = vcombine.low %v1236_v8, %v1243_v36  ;;  %v8873_v20 = vcombine.high %v1236_v8, %v1243_v36 }
 0x1fb   : > { %12331 = vst [vmem:[#allocation17_spill] sm:$0xff] %v10219_v60  ;;  %v4760_v1 = vcombine.low %v1152_v31, %v1159_v42  ;;  %v8870_v39 = vcombine.high %v1152_v31, %v1159_v42  ;;  %v4776_v22 = vcombine.low %v1168_v30, %v1175_v46  ;;  %v8871_v23 = vcombine.high %v1168_v30, %v1175_v46 }
 0x1fc   : > { %1850 = vrot.lane.b32.xlu1 %v9889_v34, %s9154_s23  ;;  %v4835_v49 = vrot.slane %v4828_v3, %v9485_v5  ;;  %v4843_v18 = vrot.slane %v8872_v56, %v9485_v5  ;;  %v4851_v17 = vrot.slane %v4844_v55, %v9485_v5  ;;  %v4859_v9 = vrot.slane %v8873_v20, %v9485_v5 }
 0x1fd   : > { %1848 = vrot.lane.b32.xlu0 %v9891_v40, %s9154_s23  ;;  %v4767_v2 = vrot.slane %v4760_v1, %v9485_v5  ;;  %v4775_v11 = vrot.slane %v8870_v39, %v9485_v5  ;;  %v4783_v8 = vrot.slane %v4776_v22, %v9485_v5  ;;  %v4791_v36 = vrot.slane %v8871_v23, %v9485_v5  ;;  %v10233_v31 = vpop.permute.xlu1 %1822  ;;  %v10235_v56 = vpop.permute.xlu0 %1820 }
 0x1fe   : > { %12332 = vst [vmem:[#allocation18_spill] sm:$0xff] %v10233_v31  ;;  %v4860_v42 = vcombine.low %v4835_v49, %v4843_v18  ;;  %v4861_v30 = vcombine.high %v4835_v49, %v4843_v18  ;;  %v4876_v46 = vcombine.low %v4851_v17, %v4859_v9  ;;  %v4877_v3 = vcombine.high %v4851_v17, %v4859_v9 }
 0x1ff   : > { %12333 = vst [vmem:[#allocation19_spill] sm:$0xff] %v10235_v56  ;;  %v4792_v55 = vcombine.low %v4767_v2, %v4775_v11  ;;  %v4793_v20 = vcombine.high %v4767_v2, %v4775_v11  ;;  %v4808_v60 = vcombine.low %v4783_v8, %v4791_v36  ;;  %v4809_v24 = vcombine.high %v4783_v8, %v4791_v36 }
 0x200   : > { %1866 = vrot.lane.b32.xlu1 %v9905_v52, %s9154_s23  ;;  %v4868_v1 = vrot.slane %v4860_v42, %v9507_v16  ;;  %v4875_v22 = vrot.slane %v4861_v30, %v9507_v16  ;;  %v4884_v23 = vrot.slane %v4876_v46, %v9507_v16  ;;  %v4891_v39 = vrot.slane %v4877_v3, %v9507_v16 }
 0x201   : > { %1864 = vrot.lane.b32.xlu0 %v9907_v63, %s9154_s23  ;;  %v4800_v49 = vrot.slane %v4792_v55, %v9507_v16  ;;  %v4807_v18 = vrot.slane %v4793_v20, %v9507_v16  ;;  %v4816_v17 = vrot.slane %v4808_v60, %v9507_v16  ;;  %v4823_v9 = vrot.slane %v4809_v24, %v9507_v16  ;;  %v10249_v2 = vpop.permute.xlu1 %3086  ;;  %v10251_v30 = vpop.permute.xlu0 %3084 }
 0x202   : > { %12334 = vst [vmem:[#allocation20_spill] sm:$0xff] %v10249_v2  ;;  %v4892_v11 = vcombine.low %v4868_v1, %v4884_v23  ;;  %v4893_v8 = vcombine.high %v4868_v1, %v4884_v23  ;;  %v4894_v36 = vcombine.low %v4875_v22, %v4891_v39  ;;  %v4895_v42 = vcombine.high %v4875_v22, %v4891_v39 }
 0x203   : > { %12335 = vst [vmem:[#allocation21_spill] sm:$0xff] %v10251_v30  ;;  %v4824_v46 = vcombine.low %v4800_v49, %v4816_v17  ;;  %v4825_v3 = vcombine.high %v4800_v49, %v4816_v17  ;;  %v4826_v55 = vcombine.low %v4807_v18, %v4823_v9  ;;  %v4827_v20 = vcombine.high %v4807_v18, %v4823_v9 }
 0x204   : > { %1882 = vrot.lane.b32.xlu1 %v9925_v26, %s9154_s23  ;;  %5448 = vst.msk [vmem:[%s9595_s11 + $0x38] sm:$0xff] %vm5440_vm1, %v4892_v11  ;;  %5464 = vst.msk [vmem:[%s9595_s11 + $0xb8] sm:$0xff] %vm5440_vm1, %v4893_v8  ;;  %v1740_v24 = vcombine.low %v10105_v32, %v10201_v15  ;;  %v1741_v60 = vcombine.high %v10105_v32, %v10201_v15  ;;  %v1672_v1 = vcombine.low %v10107_v21, %v10203_v45 }
 0x205   : > { %5480 = vst.msk [vmem:[%s9595_s11 + $0x138] sm:$0xff] %vm5440_vm1, %v4894_v36  ;;  %5496 = vst.msk [vmem:[%s9595_s11 + $0x1b8] sm:$0xff] %vm5440_vm1, %v4895_v42  ;;  %v1673_v22 = vcombine.high %v10107_v21, %v10203_v45  ;;  %1880 = vrot.lane.b32.xlu0 %v9927_v6, %s9154_s23  ;;  %v12336_v23 = vcombine.low %v9343_v47, %v10137_v58  ;;  %v12337_v49 = vcombine.high %v9343_v47, %v10137_v58  ;;  %v10289_v17 = vpop.permute.xlu1 %3102  ;;  %v10295_v47 = vpop.permute.xlu0 %3100 }
 0x206   : > { %5447 = vst.msk [vmem:[%s9595_s11 + $0x30] sm:$0xff] %vm5440_vm1, %v4824_v46  ;;  %5463 = vst.msk [vmem:[%s9595_s11 + $0xb0] sm:$0xff] %vm5440_vm1, %v4825_v3  ;;  %v1748_v9 = vrot.slane %v1740_v24, %v9485_v5  ;;  %v1755_v11 = vrot.slane %v1741_v60, %v9485_v5  ;;  %v1680_v8 = vrot.slane %v1672_v1, %v9485_v5 }
 0x207   : > { %v1732_v39 = vrot.slane %v12336_v23, %v9485_v5  ;;  %v1739_v18 = vrot.slane %v12337_v49, %v9485_v5  ;;  %5479 = vst.msk [vmem:[%s9595_s11 + $0x130] sm:$0xff] %vm5440_vm1, %v4826_v55  ;;  %5495 = vst.msk [vmem:[%s9595_s11 + $0x1b0] sm:$0xff] %vm5440_vm1, %v4827_v20  ;;  %v1687_v36 = vrot.slane %v1673_v22, %v9485_v5 }
 0x208   : > { %12338 = vst [vmem:[#allocation22_spill] sm:$0xff] %v10289_v17  ;;  %12339 = vst [vmem:[#allocation23_spill] sm:$0xff] %v10295_v47  ;;  %v12340_v42 = vcombine.low %v9347_v50, %v10147_v44  ;;  %v12341_v3 = vcombine.high %v9347_v50, %v10147_v44  ;;  %1898 = vrot.lane.b32.xlu1 %v9949_v37, %s9154_s23 }
 0x209   : > { %v1756_v20 = vcombine.low %v1732_v39, %v1748_v9  ;;  %v1757_v24 = vcombine.high %v1732_v39, %v1748_v9  ;;  %v1772_v60 = vcombine.low %v1739_v18, %v1755_v11  ;;  %v1773_v1 = vcombine.high %v1739_v18, %v1755_v11  ;;  %1896 = vrot.lane.b32.xlu0 %v9951_v41, %s9154_s23  ;;  %v10315_v39 = vpop.permute.xlu0 %1824 }
 0x20a   : > { %v1664_v46 = vrot.slane %v12340_v42, %v9485_v5  ;;  %v1671_v55 = vrot.slane %v12341_v3, %v9485_v5  ;;  %v10309_v42 = vpop.permute.xlu1 %1826 }
 0x20b   : > { %v1764_v17 = vrot.slane %v1756_v20, %v9507_v16  ;;  %v1771_v50 = vrot.slane %v1757_v24, %v9507_v16  ;;  %v1780_v3 = vrot.slane %v1772_v60, %v9507_v16  ;;  %v1787_v30 = vrot.slane %v1773_v1, %v9507_v16 }
 0x20c   : > { %v1688_v22 = vcombine.low %v1664_v46, %v1680_v8  ;;  %v1689_v23 = vcombine.high %v1664_v46, %v1680_v8  ;;  %v1704_v49 = vcombine.low %v1671_v55, %v1687_v36  ;;  %v1705_v47 = vcombine.high %v1671_v55, %v1687_v36  ;;  %1914 = vrot.lane.b32.xlu1 %v9981_v13, %s9154_s23 }
 0x20d   : > { %v5372_v36 = vcombine.low %v1764_v17, %v1771_v50  ;;  %v8888_v46 = vcombine.high %v1764_v17, %v1771_v50  ;;  %v5388_v55 = vcombine.low %v1780_v3, %v1787_v30  ;;  %v8889_v20 = vcombine.high %v1780_v3, %v1787_v30  ;;  %1912 = vrot.lane.b32.xlu0 %v9983_v48, %s9154_s23  ;;  %v10331_v17 = vpop.permute.xlu0 %1840 }
 0x20e   : > { %v1696_v18 = vrot.slane %v1688_v22, %v9507_v16  ;;  %v1703_v9 = vrot.slane %v1689_v23, %v9507_v16  ;;  %v1712_v11 = vrot.slane %v1704_v49, %v9507_v16  ;;  %v1719_v8 = vrot.slane %v1705_v47, %v9507_v16  ;;  %v10325_v2 = vpop.permute.xlu1 %1842 }
 0x20f   : > { %v5379_v23 = vrot.slane %v5372_v36, %v9485_v5  ;;  %v5387_v47 = vrot.slane %v8888_v46, %v9485_v5  ;;  %v5395_v49 = vrot.slane %v5388_v55, %v9485_v5  ;;  %v5403_v56 = vrot.slane %v8889_v20, %v9485_v5 }
 0x210   : > { %v5304_v24 = vcombine.low %v1696_v18, %v1703_v9  ;;  %v8886_v60 = vcombine.high %v1696_v18, %v1703_v9  ;;  %v5320_v1 = vcombine.low %v1712_v11, %v1719_v8  ;;  %v8887_v22 = vcombine.high %v1712_v11, %v1719_v8  ;;  %3114 = vrot.lane.b32.xlu1 %v9873_v7, %s9155_s8 }
 0x211   : > { %v5404_v9 = vcombine.low %v5379_v23, %v5387_v47  ;;  %v5405_v11 = vcombine.high %v5379_v23, %v5387_v47  ;;  %v5420_v8 = vcombine.low %v5395_v49, %v5403_v56  ;;  %v5421_v36 = vcombine.high %v5395_v49, %v5403_v56  ;;  %3112 = vrot.lane.b32.xlu0 %v9875_v51, %s9155_s8  ;;  %v1857_v25 = vpop.permute.xlu0 %1856 }
 0x212   : > { %v5311_v30 = vrot.slane %v5304_v24, %v9485_v5  ;;  %v5319_v50 = vrot.slane %v8886_v60, %v9485_v5  ;;  %v5327_v3 = vrot.slane %v5320_v1, %v9485_v5  ;;  %v5335_v18 = vrot.slane %v8887_v22, %v9485_v5  ;;  %v1859_v31 = vpop.permute.xlu1 %1858 }
 0x213   : > { %v5412_v60 = vrot.slane %v5404_v9, %v9507_v16  ;;  %v5419_v1 = vrot.slane %v5405_v11, %v9507_v16  ;;  %v5428_v22 = vrot.slane %v5420_v8, %v9507_v16  ;;  %v5435_v7 = vrot.slane %v5421_v36, %v9507_v16 }
 0x214   : > { %v5336_v46 = vcombine.low %v5311_v30, %v5319_v50  ;;  %v5337_v55 = vcombine.high %v5311_v30, %v5319_v50  ;;  %v5352_v20 = vcombine.low %v5327_v3, %v5335_v18  ;;  %v5353_v24 = vcombine.high %v5327_v3, %v5335_v18  ;;  %3130 = vrot.lane.b32.xlu1 %v9889_v34, %s9155_s8 }
 0x215   : > { %v5436_v49 = vcombine.low %v5412_v60, %v5428_v22  ;;  %v5437_v30 = vcombine.high %v5412_v60, %v5428_v22  ;;  %v5438_v50 = vcombine.low %v5419_v1, %v5435_v7  ;;  %v5439_v3 = vcombine.high %v5419_v1, %v5435_v7  ;;  %3128 = vrot.lane.b32.xlu0 %v9891_v40, %s9155_s8 }
 0x216   : > { %v5344_v56 = vrot.slane %v5336_v46, %v9507_v16  ;;  %v5351_v51 = vrot.slane %v5337_v55, %v9507_v16  ;;  %v5360_v23 = vrot.slane %v5352_v20, %v9507_v16  ;;  %v5367_v47 = vrot.slane %v5353_v24, %v9507_v16  ;;  %v1875_v36 = vpop.permute.xlu1 %1874  ;;  %v1873_v55 = vpop.permute.xlu0 %1872 }
 0x217   : > { %5456 = vst.msk [vmem:[%s9595_s11 + $0x78] sm:$0xff] %vm5440_vm1, %v5436_v49  ;;  %5472 = vst.msk [vmem:[%s9595_s11 + $0xf8] sm:$0xff] %vm5440_vm1, %v5437_v30  ;;  %v2052_v34 = vcombine.low %v9553_v57, %v1859_v31  ;;  %v2053_v46 = vcombine.high %v9553_v57, %v1859_v31  ;;  %v1984_v40 = vcombine.low %v9590_v62, %v1857_v25 }
 0x218   : > { %v5368_v18 = vcombine.low %v5344_v56, %v5360_v23  ;;  %v5369_v9 = vcombine.high %v5344_v56, %v5360_v23  ;;  %v5370_v11 = vcombine.low %v5351_v51, %v5367_v47  ;;  %v5371_v8 = vcombine.high %v5351_v51, %v5367_v47  ;;  %5488 = vst.msk [vmem:[%s9595_s11 + $0x178] sm:$0xff] %vm5440_vm1, %v5438_v50 }
 0x219   : > { %5504 = vst.msk [vmem:[%s9595_s11 + $0x1f8] sm:$0xff] %vm5440_vm1, %v5439_v3  ;;  %v1985_v20 = vcombine.high %v9590_v62, %v1857_v25  ;;  %3146 = vrot.lane.b32.xlu1 %v9905_v52, %s9155_s8  ;;  %v2596_v24 = vcombine.low %v9570_v19, %v1875_v36  ;;  %v2597_v57 = vcombine.high %v9570_v19, %v1875_v36 }
 0x21a   : > { %5455 = vst.msk [vmem:[%s9595_s11 + $0x70] sm:$0xff] %vm5440_vm1, %v5368_v18  ;;  %5471 = vst.msk [vmem:[%s9595_s11 + $0xf0] sm:$0xff] %vm5440_vm1, %v5369_v9  ;;  %3144 = vrot.lane.b32.xlu0 %v9907_v63, %s9155_s8  ;;  %v2528_v31 = vcombine.low %v9621_v28, %v1873_v55  ;;  %v2529_v60 = vcombine.high %v9621_v28, %v1873_v55  ;;  %v1891_v1 = vpop.permute.xlu1 %1890  ;;  %v2060_v22 = vrot.slane %v2052_v34, %v9485_v5  ;;  %v1889_v25 = vpop.permute.xlu0 %1888 }
 0x21b   : > { %5487 = vst.msk [vmem:[%s9595_s11 + $0x170] sm:$0xff] %vm5440_vm1, %v5370_v11  ;;  %5503 = vst.msk [vmem:[%s9595_s11 + $0x1f0] sm:$0xff] %vm5440_vm1, %v5371_v8  ;;  %v2067_v7 = vrot.slane %v2053_v46, %v9485_v5  ;;  %v2068_v62 = vcombine.low %v10309_v42, %v1891_v1  ;;  %v2069_v52 = vcombine.high %v10309_v42, %v1891_v1 }
 0x21c   : > { %v1992_v56 = vrot.slane %v1984_v40, %v9485_v5  ;;  %v1999_v19 = vrot.slane %v1985_v20, %v9485_v5  ;;  %v2000_v63 = vcombine.low %v10315_v39, %v1889_v25  ;;  %v2001_v51 = vcombine.high %v10315_v39, %v1889_v25 }
 0x21d   : > { %3162 = vrot.lane.b32.xlu1 %v9925_v26, %s9155_s8  ;;  %v10392_v28 = vrot.slane %v2596_v24, %v9485_v5  ;;  %v10395_v23 = vrot.slane %v2597_v57, %v9485_v5  ;;  %v2076_v42 = vrot.slane %v2068_v62, %v9485_v5  ;;  %v2083_v47 = vrot.slane %v2069_v52, %v9485_v5 }
 0x21e   : > { %3160 = vrot.lane.b32.xlu0 %v9927_v6, %s9155_s8  ;;  %v10402_v49 = vrot.slane %v2528_v31, %v9485_v5  ;;  %v10405_v39 = vrot.slane %v2529_v60, %v9485_v5  ;;  %v2008_v26 = vrot.slane %v2000_v63, %v9485_v5  ;;  %v2015_v30 = vrot.slane %v2001_v51, %v9485_v5  ;;  %v10409_v50 = vpop.permute.xlu1 %1906  ;;  %v10411_v8 = vpop.permute.xlu0 %1904 }
 0x21f   : > { %v2084_v3 = vcombine.low %v2060_v22, %v2076_v42  ;;  %v2085_v18 = vcombine.high %v2060_v22, %v2076_v42  ;;  %v2100_v9 = vcombine.low %v2067_v7, %v2083_v47  ;;  %v2101_v11 = vcombine.high %v2067_v7, %v2083_v47 }
 0x220   : > { %v2016_v36 = vcombine.low %v1992_v56, %v2008_v26  ;;  %v2017_v6 = vcombine.high %v1992_v56, %v2008_v26  ;;  %v2032_v34 = vcombine.low %v1999_v19, %v2015_v30  ;;  %v2033_v46 = vcombine.high %v1999_v19, %v2015_v30 }
 0x221   : > { %3178 = vrot.lane.b32.xlu1 %v9949_v37, %s9155_s8  ;;  %v2092_v55 = vrot.slane %v2084_v3, %v9507_v16  ;;  %v2099_v40 = vrot.slane %v2085_v18, %v9507_v16  ;;  %v2108_v20 = vrot.slane %v2100_v9, %v9507_v16  ;;  %v2115_v24 = vrot.slane %v2101_v11, %v9507_v16 }
 0x222   : > { %3176 = vrot.lane.b32.xlu0 %v9951_v41, %s9155_s8  ;;  %v2024_v57 = vrot.slane %v2016_v36, %v9507_v16  ;;  %v2031_v31 = vrot.slane %v2017_v6, %v9507_v16  ;;  %v2040_v60 = vrot.slane %v2032_v34, %v9507_v16  ;;  %v2047_v1 = vrot.slane %v2033_v46, %v9507_v16  ;;  %v10425_v37 = vpop.permute.xlu1 %3106  ;;  %v10427_v25 = vpop.permute.xlu0 %3104 }
 0x223   : > { %v5573_v22 = vcombine.low %v2092_v55, %v2099_v40  ;;  %v8892_v7 = vcombine.high %v2092_v55, %v2099_v40  ;;  %v5589_v62 = vcombine.low %v2108_v20, %v2115_v24  ;;  %v8893_v52 = vcombine.high %v2108_v20, %v2115_v24 }
 0x224   : > { %v5505_v56 = vcombine.low %v2024_v57, %v2031_v31  ;;  %v8890_v19 = vcombine.high %v2024_v57, %v2031_v31  ;;  %v5521_v63 = vcombine.low %v2040_v60, %v2047_v1  ;;  %v8891_v41 = vcombine.high %v2040_v60, %v2047_v1 }
 0x225   : > { %3194 = vrot.lane.b32.xlu1 %v9981_v13, %s9155_s8  ;;  %v5580_v51 = vrot.slane %v5573_v22, %v9485_v5  ;;  %v5588_v42 = vrot.slane %v8892_v7, %v9485_v5  ;;  %v5596_v47 = vrot.slane %v5589_v62, %v9485_v5  ;;  %v5604_v26 = vrot.slane %v8893_v52, %v9485_v5 }
 0x226   : > { %3192 = vrot.lane.b32.xlu0 %v9983_v48, %s9155_s8  ;;  %v5512_v30 = vrot.slane %v5505_v56, %v9485_v5  ;;  %v5520_v3 = vrot.slane %v8890_v19, %v9485_v5  ;;  %v5528_v18 = vrot.slane %v5521_v63, %v9485_v5  ;;  %v5536_v9 = vrot.slane %v8891_v41, %v9485_v5  ;;  %v10441_v13 = vpop.permute.xlu1 %3122  ;;  %v10443_v46 = vpop.permute.xlu0 %3120 }
 0x227   : > { %v5605_v11 = vcombine.low %v5580_v51, %v5588_v42  ;;  %v5606_v36 = vcombine.high %v5580_v51, %v5588_v42  ;;  %v5621_v6 = vcombine.low %v5596_v47, %v5604_v26  ;;  %v5622_v34 = vcombine.high %v5596_v47, %v5604_v26 }
 0x228   : > { %v5537_v55 = vcombine.low %v5512_v30, %v5520_v3  ;;  %v5538_v40 = vcombine.high %v5512_v30, %v5520_v3  ;;  %v5553_v20 = vcombine.low %v5528_v18, %v5536_v9  ;;  %v5554_v48 = vcombine.high %v5528_v18, %v5536_v9 }
 0x229   : > { %1838 = vrot.lane.b32.xlu1 %v10089_v0, %s9154_s23  ;;  %v5613_v24 = vrot.slane %v5605_v11, %v9507_v16  ;;  %v5620_v57 = vrot.slane %v5606_v36, %v9507_v16  ;;  %v5629_v31 = vrot.slane %v5621_v6, %v9507_v16  ;;  %v5636_v60 = vrot.slane %v5622_v34, %v9507_v16 }
 0x22a   : > { %1836 = vrot.lane.b32.xlu0 %v10091_v38, %s9154_s23  ;;  %v5545_v1 = vrot.slane %v5537_v55, %v9507_v16  ;;  %v5552_v22 = vrot.slane %v5538_v40, %v9507_v16  ;;  %v5561_v7 = vrot.slane %v5553_v20, %v9507_v16  ;;  %v5568_v62 = vrot.slane %v5554_v48, %v9507_v16  ;;  %v3139_v41 = vpop.permute.xlu1 %3138  ;;  %v3137_v51 = vpop.permute.xlu0 %3136 }
 0x22b   : > { %v5637_v52 = vcombine.low %v5613_v24, %v5629_v31  ;;  %v5638_v56 = vcombine.high %v5613_v24, %v5629_v31  ;;  %v5639_v19 = vcombine.low %v5620_v57, %v5636_v60  ;;  %v5640_v63 = vcombine.high %v5620_v57, %v5636_v60 }
 0x22c   : > { %v5569_v42 = vcombine.low %v5545_v1, %v5561_v7  ;;  %v5570_v47 = vcombine.high %v5545_v1, %v5561_v7  ;;  %v5571_v26 = vcombine.low %v5552_v22, %v5568_v62  ;;  %v5572_v30 = vcombine.high %v5552_v22, %v5568_v62 }
 0x22d   : > { %1854 = vrot.lane.b32.xlu1 %v10105_v32, %s9154_s23  ;;  %6594 = vst.msk [vmem:[%s10460_s2 + $0x8] sm:$0xff] %vm5440_vm1, %v5637_v52  ;;  %6610 = vst.msk [vmem:[%s10460_s2 + $0x88] sm:$0xff] %vm5440_vm1, %v5638_v56  ;;  %v2612_v3 = vcombine.low %v10325_v2, %v10409_v50  ;;  %v2613_v18 = vcombine.high %v10325_v2, %v10409_v50  ;;  %v2544_v9 = vcombine.low %v10331_v17, %v10411_v8 }
 0x22e   : > { %6626 = vst.msk [vmem:[%s10460_s2 + $0x108] sm:$0xff] %vm5440_vm1, %v5639_v19  ;;  %6642 = vst.msk [vmem:[%s10460_s2 + $0x188] sm:$0xff] %vm5440_vm1, %v5640_v63  ;;  %v2545_v11 = vcombine.high %v10331_v17, %v10411_v8  ;;  %1852 = vrot.lane.b32.xlu0 %v10107_v21, %s9154_s23  ;;  %v3332_v36 = vcombine.low %v9588_v59, %v3139_v41  ;;  %v3333_v2 = vcombine.high %v9588_v59, %v3139_v41  ;;  %v10520_v62 = vpop.permute.xlu1 %3154  ;;  %v10522_v52 = vpop.permute.xlu0 %3152 }
 0x22f   : > { %6593 = vst.msk [vmem:[%s10460_s2] sm:$0xff] %vm5440_vm1, %v5569_v42  ;;  %6609 = vst.msk [vmem:[%s10460_s2 + $0x80] sm:$0xff] %vm5440_vm1, %v5570_v47  ;;  %v3264_v50 = vcombine.low %v9649_v4, %v3137_v51  ;;  %v3265_v6 = vcombine.high %v9649_v4, %v3137_v51  ;;  %v2620_v17 = vrot.slane %v2612_v3, %v9485_v5 }
 0x230   : > { %6625 = vst.msk [vmem:[%s10460_s2 + $0x100] sm:$0xff] %vm5440_vm1, %v5571_v26  ;;  %6641 = vst.msk [vmem:[%s10460_s2 + $0x180] sm:$0xff] %vm5440_vm1, %v5572_v30  ;;  %v2627_v8 = vrot.slane %v2613_v18, %v9485_v5  ;;  %v2552_v34 = vrot.slane %v2544_v9, %v9485_v5  ;;  %v2559_v55 = vrot.slane %v2545_v11, %v9485_v5 }
 0x231   : > { %v10497_v40 = vrot.slane %v3332_v36, %v9485_v5  ;;  %v10500_v20 = vrot.slane %v3333_v2, %v9485_v5  ;;  %v10503_v59 = vrot.slane %v3264_v50, %v9485_v5  ;;  %v10506_v48 = vrot.slane %v3265_v6, %v9485_v5  ;;  %1870 = vrot.lane.b32.xlu1 %v10121_v53, %s9154_s23 }
 0x232   : > { %v2628_v4 = vcombine.low %v10392_v28, %v2620_v17  ;;  %v2629_v24 = vcombine.high %v10392_v28, %v2620_v17  ;;  %v2644_v57 = vcombine.low %v10395_v23, %v2627_v8  ;;  %v2645_v31 = vcombine.high %v10395_v23, %v2627_v8  ;;  %1868 = vrot.lane.b32.xlu0 %v10123_v61, %s9154_s23 }
 0x233   : > { %v2560_v60 = vcombine.low %v10402_v49, %v2552_v34  ;;  %v2561_v1 = vcombine.high %v10402_v49, %v2552_v34  ;;  %v2576_v22 = vcombine.low %v10405_v39, %v2559_v55  ;;  %v2577_v7 = vcombine.high %v10405_v39, %v2559_v55  ;;  %v3171_v55 = vpop.permute.xlu1 %3170 }
 0x234   : > { %v2636_v28 = vrot.slane %v2628_v4, %v9507_v16  ;;  %v2643_v56 = vrot.slane %v2629_v24, %v9507_v16  ;;  %v2652_v23 = vrot.slane %v2644_v57, %v9507_v16  ;;  %v2659_v19 = vrot.slane %v2645_v31, %v9507_v16  ;;  %v3169_v4 = vpop.permute.xlu0 %3168 }
 0x235   : > { %v2568_v63 = vrot.slane %v2560_v60, %v9507_v16  ;;  %v2575_v49 = vrot.slane %v2561_v1, %v9507_v16  ;;  %v2584_v41 = vrot.slane %v2576_v22, %v9507_v16  ;;  %v2591_v39 = vrot.slane %v2577_v7, %v9507_v16  ;;  %1886 = vrot.lane.b32.xlu1 %v10137_v58, %s9154_s23 }
 0x236   : > { %v6117_v51 = vcombine.low %v2636_v28, %v2643_v56  ;;  %v8908_v42 = vcombine.high %v2636_v28, %v2643_v56  ;;  %v6133_v47 = vcombine.low %v2652_v23, %v2659_v19  ;;  %v8909_v26 = vcombine.high %v2652_v23, %v2659_v19  ;;  %1884 = vrot.lane.b32.xlu0 %v10147_v44, %s9154_s23 }
 0x237   : > { %v6049_v30 = vcombine.low %v2568_v63, %v2575_v49  ;;  %v8906_v3 = vcombine.high %v2568_v63, %v2575_v49  ;;  %v6065_v18 = vcombine.low %v2584_v41, %v2591_v39  ;;  %v8907_v9 = vcombine.high %v2584_v41, %v2591_v39 }
 0x238   : > { %v6124_v11 = vrot.slane %v6117_v51, %v9485_v5  ;;  %v6132_v36 = vrot.slane %v8908_v42, %v9485_v5  ;;  %v6140_v2 = vrot.slane %v6133_v47, %v9485_v5  ;;  %v6148_v50 = vrot.slane %v8909_v26, %v9485_v5 }
 0x239   : > { %v6056_v6 = vrot.slane %v6049_v30, %v9485_v5  ;;  %v6064_v17 = vrot.slane %v8906_v3, %v9485_v5  ;;  %v6072_v8 = vrot.slane %v6065_v18, %v9485_v5  ;;  %v6080_v34 = vrot.slane %v8907_v9, %v9485_v5  ;;  %1902 = vrot.lane.b32.xlu1 %v10169_v33, %s9154_s23 }
 0x23a   : > { %v6149_v24 = vcombine.low %v6124_v11, %v6132_v36  ;;  %v6150_v57 = vcombine.high %v6124_v11, %v6132_v36  ;;  %v6165_v31 = vcombine.low %v6140_v2, %v6148_v50  ;;  %v6166_v60 = vcombine.high %v6140_v2, %v6148_v50  ;;  %1900 = vrot.lane.b32.xlu0 %v10179_v12, %s9154_s23  ;;  %v10560_v36 = vpop.permute.xlu1 %3186  ;;  %v10562_v2 = vpop.permute.xlu0 %3184 }
 0x23b   : > { %v6081_v1 = vcombine.low %v6056_v6, %v6064_v17  ;;  %v6082_v22 = vcombine.high %v6056_v6, %v6064_v17  ;;  %v6097_v7 = vcombine.low %v6072_v8, %v6080_v34  ;;  %v6098_v28 = vcombine.high %v6072_v8, %v6080_v34  ;;  %v12342_v17 = vld [vmem:[#allocation5_spill] sm:$0xff] }
 0x23c   : > { %v6157_v56 = vrot.slane %v6149_v24, %v9507_v16  ;;  %v6164_v23 = vrot.slane %v6150_v57, %v9507_v16  ;;  %v6173_v19 = vrot.slane %v6165_v31, %v9507_v16  ;;  %v6180_v63 = vrot.slane %v6166_v60, %v9507_v16 }
 0x23d   : > { %v6089_v49 = vrot.slane %v6081_v1, %v9507_v16  ;;  %v6096_v41 = vrot.slane %v6082_v22, %v9507_v16  ;;  %v6105_v39 = vrot.slane %v6097_v7, %v9507_v16  ;;  %v6112_v51 = vrot.slane %v6098_v28, %v9507_v16  ;;  %1918 = vrot.lane.b32.xlu1 %v10201_v15, %s9154_s23 }
 0x23e   : > { %v6181_v42 = vcombine.low %v6157_v56, %v6173_v19  ;;  %v6182_v47 = vcombine.high %v6157_v56, %v6173_v19  ;;  %v6183_v26 = vcombine.low %v6164_v23, %v6180_v63  ;;  %v6184_v30 = vcombine.high %v6164_v23, %v6180_v63  ;;  %1916 = vrot.lane.b32.xlu0 %v10203_v45, %s9154_s23  ;;  %v10624_v63 = vpop.permute.xlu1 %1830 }
 0x23f   : > { %v6113_v3 = vcombine.low %v6089_v49, %v6105_v39  ;;  %v6114_v18 = vcombine.high %v6089_v49, %v6105_v39  ;;  %v6115_v9 = vcombine.low %v6096_v41, %v6112_v51  ;;  %v6116_v11 = vcombine.high %v6096_v41, %v6112_v51  ;;  %v10626_v49 = vpop.permute.xlu0 %1828 }
 0x240   : > { %6602 = vst.msk [vmem:[%s10460_s2 + $0x48] sm:$0xff] %vm5440_vm1, %v6181_v42  ;;  %6618 = vst.msk [vmem:[%s10460_s2 + $0xc8] sm:$0xff] %vm5440_vm1, %v6182_v47  ;;  %v3876_v50 = vcombine.low %v9619_v27, %v10520_v62  ;;  %v3877_v6 = vcombine.high %v9619_v27, %v10520_v62  ;;  %v3808_v8 = vcombine.low %v12342_v17, %v10522_v52 }
 0x241   : > { %6634 = vst.msk [vmem:[%s10460_s2 + $0x148] sm:$0xff] %vm5440_vm1, %v6183_v26  ;;  %6650 = vst.msk [vmem:[%s10460_s2 + $0x1c8] sm:$0xff] %vm5440_vm1, %v6184_v30  ;;  %v3809_v34 = vcombine.high %v12342_v17, %v10522_v52  ;;  %v3348_v24 = vcombine.low %v10425_v37, %v3171_v55  ;;  %v3349_v57 = vcombine.high %v10425_v37, %v3171_v55  ;;  %3118 = vrot.lane.b32.xlu1 %v10089_v0, %s9155_s8 }
 0x242   : > { %6601 = vst.msk [vmem:[%s10460_s2 + $0x40] sm:$0xff] %vm5440_vm1, %v6113_v3  ;;  %6617 = vst.msk [vmem:[%s10460_s2 + $0xc0] sm:$0xff] %vm5440_vm1, %v6114_v18  ;;  %v3280_v27 = vcombine.low %v10427_v25, %v3169_v4  ;;  %v3281_v62 = vcombine.high %v10427_v25, %v3169_v4  ;;  %v10595_v52 = vrot.slane %v3876_v50, %v9485_v5  ;;  %3116 = vrot.lane.b32.xlu0 %v10091_v38, %s9155_s8 }
 0x243   : > { %6633 = vst.msk [vmem:[%s10460_s2 + $0x140] sm:$0xff] %vm5440_vm1, %v6115_v9  ;;  %6649 = vst.msk [vmem:[%s10460_s2 + $0x1c0] sm:$0xff] %vm5440_vm1, %v6116_v11  ;;  %v10598_v31 = vrot.slane %v3877_v6, %v9485_v5  ;;  %v10601_v60 = vrot.slane %v3808_v8, %v9485_v5  ;;  %v10604_v1 = vrot.slane %v3809_v34, %v9485_v5 }
 0x244   : > { %v3356_v37 = vrot.slane %v3348_v24, %v9485_v5  ;;  %v3363_v25 = vrot.slane %v3349_v57, %v9485_v5  ;;  %v3288_v0 = vrot.slane %v3280_v27, %v9485_v5  ;;  %v3295_v55 = vrot.slane %v3281_v62, %v9485_v5  ;;  %v10652_v27 = vpop.permute.xlu1 %1846  ;;  %v10654_v62 = vpop.permute.xlu0 %1844 }
 0x245   : > { %v3892_v4 = vcombine.low %v10441_v13, %v10560_v36  ;;  %v3893_v22 = vcombine.high %v10441_v13, %v10560_v36  ;;  %v3824_v7 = vcombine.low %v10443_v46, %v10562_v2  ;;  %v3825_v38 = vcombine.high %v10443_v46, %v10562_v2  ;;  %3134 = vrot.lane.b32.xlu1 %v10105_v32, %s9155_s8  ;;  %v12343_v13 = vld [vmem:[#allocation6_spill] sm:$0xff] }
 0x246   : > { %v3364_v28 = vcombine.low %v10497_v40, %v3356_v37  ;;  %v3365_v56 = vcombine.high %v10497_v40, %v3356_v37  ;;  %v3380_v23 = vcombine.low %v10500_v20, %v3363_v25  ;;  %v3381_v19 = vcombine.high %v10500_v20, %v3363_v25  ;;  %3132 = vrot.lane.b32.xlu0 %v10107_v21, %s9155_s8 }
 0x247   : > { %v3296_v41 = vcombine.low %v10503_v59, %v3288_v0  ;;  %v3297_v39 = vcombine.high %v10503_v59, %v3288_v0  ;;  %v3312_v51 = vcombine.low %v10506_v48, %v3295_v55  ;;  %v3313_v42 = vcombine.high %v10506_v48, %v3295_v55 }
 0x248   : > { %v3372_v40 = vrot.slane %v3364_v28, %v9507_v16  ;;  %v3379_v20 = vrot.slane %v3365_v56, %v9507_v16  ;;  %v3388_v47 = vrot.slane %v3380_v23, %v9507_v16  ;;  %v3395_v26 = vrot.slane %v3381_v19, %v9507_v16 }
 0x249   : > { %v3304_v32 = vrot.slane %v3296_v41, %v9507_v16  ;;  %v3311_v30 = vrot.slane %v3297_v39, %v9507_v16  ;;  %v3320_v59 = vrot.slane %v3312_v51, %v9507_v16  ;;  %v3327_v3 = vrot.slane %v3313_v42, %v9507_v16  ;;  %3150 = vrot.lane.b32.xlu1 %v10121_v53, %s9155_s8 }
 0x24a   : > { %v6725_v48 = vcombine.low %v3372_v40, %v3379_v20  ;;  %v8924_v18 = vcombine.high %v3372_v40, %v3379_v20  ;;  %v6741_v9 = vcombine.low %v3388_v47, %v3395_v26  ;;  %v8925_v21 = vcombine.high %v3388_v47, %v3395_v26  ;;  %3148 = vrot.lane.b32.xlu0 %v10123_v61, %s9155_s8 }
 0x24b   : > { %v6657_v11 = vcombine.low %v3304_v32, %v3311_v30  ;;  %v8922_v50 = vcombine.high %v3304_v32, %v3311_v30  ;;  %v6673_v6 = vcombine.low %v3320_v59, %v3327_v3  ;;  %v8923_v17 = vcombine.high %v3320_v59, %v3327_v3 }
 0x24c   : > { %v6732_v8 = vrot.slane %v6725_v48, %v9485_v5  ;;  %v6740_v34 = vrot.slane %v8924_v18, %v9485_v5  ;;  %v6748_v24 = vrot.slane %v6741_v9, %v9485_v5  ;;  %v6756_v57 = vrot.slane %v8925_v21, %v9485_v5  ;;  %v10672_v48 = vpop.permute.xlu1 %1862  ;;  %v10674_v18 = vpop.permute.xlu0 %1860 }
 0x24d   : > { %v6664_v53 = vrot.slane %v6657_v11, %v9485_v5  ;;  %v6672_v37 = vrot.slane %v8922_v50, %v9485_v5  ;;  %v6680_v25 = vrot.slane %v6673_v6, %v9485_v5  ;;  %v6688_v61 = vrot.slane %v8923_v17, %v9485_v5  ;;  %3166 = vrot.lane.b32.xlu1 %v10137_v58, %s9155_s8 }
 0x24e   : > { %v6757_v0 = vcombine.low %v6732_v8, %v6740_v34  ;;  %v6758_v55 = vcombine.high %v6732_v8, %v6740_v34  ;;  %v6773_v28 = vcombine.low %v6748_v24, %v6756_v57  ;;  %v6774_v56 = vcombine.high %v6748_v24, %v6756_v57  ;;  %3164 = vrot.lane.b32.xlu0 %v10147_v44, %s9155_s8 }
 0x24f   : > { %v6689_v23 = vcombine.low %v6664_v53, %v6672_v37  ;;  %v6690_v19 = vcombine.high %v6664_v53, %v6672_v37  ;;  %v6705_v41 = vcombine.low %v6680_v25, %v6688_v61  ;;  %v6706_v39 = vcombine.high %v6680_v25, %v6688_v61 }
 0x250   : > { %v6765_v51 = vrot.slane %v6757_v0, %v9507_v16  ;;  %v6772_v42 = vrot.slane %v6758_v55, %v9507_v16  ;;  %v6781_v40 = vrot.slane %v6773_v28, %v9507_v16  ;;  %v6788_v20 = vrot.slane %v6774_v56, %v9507_v16  ;;  %v10741_v61 = vpop.permute.xlu0 %1876 }
 0x251   : > { %v6697_v47 = vrot.slane %v6689_v23, %v9507_v16  ;;  %v6704_v58 = vrot.slane %v6690_v19, %v9507_v16  ;;  %v6713_v26 = vrot.slane %v6705_v41, %v9507_v16  ;;  %v6720_v32 = vrot.slane %v6706_v39, %v9507_v16  ;;  %3182 = vrot.lane.b32.xlu1 %v10169_v33, %s9155_s8 }
 0x252   : > { %v6789_v30 = vcombine.low %v6765_v51, %v6781_v40  ;;  %v6790_v59 = vcombine.high %v6765_v51, %v6781_v40  ;;  %v6791_v44 = vcombine.low %v6772_v42, %v6788_v20  ;;  %v6792_v3 = vcombine.high %v6772_v42, %v6788_v20  ;;  %3180 = vrot.lane.b32.xlu0 %v10179_v12, %s9155_s8 }
 0x253   : > { %v6721_v9 = vcombine.low %v6697_v47, %v6713_v26  ;;  %v6722_v21 = vcombine.high %v6697_v47, %v6713_v26  ;;  %v6723_v11 = vcombine.low %v6704_v58, %v6720_v32  ;;  %v6724_v50 = vcombine.high %v6704_v58, %v6720_v32 }
 0x254   : > { %7746 = vst.msk [vmem:[%s10681_s12 + $0x8] sm:$0xff] %vm5440_vm1, %v6789_v30  ;;  %7762 = vst.msk [vmem:[%s10681_s12 + $0x88] sm:$0xff] %vm5440_vm1, %v6790_v59  ;;  %v3900_v33 = vrot.slane %v3892_v4, %v9485_v5  ;;  %v3907_v12 = vrot.slane %v3893_v22, %v9485_v5  ;;  %v3832_v6 = vrot.slane %v3824_v7, %v9485_v5 }
 0x255   : > { %7778 = vst.msk [vmem:[%s10681_s12 + $0x108] sm:$0xff] %vm5440_vm1, %v6791_v44  ;;  %7794 = vst.msk [vmem:[%s10681_s12 + $0x188] sm:$0xff] %vm5440_vm1, %v6792_v3  ;;  %v3839_v17 = vrot.slane %v3825_v38, %v9485_v5  ;;  %v2188_v36 = vcombine.low %v12343_v13, %v10672_v48  ;;  %v2189_v4 = vcombine.high %v12343_v13, %v10672_v48  ;;  %3198 = vrot.lane.b32.xlu1 %v10201_v15, %s9155_s8  ;;  %v10739_v15 = vpop.permute.xlu1 %1878  ;;  %v12344_v48 = vld [vmem:[#allocation7_spill] sm:$0xff] }
 0x256   : > { %7745 = vst.msk [vmem:[%s10681_s12] sm:$0xff] %vm5440_vm1, %v6721_v9  ;;  %7761 = vst.msk [vmem:[%s10681_s12 + $0x80] sm:$0xff] %vm5440_vm1, %v6722_v21  ;;  %v2120_v22 = vcombine.low %v9785_v43, %v10674_v18  ;;  %v2121_v46 = vcombine.high %v9785_v43, %v10674_v18  ;;  %v3908_v2 = vcombine.low %v10595_v52, %v3900_v33  ;;  %3196 = vrot.lane.b32.xlu0 %v10203_v45, %s9155_s8 }
 0x257   : > { %7777 = vst.msk [vmem:[%s10681_s12 + $0x100] sm:$0xff] %vm5440_vm1, %v6723_v11  ;;  %7793 = vst.msk [vmem:[%s10681_s12 + $0x180] sm:$0xff] %vm5440_vm1, %v6724_v50  ;;  %v3909_v7 = vcombine.high %v10595_v52, %v3900_v33  ;;  %v3924_v38 = vcombine.low %v10598_v31, %v3907_v12  ;;  %v3925_v8 = vcombine.high %v10598_v31, %v3907_v12  ;;  %v1893_v11 = vpop.permute.xlu0 %1892 }
 0x258   : > { %v3840_v34 = vcombine.low %v10601_v60, %v3832_v6  ;;  %v3841_v24 = vcombine.high %v10601_v60, %v3832_v6  ;;  %v3856_v57 = vcombine.low %v10604_v1, %v3839_v17  ;;  %v3857_v53 = vcombine.high %v10604_v1, %v3839_v17 }
 0x259   : > { %v3916_v52 = vrot.slane %v3908_v2, %v9507_v16  ;;  %v3923_v37 = vrot.slane %v3909_v7, %v9507_v16  ;;  %v3932_v31 = vrot.slane %v3924_v38, %v9507_v16  ;;  %v3939_v25 = vrot.slane %v3925_v8, %v9507_v16  ;;  %v1895_v21 = vpop.permute.xlu1 %1894 }
 0x25a   : > { %v3848_v60 = vrot.slane %v3840_v34, %v9507_v16  ;;  %v3855_v0 = vrot.slane %v3841_v24, %v9507_v16  ;;  %v3864_v1 = vrot.slane %v3856_v57, %v9507_v16  ;;  %v3871_v45 = vrot.slane %v3857_v53, %v9507_v16 }
 0x25b   : > { %v7269_v55 = vcombine.low %v3916_v52, %v3923_v37  ;;  %v8940_v28 = vcombine.high %v3916_v52, %v3923_v37  ;;  %v7285_v56 = vcombine.low %v3932_v31, %v3939_v25  ;;  %v8941_v23 = vcombine.high %v3932_v31, %v3939_v25 }
 0x25c   : > { %v7201_v19 = vcombine.low %v3848_v60, %v3855_v0  ;;  %v8938_v41 = vcombine.high %v3848_v60, %v3855_v0  ;;  %v7217_v39 = vcombine.low %v3864_v1, %v3871_v45  ;;  %v8939_v51 = vcombine.high %v3864_v1, %v3871_v45 }
 0x25d   : > { %v7276_v42 = vrot.slane %v7269_v55, %v9485_v5  ;;  %v7284_v40 = vrot.slane %v8940_v28, %v9485_v5  ;;  %v7292_v20 = vrot.slane %v7285_v56, %v9485_v5  ;;  %v7300_v47 = vrot.slane %v8941_v23, %v9485_v5  ;;  %v10787_v23 = vpop.permute.xlu1 %1910 }
 0x25e   : > { %v7208_v58 = vrot.slane %v7201_v19, %v9485_v5  ;;  %v7216_v26 = vrot.slane %v8938_v41, %v9485_v5  ;;  %v7224_v32 = vrot.slane %v7217_v39, %v9485_v5  ;;  %v7232_v30 = vrot.slane %v8939_v51, %v9485_v5  ;;  %v10789_v19 = vpop.permute.xlu0 %1908 }
 0x25f   : > { %v7301_v59 = vcombine.low %v7276_v42, %v7284_v40  ;;  %v7302_v44 = vcombine.high %v7276_v42, %v7284_v40  ;;  %v7317_v3 = vcombine.low %v7292_v20, %v7300_v47  ;;  %v7318_v9 = vcombine.high %v7292_v20, %v7300_v47 }
 0x260   : > { %v7233_v50 = vcombine.low %v7208_v58, %v7216_v26  ;;  %v7234_v33 = vcombine.high %v7208_v58, %v7216_v26  ;;  %v7249_v12 = vcombine.low %v7224_v32, %v7232_v30  ;;  %v7250_v6 = vcombine.high %v7224_v32, %v7232_v30 }
 0x261   : > { %v7309_v17 = vrot.slane %v7301_v59, %v9507_v16  ;;  %v7316_v2 = vrot.slane %v7302_v44, %v9507_v16  ;;  %v7325_v7 = vrot.slane %v7317_v3, %v9507_v16  ;;  %v7332_v38 = vrot.slane %v7318_v9, %v9507_v16  ;;  %v10835_v44 = vpop.permute.xlu1 %3110 }
 0x262   : > { %v7241_v8 = vrot.slane %v7233_v50, %v9507_v16  ;;  %v7248_v34 = vrot.slane %v7234_v33, %v9507_v16  ;;  %v7257_v24 = vrot.slane %v7249_v12, %v9507_v16  ;;  %v7264_v57 = vrot.slane %v7250_v6, %v9507_v16  ;;  %v10837_v3 = vpop.permute.xlu0 %3108 }
 0x263   : > { %v7333_v53 = vcombine.low %v7309_v17, %v7325_v7  ;;  %v7334_v52 = vcombine.high %v7309_v17, %v7325_v7  ;;  %v7335_v37 = vcombine.low %v7316_v2, %v7332_v38  ;;  %v7336_v31 = vcombine.high %v7316_v2, %v7332_v38 }
 0x264   : > { %v7265_v25 = vcombine.low %v7241_v8, %v7257_v24  ;;  %v7266_v60 = vcombine.high %v7241_v8, %v7257_v24  ;;  %v7267_v0 = vcombine.low %v7248_v34, %v7264_v57  ;;  %v7268_v1 = vcombine.high %v7248_v34, %v7264_v57 }
 0x265   : > { %7754 = vst.msk [vmem:[%s10681_s12 + $0x48] sm:$0xff] %vm5440_vm1, %v7333_v53  ;;  %7770 = vst.msk [vmem:[%s10681_s12 + $0xc8] sm:$0xff] %vm5440_vm1, %v7334_v52  ;;  %v2196_v45 = vrot.slane %v2188_v36, %v9485_v5  ;;  %v2203_v55 = vrot.slane %v2189_v4, %v9485_v5  ;;  %v2128_v28 = vrot.slane %v2120_v22, %v9485_v5 }
 0x266   : > { %7786 = vst.msk [vmem:[%s10681_s12 + $0x148] sm:$0xff] %vm5440_vm1, %v7335_v37  ;;  %7802 = vst.msk [vmem:[%s10681_s12 + $0x1c8] sm:$0xff] %vm5440_vm1, %v7336_v31  ;;  %v2135_v56 = vrot.slane %v2121_v46, %v9485_v5  ;;  %v2732_v13 = vcombine.low %v12344_v48, %v10739_v15  ;;  %v2733_v36 = vcombine.high %v12344_v48, %v10739_v15 }
 0x267   : > { %7753 = vst.msk [vmem:[%s10681_s12 + $0x40] sm:$0xff] %vm5440_vm1, %v7265_v25  ;;  %7769 = vst.msk [vmem:[%s10681_s12 + $0xc0] sm:$0xff] %vm5440_vm1, %v7266_v60  ;;  %v2664_v43 = vcombine.low %v9801_v29, %v10741_v61  ;;  %v2665_v18 = vcombine.high %v9801_v29, %v10741_v61  ;;  %v2204_v4 = vcombine.low %v10624_v63, %v1895_v21 }
 0x268   : > { %7785 = vst.msk [vmem:[%s10681_s12 + $0x140] sm:$0xff] %vm5440_vm1, %v7267_v0  ;;  %7801 = vst.msk [vmem:[%s10681_s12 + $0x1c0] sm:$0xff] %vm5440_vm1, %v7268_v1  ;;  %v2205_v22 = vcombine.high %v10624_v63, %v1895_v21  ;;  %v2136_v46 = vcombine.low %v10626_v49, %v1893_v11  ;;  %v2137_v41 = vcombine.high %v10626_v49, %v1893_v11 }
 0x269   : > { %v10812_v39 = vrot.slane %v2732_v13, %v9485_v5  ;;  %v10815_v51 = vrot.slane %v2733_v36, %v9485_v5  ;;  %v10818_v15 = vrot.slane %v2664_v43, %v9485_v5  ;;  %v10821_v42 = vrot.slane %v2665_v18, %v9485_v5 }
 0x26a   : > { %v2212_v29 = vrot.slane %v2204_v4, %v9485_v5  ;;  %v2219_v63 = vrot.slane %v2205_v22, %v9485_v5  ;;  %v2144_v61 = vrot.slane %v2136_v46, %v9485_v5  ;;  %v2151_v49 = vrot.slane %v2137_v41, %v9485_v5 }
 0x26b   : > { %v2748_v40 = vcombine.low %v10652_v27, %v10787_v23  ;;  %v2749_v20 = vcombine.high %v10652_v27, %v10787_v23  ;;  %v2680_v47 = vcombine.low %v10654_v62, %v10789_v19  ;;  %v2681_v58 = vcombine.high %v10654_v62, %v10789_v19 }
 0x26c   : > { %v2220_v26 = vcombine.low %v2196_v45, %v2212_v29  ;;  %v2221_v32 = vcombine.high %v2196_v45, %v2212_v29  ;;  %v2236_v30 = vcombine.low %v2203_v55, %v2219_v63  ;;  %v2237_v59 = vcombine.high %v2203_v55, %v2219_v63  ;;  %v10851_v55 = vpop.permute.xlu1 %3126 }
 0x26d   : > { %v2152_v9 = vcombine.low %v2128_v28, %v2144_v61  ;;  %v2153_v21 = vcombine.high %v2128_v28, %v2144_v61  ;;  %v2168_v11 = vcombine.low %v2135_v56, %v2151_v49  ;;  %v2169_v50 = vcombine.high %v2135_v56, %v2151_v49  ;;  %v10853_v28 = vpop.permute.xlu0 %3124 }
 0x26e   : > { %v2228_v33 = vrot.slane %v2220_v26, %v9507_v16  ;;  %v2235_v12 = vrot.slane %v2221_v32, %v9507_v16  ;;  %v2244_v6 = vrot.slane %v2236_v30, %v9507_v16  ;;  %v2251_v17 = vrot.slane %v2237_v59, %v9507_v16 }
 0x26f   : > { %v2160_v2 = vrot.slane %v2152_v9, %v9507_v16  ;;  %v2167_v7 = vrot.slane %v2153_v21, %v9507_v16  ;;  %v2176_v38 = vrot.slane %v2168_v11, %v9507_v16  ;;  %v2183_v8 = vrot.slane %v2169_v50, %v9507_v16 }
 0x270   : > { %v5709_v34 = vcombine.low %v2228_v33, %v2235_v12  ;;  %v8896_v24 = vcombine.high %v2228_v33, %v2235_v12  ;;  %v5725_v57 = vcombine.low %v2244_v6, %v2251_v17  ;;  %v8897_v53 = vcombine.high %v2244_v6, %v2251_v17  ;;  %v10867_v6 = vpop.permute.xlu1 %3142 }
 0x271   : > { %v5641_v52 = vcombine.low %v2160_v2, %v2167_v7  ;;  %v8894_v37 = vcombine.high %v2160_v2, %v2167_v7  ;;  %v5657_v31 = vcombine.low %v2176_v38, %v2183_v8  ;;  %v8895_v25 = vcombine.high %v2176_v38, %v2183_v8  ;;  %v10869_v17 = vpop.permute.xlu0 %3140 }
 0x272   : > { %v5716_v60 = vrot.slane %v5709_v34, %v9485_v5  ;;  %v5724_v0 = vrot.slane %v8896_v24, %v9485_v5  ;;  %v5732_v1 = vrot.slane %v5725_v57, %v9485_v5  ;;  %v5740_v45 = vrot.slane %v8897_v53, %v9485_v5 }
 0x273   : > { %v5648_v56 = vrot.slane %v5641_v52, %v9485_v5  ;;  %v5656_v48 = vrot.slane %v8894_v37, %v9485_v5  ;;  %v5664_v13 = vrot.slane %v5657_v31, %v9485_v5  ;;  %v5672_v36 = vrot.slane %v8895_v25, %v9485_v5 }
 0x274   : > { %v5741_v43 = vcombine.low %v5716_v60, %v5724_v0  ;;  %v5742_v18 = vcombine.high %v5716_v60, %v5724_v0  ;;  %v5757_v4 = vcombine.low %v5732_v1, %v5740_v45  ;;  %v5758_v22 = vcombine.high %v5732_v1, %v5740_v45 }
 0x275   : > { %v5673_v46 = vcombine.low %v5648_v56, %v5656_v48  ;;  %v5674_v41 = vcombine.high %v5648_v56, %v5656_v48  ;;  %v5689_v29 = vcombine.low %v5664_v13, %v5672_v36  ;;  %v5690_v63 = vcombine.high %v5664_v13, %v5672_v36  ;;  %v10923_v56 = vpop.permute.xlu1 %3158  ;;  %v10925_v48 = vpop.permute.xlu0 %3156 }
 0x276   : > { %v5749_v61 = vrot.slane %v5741_v43, %v9507_v16  ;;  %v5756_v49 = vrot.slane %v5742_v18, %v9507_v16  ;;  %v5765_v26 = vrot.slane %v5757_v4, %v9507_v16  ;;  %v5772_v32 = vrot.slane %v5758_v22, %v9507_v16 }
 0x277   : > { %v5681_v30 = vrot.slane %v5673_v46, %v9507_v16  ;;  %v5688_v59 = vrot.slane %v5674_v41, %v9507_v16  ;;  %v5697_v9 = vrot.slane %v5689_v29, %v9507_v16  ;;  %v5704_v21 = vrot.slane %v5690_v63, %v9507_v16 }
 0x278   : > { %v5773_v11 = vcombine.low %v5749_v61, %v5765_v26  ;;  %v5774_v50 = vcombine.high %v5749_v61, %v5765_v26  ;;  %v5775_v33 = vcombine.low %v5756_v49, %v5772_v32  ;;  %v5776_v12 = vcombine.high %v5756_v49, %v5772_v32 }
 0x279   : > { %v5705_v2 = vcombine.low %v5681_v30, %v5697_v9  ;;  %v5706_v7 = vcombine.high %v5681_v30, %v5697_v9  ;;  %v5707_v38 = vcombine.low %v5688_v59, %v5704_v21  ;;  %v5708_v8 = vcombine.high %v5688_v59, %v5704_v21 }
 0x27a   : > { %6596 = vst.msk [vmem:[%s10460_s2 + $0x18] sm:$0xff] %vm5440_vm1, %v5773_v11  ;;  %6612 = vst.msk [vmem:[%s10460_s2 + $0x98] sm:$0xff] %vm5440_vm1, %v5774_v50  ;;  %v2756_v34 = vrot.slane %v2748_v40, %v9485_v5  ;;  %v2763_v24 = vrot.slane %v2749_v20, %v9485_v5  ;;  %v2688_v57 = vrot.slane %v2680_v47, %v9485_v5  ;;  %v12345_v40 = vld [vmem:[#allocation9_spill] sm:$0xff] }
 0x27b   : > { %6628 = vst.msk [vmem:[%s10460_s2 + $0x118] sm:$0xff] %vm5440_vm1, %v5775_v33  ;;  %6644 = vst.msk [vmem:[%s10460_s2 + $0x198] sm:$0xff] %vm5440_vm1, %v5776_v12  ;;  %v2695_v53 = vrot.slane %v2681_v58, %v9485_v5  ;;  %v3468_v27 = vcombine.low %v9799_v35, %v10867_v6  ;;  %v3469_v23 = vcombine.high %v9799_v35, %v10867_v6  ;;  %v3175_v12 = vpop.permute.xlu1 %3174  ;;  %v12346_v35 = vld [vmem:[#allocation8_spill] sm:$0xff] }
 0x27c   : > { %6595 = vst.msk [vmem:[%s10460_s2 + $0x10] sm:$0xff] %vm5440_vm1, %v5705_v2  ;;  %6611 = vst.msk [vmem:[%s10460_s2 + $0x90] sm:$0xff] %vm5440_vm1, %v5706_v7  ;;  %v3400_v20 = vcombine.low %v12345_v40, %v10869_v17  ;;  %v3401_v62 = vcombine.high %v12345_v40, %v10869_v17  ;;  %v2764_v19 = vcombine.low %v10812_v39, %v2756_v34  ;;  %v3173_v2 = vpop.permute.xlu0 %3172  ;;  %v12347_v17 = vld [vmem:[#allocation10_spill] sm:$0xff] }
 0x27d   : > { %6627 = vst.msk [vmem:[%s10460_s2 + $0x110] sm:$0xff] %vm5440_vm1, %v5707_v38  ;;  %6643 = vst.msk [vmem:[%s10460_s2 + $0x190] sm:$0xff] %vm5440_vm1, %v5708_v8  ;;  %v2765_v47 = vcombine.high %v10812_v39, %v2756_v34  ;;  %v2780_v58 = vcombine.low %v10815_v51, %v2763_v24  ;;  %v2781_v52 = vcombine.high %v10815_v51, %v2763_v24 }
 0x27e   : > { %v2696_v37 = vcombine.low %v10818_v15, %v2688_v57  ;;  %v2697_v31 = vcombine.high %v10818_v15, %v2688_v57  ;;  %v2712_v25 = vcombine.low %v10821_v42, %v2695_v53  ;;  %v2713_v60 = vcombine.high %v10821_v42, %v2695_v53 }
 0x27f   : > { %v2772_v0 = vrot.slane %v2764_v19, %v9507_v16  ;;  %v2779_v1 = vrot.slane %v2765_v47, %v9507_v16  ;;  %v2788_v45 = vrot.slane %v2780_v58, %v9507_v16  ;;  %v2795_v39 = vrot.slane %v2781_v52, %v9507_v16 }
 0x280   : > { %v2704_v51 = vrot.slane %v2696_v37, %v9507_v16  ;;  %v2711_v15 = vrot.slane %v2697_v31, %v9507_v16  ;;  %v2720_v13 = vrot.slane %v2712_v25, %v9507_v16  ;;  %v2727_v42 = vrot.slane %v2713_v60, %v9507_v16 }
 0x281   : > { %v6253_v36 = vcombine.low %v2772_v0, %v2779_v1  ;;  %v8912_v43 = vcombine.high %v2772_v0, %v2779_v1  ;;  %v6269_v18 = vcombine.low %v2788_v45, %v2795_v39  ;;  %v8913_v4 = vcombine.high %v2788_v45, %v2795_v39 }
 0x282   : > { %v6185_v22 = vcombine.low %v2704_v51, %v2711_v15  ;;  %v8910_v46 = vcombine.high %v2704_v51, %v2711_v15  ;;  %v6201_v41 = vcombine.low %v2720_v13, %v2727_v42  ;;  %v8911_v29 = vcombine.high %v2720_v13, %v2727_v42 }
 0x283   : > { %v6260_v63 = vrot.slane %v6253_v36, %v9485_v5  ;;  %v6268_v61 = vrot.slane %v8912_v43, %v9485_v5  ;;  %v6276_v49 = vrot.slane %v6269_v18, %v9485_v5  ;;  %v6284_v26 = vrot.slane %v8913_v4, %v9485_v5  ;;  %v10971_v43 = vpop.permute.xlu1 %3190  ;;  %v10973_v18 = vpop.permute.xlu0 %3188 }
 0x284   : > { %v6192_v32 = vrot.slane %v6185_v22, %v9485_v5  ;;  %v6200_v30 = vrot.slane %v8910_v46, %v9485_v5  ;;  %v6208_v59 = vrot.slane %v6201_v41, %v9485_v5  ;;  %v6216_v9 = vrot.slane %v8911_v29, %v9485_v5 }
 0x285   : > { %v6285_v21 = vcombine.low %v6260_v63, %v6268_v61  ;;  %v6286_v11 = vcombine.high %v6260_v63, %v6268_v61  ;;  %v6301_v50 = vcombine.low %v6276_v49, %v6284_v26  ;;  %v6302_v33 = vcombine.high %v6276_v49, %v6284_v26 }
 0x286   : > { %v6217_v7 = vcombine.low %v6192_v32, %v6200_v30  ;;  %v6218_v38 = vcombine.high %v6192_v32, %v6200_v30  ;;  %v6233_v8 = vcombine.low %v6208_v59, %v6216_v9  ;;  %v6234_v34 = vcombine.high %v6208_v59, %v6216_v9 }
 0x287   : > { %v6293_v24 = vrot.slane %v6285_v21, %v9507_v16  ;;  %v6300_v57 = vrot.slane %v6286_v11, %v9507_v16  ;;  %v6309_v53 = vrot.slane %v6301_v50, %v9507_v16  ;;  %v6316_v19 = vrot.slane %v6302_v33, %v9507_v16  ;;  %v11019_v11 = vpop.permute.xlu1 %1834  ;;  %v11021_v50 = vpop.permute.xlu0 %1832 }
 0x288   : > { %v6225_v47 = vrot.slane %v6217_v7, %v9507_v16  ;;  %v6232_v58 = vrot.slane %v6218_v38, %v9507_v16  ;;  %v6241_v52 = vrot.slane %v6233_v8, %v9507_v16  ;;  %v6248_v37 = vrot.slane %v6234_v34, %v9507_v16 }
 0x289   : > { %v6317_v31 = vcombine.low %v6293_v24, %v6309_v53  ;;  %v6318_v25 = vcombine.high %v6293_v24, %v6309_v53  ;;  %v6319_v60 = vcombine.low %v6300_v57, %v6316_v19  ;;  %v6320_v0 = vcombine.high %v6300_v57, %v6316_v19 }
 0x28a   : > { %v6249_v1 = vcombine.low %v6225_v47, %v6241_v52  ;;  %v6250_v45 = vcombine.high %v6225_v47, %v6241_v52  ;;  %v6251_v39 = vcombine.low %v6232_v58, %v6248_v37  ;;  %v6252_v51 = vcombine.high %v6232_v58, %v6248_v37 }
 0x28b   : > { %6604 = vst.msk [vmem:[%s10460_s2 + $0x58] sm:$0xff] %vm5440_vm1, %v6317_v31  ;;  %6620 = vst.msk [vmem:[%s10460_s2 + $0xd8] sm:$0xff] %vm5440_vm1, %v6318_v25  ;;  %v3476_v15 = vrot.slane %v3468_v27, %v9485_v5  ;;  %v3483_v13 = vrot.slane %v3469_v23, %v9485_v5  ;;  %v3408_v42 = vrot.slane %v3400_v20, %v9485_v5 }
 0x28c   : > { %6636 = vst.msk [vmem:[%s10460_s2 + $0x158] sm:$0xff] %vm5440_vm1, %v6319_v60  ;;  %6652 = vst.msk [vmem:[%s10460_s2 + $0x1d8] sm:$0xff] %vm5440_vm1, %v6320_v0  ;;  %v3415_v36 = vrot.slane %v3401_v62, %v9485_v5  ;;  %v4012_v6 = vcombine.low %v12346_v35, %v10923_v56  ;;  %v4013_v27 = vcombine.high %v12346_v35, %v10923_v56 }
 0x28d   : > { %6603 = vst.msk [vmem:[%s10460_s2 + $0x50] sm:$0xff] %vm5440_vm1, %v6249_v1  ;;  %6619 = vst.msk [vmem:[%s10460_s2 + $0xd0] sm:$0xff] %vm5440_vm1, %v6250_v45  ;;  %v3944_v23 = vcombine.low %v12347_v17, %v10925_v48  ;;  %v3945_v40 = vcombine.high %v12347_v17, %v10925_v48  ;;  %v3484_v20 = vcombine.low %v10835_v44, %v3175_v12 }
 0x28e   : > { %6635 = vst.msk [vmem:[%s10460_s2 + $0x150] sm:$0xff] %vm5440_vm1, %v6251_v39  ;;  %6651 = vst.msk [vmem:[%s10460_s2 + $0x1d0] sm:$0xff] %vm5440_vm1, %v6252_v51  ;;  %v3485_v62 = vcombine.high %v10835_v44, %v3175_v12  ;;  %v3416_v4 = vcombine.low %v10837_v3, %v3173_v2  ;;  %v3417_v22 = vcombine.high %v10837_v3, %v3173_v2 }
 0x28f   : > { %v10996_v46 = vrot.slane %v4012_v6, %v9485_v5  ;;  %v10999_v41 = vrot.slane %v4013_v27, %v9485_v5  ;;  %v11002_v56 = vrot.slane %v3944_v23, %v9485_v5  ;;  %v11005_v29 = vrot.slane %v3945_v40, %v9485_v5 }
 0x290   : > { %v3492_v48 = vrot.slane %v3484_v20, %v9485_v5  ;;  %v3499_v44 = vrot.slane %v3485_v62, %v9485_v5  ;;  %v3424_v63 = vrot.slane %v3416_v4, %v9485_v5  ;;  %v3431_v3 = vrot.slane %v3417_v22, %v9485_v5 }
 0x291   : > { %v4028_v61 = vcombine.low %v10851_v55, %v10971_v43  ;;  %v4029_v49 = vcombine.high %v10851_v55, %v10971_v43  ;;  %v3960_v26 = vcombine.low %v10853_v28, %v10973_v18  ;;  %v3961_v32 = vcombine.high %v10853_v28, %v10973_v18  ;;  %v12348_v55 = vld [vmem:[#allocation11_spill] sm:$0xff] }
 0x292   : > { %v3500_v30 = vcombine.low %v3476_v15, %v3492_v48  ;;  %v3501_v59 = vcombine.high %v3476_v15, %v3492_v48  ;;  %v3516_v9 = vcombine.low %v3483_v13, %v3499_v44  ;;  %v3517_v21 = vcombine.high %v3483_v13, %v3499_v44  ;;  %v11035_v13 = vpop.permute.xlu1 %1850 }
 0x293   : > { %v3432_v33 = vcombine.low %v3408_v42, %v3424_v63  ;;  %v3433_v12 = vcombine.high %v3408_v42, %v3424_v63  ;;  %v3448_v2 = vcombine.low %v3415_v36, %v3431_v3  ;;  %v3449_v7 = vcombine.high %v3415_v36, %v3431_v3  ;;  %v11037_v42 = vpop.permute.xlu0 %1848 }
 0x294   : > { %v3508_v38 = vrot.slane %v3500_v30, %v9507_v16  ;;  %v3515_v8 = vrot.slane %v3501_v59, %v9507_v16  ;;  %v3524_v34 = vrot.slane %v3516_v9, %v9507_v16  ;;  %v3531_v24 = vrot.slane %v3517_v21, %v9507_v16 }
 0x295   : > { %v3440_v57 = vrot.slane %v3432_v33, %v9507_v16  ;;  %v3447_v53 = vrot.slane %v3433_v12, %v9507_v16  ;;  %v3456_v19 = vrot.slane %v3448_v2, %v9507_v16  ;;  %v3463_v47 = vrot.slane %v3449_v7, %v9507_v16 }
 0x296   : > { %v6861_v58 = vcombine.low %v3508_v38, %v3515_v8  ;;  %v8928_v52 = vcombine.high %v3508_v38, %v3515_v8  ;;  %v6877_v37 = vcombine.low %v3524_v34, %v3531_v24  ;;  %v8929_v31 = vcombine.high %v3524_v34, %v3531_v24  ;;  %v11051_v8 = vpop.permute.xlu1 %1866 }
 0x297   : > { %v6793_v25 = vcombine.low %v3440_v57, %v3447_v53  ;;  %v8926_v60 = vcombine.high %v3440_v57, %v3447_v53  ;;  %v6809_v0 = vcombine.low %v3456_v19, %v3463_v47  ;;  %v8927_v1 = vcombine.high %v3456_v19, %v3463_v47  ;;  %v11053_v34 = vpop.permute.xlu0 %1864 }
 0x298   : > { %v6868_v45 = vrot.slane %v6861_v58, %v9485_v5  ;;  %v6876_v39 = vrot.slane %v8928_v52, %v9485_v5  ;;  %v6884_v51 = vrot.slane %v6877_v37, %v9485_v5  ;;  %v6892_v15 = vrot.slane %v8929_v31, %v9485_v5 }
 0x299   : > { %v6800_v36 = vrot.slane %v6793_v25, %v9485_v5  ;;  %v6808_v35 = vrot.slane %v8926_v60, %v9485_v5  ;;  %v6816_v6 = vrot.slane %v6809_v0, %v9485_v5  ;;  %v6824_v27 = vrot.slane %v8927_v1, %v9485_v5 }
 0x29a   : > { %v6893_v17 = vcombine.low %v6868_v45, %v6876_v39  ;;  %v6894_v23 = vcombine.high %v6868_v45, %v6876_v39  ;;  %v6909_v40 = vcombine.low %v6884_v51, %v6892_v15  ;;  %v6910_v20 = vcombine.high %v6884_v51, %v6892_v15 }
 0x29b   : > { %v6825_v62 = vcombine.low %v6800_v36, %v6808_v35  ;;  %v6826_v4 = vcombine.high %v6800_v36, %v6808_v35  ;;  %v6841_v22 = vcombine.low %v6816_v6, %v6824_v27  ;;  %v6842_v48 = vcombine.high %v6816_v6, %v6824_v27  ;;  %v11107_v36 = vpop.permute.xlu1 %1882  ;;  %v11109_v35 = vpop.permute.xlu0 %1880 }
 0x29c   : > { %v6901_v44 = vrot.slane %v6893_v17, %v9507_v16  ;;  %v6908_v63 = vrot.slane %v6894_v23, %v9507_v16  ;;  %v6917_v3 = vrot.slane %v6909_v40, %v9507_v16  ;;  %v6924_v30 = vrot.slane %v6910_v20, %v9507_v16 }
 0x29d   : > { %v6833_v59 = vrot.slane %v6825_v62, %v9507_v16  ;;  %v6840_v9 = vrot.slane %v6826_v4, %v9507_v16  ;;  %v6849_v21 = vrot.slane %v6841_v22, %v9507_v16  ;;  %v6856_v33 = vrot.slane %v6842_v48, %v9507_v16 }
 0x29e   : > { %v6925_v12 = vcombine.low %v6901_v44, %v6917_v3  ;;  %v6926_v2 = vcombine.high %v6901_v44, %v6917_v3  ;;  %v6927_v7 = vcombine.low %v6908_v63, %v6924_v30  ;;  %v6928_v38 = vcombine.high %v6908_v63, %v6924_v30 }
 0x29f   : > { %v6857_v24 = vcombine.low %v6833_v59, %v6849_v21  ;;  %v6858_v57 = vcombine.high %v6833_v59, %v6849_v21  ;;  %v6859_v53 = vcombine.low %v6840_v9, %v6856_v33  ;;  %v6860_v19 = vcombine.high %v6840_v9, %v6856_v33 }
 0x2a0   : > { %7748 = vst.msk [vmem:[%s10681_s12 + $0x18] sm:$0xff] %vm5440_vm1, %v6925_v12  ;;  %7764 = vst.msk [vmem:[%s10681_s12 + $0x98] sm:$0xff] %vm5440_vm1, %v6926_v2  ;;  %v4036_v47 = vrot.slane %v4028_v61, %v9485_v5  ;;  %v4043_v58 = vrot.slane %v4029_v49, %v9485_v5  ;;  %v3968_v52 = vrot.slane %v3960_v26, %v9485_v5  ;;  %v12349_v49 = vld [vmem:[#allocation12_spill] sm:$0xff] }
 0x2a1   : > { %7780 = vst.msk [vmem:[%s10681_s12 + $0x118] sm:$0xff] %vm5440_vm1, %v6927_v7  ;;  %7796 = vst.msk [vmem:[%s10681_s12 + $0x198] sm:$0xff] %vm5440_vm1, %v6928_v38  ;;  %v3975_v37 = vrot.slane %v3961_v32, %v9485_v5  ;;  %v2324_v43 = vcombine.low %v12348_v55, %v11051_v8  ;;  %v2325_v61 = vcombine.high %v12348_v55, %v11051_v8  ;;  %v1899_v38 = vpop.permute.xlu1 %1898 }
 0x2a2   : > { %7747 = vst.msk [vmem:[%s10681_s12 + $0x10] sm:$0xff] %vm5440_vm1, %v6857_v24  ;;  %7763 = vst.msk [vmem:[%s10681_s12 + $0x90] sm:$0xff] %vm5440_vm1, %v6858_v57  ;;  %v2256_v26 = vcombine.low %v12349_v49, %v11053_v34  ;;  %v2257_v28 = vcombine.high %v12349_v49, %v11053_v34  ;;  %v4044_v18 = vcombine.low %v10996_v46, %v4036_v47  ;;  %v1897_v24 = vpop.permute.xlu0 %1896 }
 0x2a3   : > { %7779 = vst.msk [vmem:[%s10681_s12 + $0x110] sm:$0xff] %vm5440_vm1, %v6859_v53  ;;  %7795 = vst.msk [vmem:[%s10681_s12 + $0x190] sm:$0xff] %vm5440_vm1, %v6860_v19  ;;  %v4045_v32 = vcombine.high %v10996_v46, %v4036_v47  ;;  %v4060_v31 = vcombine.low %v10999_v41, %v4043_v58  ;;  %v4061_v25 = vcombine.high %v10999_v41, %v4043_v58 }
 0x2a4   : > { %v3976_v60 = vcombine.low %v11002_v56, %v3968_v52  ;;  %v3977_v0 = vcombine.high %v11002_v56, %v3968_v52  ;;  %v3992_v1 = vcombine.low %v11005_v29, %v3975_v37  ;;  %v3993_v45 = vcombine.high %v11005_v29, %v3975_v37 }
 0x2a5   : > { %v4052_v39 = vrot.slane %v4044_v18, %v9507_v16  ;;  %v4059_v51 = vrot.slane %v4045_v32, %v9507_v16  ;;  %v4068_v15 = vrot.slane %v4060_v31, %v9507_v16  ;;  %v4075_v46 = vrot.slane %v4061_v25, %v9507_v16 }
 0x2a6   : > { %v3984_v41 = vrot.slane %v3976_v60, %v9507_v16  ;;  %v3991_v56 = vrot.slane %v3977_v0, %v9507_v16  ;;  %v4000_v6 = vrot.slane %v3992_v1, %v9507_v16  ;;  %v4007_v29 = vrot.slane %v3993_v45, %v9507_v16 }
 0x2a7   : > { %v7405_v27 = vcombine.low %v4052_v39, %v4059_v51  ;;  %v8944_v17 = vcombine.high %v4052_v39, %v4059_v51  ;;  %v7421_v23 = vcombine.low %v4068_v15, %v4075_v46  ;;  %v8945_v40 = vcombine.high %v4068_v15, %v4075_v46 }
 0x2a8   : > { %v7337_v20 = vcombine.low %v3984_v41, %v3991_v56  ;;  %v8942_v62 = vcombine.high %v3984_v41, %v3991_v56  ;;  %v7353_v4 = vcombine.low %v4000_v6, %v4007_v29  ;;  %v8943_v22 = vcombine.high %v4000_v6, %v4007_v29 }
 0x2a9   : > { %v7412_v48 = vrot.slane %v7405_v27, %v9485_v5  ;;  %v7420_v44 = vrot.slane %v8944_v17, %v9485_v5  ;;  %v7428_v63 = vrot.slane %v7421_v23, %v9485_v5  ;;  %v7436_v3 = vrot.slane %v8945_v40, %v9485_v5  ;;  %v11155_v17 = vpop.permute.xlu1 %1914  ;;  %v11157_v23 = vpop.permute.xlu0 %1912 }
 0x2aa   : > { %v7344_v30 = vrot.slane %v7337_v20, %v9485_v5  ;;  %v7352_v59 = vrot.slane %v8942_v62, %v9485_v5  ;;  %v7360_v9 = vrot.slane %v7353_v4, %v9485_v5  ;;  %v7368_v21 = vrot.slane %v8943_v22, %v9485_v5 }
 0x2ab   : > { %v7437_v33 = vcombine.low %v7412_v48, %v7420_v44  ;;  %v7438_v12 = vcombine.high %v7412_v48, %v7420_v44  ;;  %v7453_v2 = vcombine.low %v7428_v63, %v7436_v3  ;;  %v7454_v7 = vcombine.high %v7428_v63, %v7436_v3 }
 0x2ac   : > { %v7369_v57 = vcombine.low %v7344_v30, %v7352_v59  ;;  %v7370_v53 = vcombine.high %v7344_v30, %v7352_v59  ;;  %v7385_v19 = vcombine.low %v7360_v9, %v7368_v21  ;;  %v7386_v47 = vcombine.high %v7360_v9, %v7368_v21 }
 0x2ad   : > { %v7445_v58 = vrot.slane %v7437_v33, %v9507_v16  ;;  %v7452_v52 = vrot.slane %v7438_v12, %v9507_v16  ;;  %v7461_v37 = vrot.slane %v7453_v2, %v9507_v16  ;;  %v7468_v18 = vrot.slane %v7454_v7, %v9507_v16  ;;  %v11203_v59 = vpop.permute.xlu1 %3114  ;;  %v11205_v9 = vpop.permute.xlu0 %3112 }
 0x2ae   : > { %v7377_v32 = vrot.slane %v7369_v57, %v9507_v16  ;;  %v7384_v31 = vrot.slane %v7370_v53, %v9507_v16  ;;  %v7393_v25 = vrot.slane %v7385_v19, %v9507_v16  ;;  %v7400_v60 = vrot.slane %v7386_v47, %v9507_v16 }
 0x2af   : > { %v7469_v0 = vcombine.low %v7445_v58, %v7461_v37  ;;  %v7470_v1 = vcombine.high %v7445_v58, %v7461_v37  ;;  %v7471_v45 = vcombine.low %v7452_v52, %v7468_v18  ;;  %v7472_v39 = vcombine.high %v7452_v52, %v7468_v18 }
 0x2b0   : > { %v7401_v51 = vcombine.low %v7377_v32, %v7393_v25  ;;  %v7402_v15 = vcombine.high %v7377_v32, %v7393_v25  ;;  %v7403_v46 = vcombine.low %v7384_v31, %v7400_v60  ;;  %v7404_v41 = vcombine.high %v7384_v31, %v7400_v60 }
 0x2b1   : > { %7756 = vst.msk [vmem:[%s10681_s12 + $0x58] sm:$0xff] %vm5440_vm1, %v7469_v0  ;;  %7772 = vst.msk [vmem:[%s10681_s12 + $0xd8] sm:$0xff] %vm5440_vm1, %v7470_v1  ;;  %v2332_v56 = vrot.slane %v2324_v43, %v9485_v5  ;;  %v2339_v6 = vrot.slane %v2325_v61, %v9485_v5  ;;  %v2264_v29 = vrot.slane %v2256_v26, %v9485_v5 }
 0x2b2   : > { %7788 = vst.msk [vmem:[%s10681_s12 + $0x158] sm:$0xff] %vm5440_vm1, %v7471_v45  ;;  %7804 = vst.msk [vmem:[%s10681_s12 + $0x1d8] sm:$0xff] %vm5440_vm1, %v7472_v39  ;;  %v2271_v27 = vrot.slane %v2257_v28, %v9485_v5  ;;  %v2868_v8 = vcombine.low %v10013_v54, %v11107_v36  ;;  %v2869_v55 = vcombine.high %v10013_v54, %v11107_v36 }
 0x2b3   : > { %7755 = vst.msk [vmem:[%s10681_s12 + $0x50] sm:$0xff] %vm5440_vm1, %v7401_v51  ;;  %7771 = vst.msk [vmem:[%s10681_s12 + $0xd0] sm:$0xff] %vm5440_vm1, %v7402_v15  ;;  %v2800_v34 = vcombine.low %v10015_v10, %v11109_v35  ;;  %v2801_v43 = vcombine.high %v10015_v10, %v11109_v35  ;;  %v2340_v61 = vcombine.low %v11019_v11, %v1899_v38  ;;  %v11219_v15 = vpop.permute.xlu1 %3130 }
 0x2b4   : > { %7787 = vst.msk [vmem:[%s10681_s12 + $0x150] sm:$0xff] %vm5440_vm1, %v7403_v46  ;;  %7803 = vst.msk [vmem:[%s10681_s12 + $0x1d0] sm:$0xff] %vm5440_vm1, %v7404_v41  ;;  %v2341_v49 = vcombine.high %v11019_v11, %v1899_v38  ;;  %v2272_v26 = vcombine.low %v11021_v50, %v1897_v24  ;;  %v2273_v28 = vcombine.high %v11021_v50, %v1897_v24  ;;  %v11221_v46 = vpop.permute.xlu0 %3128 }
 0x2b5   : > { %v11180_v40 = vrot.slane %v2868_v8, %v9485_v5  ;;  %v11183_v20 = vrot.slane %v2869_v55, %v9485_v5  ;;  %v11186_v54 = vrot.slane %v2800_v34, %v9485_v5  ;;  %v11189_v36 = vrot.slane %v2801_v43, %v9485_v5 }
 0x2b6   : > { %v2348_v10 = vrot.slane %v2340_v61, %v9485_v5  ;;  %v2355_v11 = vrot.slane %v2341_v49, %v9485_v5  ;;  %v2280_v35 = vrot.slane %v2272_v26, %v9485_v5  ;;  %v2287_v50 = vrot.slane %v2273_v28, %v9485_v5 }
 0x2b7   : > { %v2884_v62 = vcombine.low %v11035_v13, %v11155_v17  ;;  %v2885_v4 = vcombine.high %v11035_v13, %v11155_v17  ;;  %v2816_v22 = vcombine.low %v11037_v42, %v11157_v23  ;;  %v2817_v48 = vcombine.high %v11037_v42, %v11157_v23 }
 0x2b8   : > { %v2356_v44 = vcombine.low %v2332_v56, %v2348_v10  ;;  %v2357_v63 = vcombine.high %v2332_v56, %v2348_v10  ;;  %v2372_v3 = vcombine.low %v2339_v6, %v2355_v11  ;;  %v2373_v30 = vcombine.high %v2339_v6, %v2355_v11 }
 0x2b9   : > { %v2288_v21 = vcombine.low %v2264_v29, %v2280_v35  ;;  %v2289_v33 = vcombine.high %v2264_v29, %v2280_v35  ;;  %v2304_v12 = vcombine.low %v2271_v27, %v2287_v50  ;;  %v2305_v2 = vcombine.high %v2271_v27, %v2287_v50 }
 0x2ba   : > { %v2364_v7 = vrot.slane %v2356_v44, %v9507_v16  ;;  %v2371_v38 = vrot.slane %v2357_v63, %v9507_v16  ;;  %v2380_v24 = vrot.slane %v2372_v3, %v9507_v16  ;;  %v2387_v57 = vrot.slane %v2373_v30, %v9507_v16 }
 0x2bb   : > { %v2296_v53 = vrot.slane %v2288_v21, %v9507_v16  ;;  %v2303_v19 = vrot.slane %v2289_v33, %v9507_v16  ;;  %v2312_v47 = vrot.slane %v2304_v12, %v9507_v16  ;;  %v2319_v58 = vrot.slane %v2305_v2, %v9507_v16  ;;  %v11235_v2 = vpop.permute.xlu1 %3146 }
 0x2bc   : > { %v5845_v52 = vcombine.low %v2364_v7, %v2371_v38  ;;  %v8900_v37 = vcombine.high %v2364_v7, %v2371_v38  ;;  %v5861_v18 = vcombine.low %v2380_v24, %v2387_v57  ;;  %v8901_v32 = vcombine.high %v2380_v24, %v2387_v57  ;;  %v11237_v7 = vpop.permute.xlu0 %3144 }
 0x2bd   : > { %v5777_v31 = vcombine.low %v2296_v53, %v2303_v19  ;;  %v8898_v25 = vcombine.high %v2296_v53, %v2303_v19  ;;  %v5793_v60 = vcombine.low %v2312_v47, %v2319_v58  ;;  %v8899_v0 = vcombine.high %v2312_v47, %v2319_v58 }
 0x2be   : > { %v5852_v1 = vrot.slane %v5845_v52, %v9485_v5  ;;  %v5860_v45 = vrot.slane %v8900_v37, %v9485_v5  ;;  %v5868_v39 = vrot.slane %v5861_v18, %v9485_v5  ;;  %v5876_v51 = vrot.slane %v8901_v32, %v9485_v5 }
 0x2bf   : > { %v5784_v41 = vrot.slane %v5777_v31, %v9485_v5  ;;  %v5792_v56 = vrot.slane %v8898_v25, %v9485_v5  ;;  %v5800_v6 = vrot.slane %v5793_v60, %v9485_v5  ;;  %v5808_v29 = vrot.slane %v8899_v0, %v9485_v5 }
 0x2c0   : > { %v5877_v27 = vcombine.low %v5852_v1, %v5860_v45  ;;  %v5878_v8 = vcombine.high %v5852_v1, %v5860_v45  ;;  %v5893_v55 = vcombine.low %v5868_v39, %v5876_v51  ;;  %v5894_v34 = vcombine.high %v5868_v39, %v5876_v51  ;;  %v11291_v45 = vpop.permute.xlu1 %3162  ;;  %v11293_v39 = vpop.permute.xlu0 %3160 }
 0x2c1   : > { %v5809_v43 = vcombine.low %v5784_v41, %v5792_v56  ;;  %v5810_v61 = vcombine.high %v5784_v41, %v5792_v56  ;;  %v5825_v49 = vcombine.low %v5800_v6, %v5808_v29  ;;  %v5826_v26 = vcombine.high %v5800_v6, %v5808_v29 }
 0x2c2   : > { %v5885_v28 = vrot.slane %v5877_v27, %v9507_v16  ;;  %v5892_v10 = vrot.slane %v5878_v8, %v9507_v16  ;;  %v5901_v11 = vrot.slane %v5893_v55, %v9507_v16  ;;  %v5908_v35 = vrot.slane %v5894_v34, %v9507_v16 }
 0x2c3   : > { %v5817_v50 = vrot.slane %v5809_v43, %v9507_v16  ;;  %v5824_v44 = vrot.slane %v5810_v61, %v9507_v16  ;;  %v5833_v63 = vrot.slane %v5825_v49, %v9507_v16  ;;  %v5840_v3 = vrot.slane %v5826_v26, %v9507_v16 }
 0x2c4   : > { %v5909_v30 = vcombine.low %v5885_v28, %v5901_v11  ;;  %v5910_v21 = vcombine.high %v5885_v28, %v5901_v11  ;;  %v5911_v33 = vcombine.low %v5892_v10, %v5908_v35  ;;  %v5912_v12 = vcombine.high %v5892_v10, %v5908_v35 }
 0x2c5   : > { %v5841_v38 = vcombine.low %v5817_v50, %v5833_v63  ;;  %v5842_v24 = vcombine.high %v5817_v50, %v5833_v63  ;;  %v5843_v57 = vcombine.low %v5824_v44, %v5840_v3  ;;  %v5844_v53 = vcombine.high %v5824_v44, %v5840_v3 }
 0x2c6   : > { %6598 = vst.msk [vmem:[%s10460_s2 + $0x28] sm:$0xff] %vm5440_vm1, %v5909_v30  ;;  %6614 = vst.msk [vmem:[%s10460_s2 + $0xa8] sm:$0xff] %vm5440_vm1, %v5910_v21  ;;  %v2892_v19 = vrot.slane %v2884_v62, %v9485_v5  ;;  %v2899_v47 = vrot.slane %v2885_v4, %v9485_v5  ;;  %v2824_v58 = vrot.slane %v2816_v22, %v9485_v5  ;;  %v12350_v62 = vld [vmem:[#allocation13_spill] sm:$0xff]  ;;  %v3179_v30 = vpop.permute.xlu1 %3178  ;;  %v3177_v21 = vpop.permute.xlu0 %3176 }
 0x2c7   : > { %6630 = vst.msk [vmem:[%s10460_s2 + $0x128] sm:$0xff] %vm5440_vm1, %v5911_v33  ;;  %6646 = vst.msk [vmem:[%s10460_s2 + $0x1a8] sm:$0xff] %vm5440_vm1, %v5912_v12  ;;  %v2831_v52 = vrot.slane %v2817_v48, %v9485_v5  ;;  %v3604_v13 = vcombine.low %v10029_v14, %v11235_v2  ;;  %v3605_v17 = vcombine.high %v10029_v14, %v11235_v2  ;;  %v12351_v14 = vld [vmem:[#allocation14_spill] sm:$0xff] }
 0x2c8   : > { %6597 = vst.msk [vmem:[%s10460_s2 + $0x20] sm:$0xff] %vm5440_vm1, %v5841_v38  ;;  %6613 = vst.msk [vmem:[%s10460_s2 + $0xa0] sm:$0xff] %vm5440_vm1, %v5842_v24  ;;  %v3536_v4 = vcombine.low %v12350_v62, %v11237_v7  ;;  %v3537_v42 = vcombine.high %v12350_v62, %v11237_v7  ;;  %v2900_v23 = vcombine.low %v11180_v40, %v2892_v19  ;;  %v12352_v7 = vld [vmem:[#allocation15_spill] sm:$0xff] }
 0x2c9   : > { %6629 = vst.msk [vmem:[%s10460_s2 + $0x120] sm:$0xff] %vm5440_vm1, %v5843_v57  ;;  %6645 = vst.msk [vmem:[%s10460_s2 + $0x1a0] sm:$0xff] %vm5440_vm1, %v5844_v53  ;;  %v2901_v22 = vcombine.high %v11180_v40, %v2892_v19  ;;  %v2916_v48 = vcombine.low %v11183_v20, %v2899_v47  ;;  %v2917_v37 = vcombine.high %v11183_v20, %v2899_v47 }
 0x2ca   : > { %v2832_v18 = vcombine.low %v11186_v54, %v2824_v58  ;;  %v2833_v32 = vcombine.high %v11186_v54, %v2824_v58  ;;  %v2848_v31 = vcombine.low %v11189_v36, %v2831_v52  ;;  %v2849_v25 = vcombine.high %v11189_v36, %v2831_v52 }
 0x2cb   : > { %v2908_v60 = vrot.slane %v2900_v23, %v9507_v16  ;;  %v2915_v0 = vrot.slane %v2901_v22, %v9507_v16  ;;  %v2924_v1 = vrot.slane %v2916_v48, %v9507_v16  ;;  %v2931_v40 = vrot.slane %v2917_v37, %v9507_v16 }
 0x2cc   : > { %v2840_v20 = vrot.slane %v2832_v18, %v9507_v16  ;;  %v2847_v54 = vrot.slane %v2833_v32, %v9507_v16  ;;  %v2856_v51 = vrot.slane %v2848_v31, %v9507_v16  ;;  %v2863_v36 = vrot.slane %v2849_v25, %v9507_v16 }
 0x2cd   : > { %v6389_v41 = vcombine.low %v2908_v60, %v2915_v0  ;;  %v8916_v56 = vcombine.high %v2908_v60, %v2915_v0  ;;  %v6405_v6 = vcombine.low %v2924_v1, %v2931_v40  ;;  %v8917_v29 = vcombine.high %v2924_v1, %v2931_v40 }
 0x2ce   : > { %v6321_v27 = vcombine.low %v2840_v20, %v2847_v54  ;;  %v8914_v8 = vcombine.high %v2840_v20, %v2847_v54  ;;  %v6337_v55 = vcombine.low %v2856_v51, %v2863_v36  ;;  %v8915_v34 = vcombine.high %v2856_v51, %v2863_v36  ;;  %v11339_v51 = vpop.permute.xlu1 %3194  ;;  %v11341_v36 = vpop.permute.xlu0 %3192 }
 0x2cf   : > { %v6396_v43 = vrot.slane %v6389_v41, %v9485_v5  ;;  %v6404_v61 = vrot.slane %v8916_v56, %v9485_v5  ;;  %v6412_v49 = vrot.slane %v6405_v6, %v9485_v5  ;;  %v6420_v26 = vrot.slane %v8917_v29, %v9485_v5 }
 0x2d0   : > { %v6328_v28 = vrot.slane %v6321_v27, %v9485_v5  ;;  %v6336_v10 = vrot.slane %v8914_v8, %v9485_v5  ;;  %v6344_v11 = vrot.slane %v6337_v55, %v9485_v5  ;;  %v6352_v35 = vrot.slane %v8915_v34, %v9485_v5 }
 0x2d1   : > { %v6421_v50 = vcombine.low %v6396_v43, %v6404_v61  ;;  %v6422_v44 = vcombine.high %v6396_v43, %v6404_v61  ;;  %v6437_v63 = vcombine.low %v6412_v49, %v6420_v26  ;;  %v6438_v3 = vcombine.high %v6412_v49, %v6420_v26 }
 0x2d2   : > { %v6353_v33 = vcombine.low %v6328_v28, %v6336_v10  ;;  %v6354_v12 = vcombine.high %v6328_v28, %v6336_v10  ;;  %v6369_v38 = vcombine.low %v6344_v11, %v6352_v35  ;;  %v6370_v24 = vcombine.high %v6344_v11, %v6352_v35  ;;  %v11387_v11 = vpop.permute.xlu1 %1838  ;;  %v11389_v35 = vpop.permute.xlu0 %1836 }
 0x2d3   : > { %v6429_v57 = vrot.slane %v6421_v50, %v9507_v16  ;;  %v6436_v53 = vrot.slane %v6422_v44, %v9507_v16  ;;  %v6445_v19 = vrot.slane %v6437_v63, %v9507_v16  ;;  %v6452_v47 = vrot.slane %v6438_v3, %v9507_v16 }
 0x2d4   : > { %v6361_v58 = vrot.slane %v6353_v33, %v9507_v16  ;;  %v6368_v52 = vrot.slane %v6354_v12, %v9507_v16  ;;  %v6377_v23 = vrot.slane %v6369_v38, %v9507_v16  ;;  %v6384_v22 = vrot.slane %v6370_v24, %v9507_v16 }
 0x2d5   : > { %v6453_v48 = vcombine.low %v6429_v57, %v6445_v19  ;;  %v6454_v37 = vcombine.high %v6429_v57, %v6445_v19  ;;  %v6455_v18 = vcombine.low %v6436_v53, %v6452_v47  ;;  %v6456_v32 = vcombine.high %v6436_v53, %v6452_v47 }
 0x2d6   : > { %v6385_v31 = vcombine.low %v6361_v58, %v6377_v23  ;;  %v6386_v25 = vcombine.high %v6361_v58, %v6377_v23  ;;  %v6387_v60 = vcombine.low %v6368_v52, %v6384_v22  ;;  %v6388_v0 = vcombine.high %v6368_v52, %v6384_v22 }
 0x2d7   : > { %6606 = vst.msk [vmem:[%s10460_s2 + $0x68] sm:$0xff] %vm5440_vm1, %v6453_v48  ;;  %6622 = vst.msk [vmem:[%s10460_s2 + $0xe8] sm:$0xff] %vm5440_vm1, %v6454_v37  ;;  %v3612_v1 = vrot.slane %v3604_v13, %v9485_v5  ;;  %v3619_v40 = vrot.slane %v3605_v17, %v9485_v5  ;;  %v3544_v20 = vrot.slane %v3536_v4, %v9485_v5 }
 0x2d8   : > { %6638 = vst.msk [vmem:[%s10460_s2 + $0x168] sm:$0xff] %vm5440_vm1, %v6455_v18  ;;  %6654 = vst.msk [vmem:[%s10460_s2 + $0x1e8] sm:$0xff] %vm5440_vm1, %v6456_v32  ;;  %v3551_v54 = vrot.slane %v3537_v42, %v9485_v5  ;;  %v4148_v2 = vcombine.low %v12351_v14, %v11291_v45  ;;  %v4149_v13 = vcombine.high %v12351_v14, %v11291_v45 }
 0x2d9   : > { %6605 = vst.msk [vmem:[%s10460_s2 + $0x60] sm:$0xff] %vm5440_vm1, %v6385_v31  ;;  %6621 = vst.msk [vmem:[%s10460_s2 + $0xe0] sm:$0xff] %vm5440_vm1, %v6386_v25  ;;  %v4080_v17 = vcombine.low %v12352_v7, %v11293_v39  ;;  %v4081_v62 = vcombine.high %v12352_v7, %v11293_v39  ;;  %v3620_v4 = vcombine.low %v11203_v59, %v3179_v30 }
 0x2da   : > { %6637 = vst.msk [vmem:[%s10460_s2 + $0x160] sm:$0xff] %vm5440_vm1, %v6387_v60  ;;  %6653 = vst.msk [vmem:[%s10460_s2 + $0x1e0] sm:$0xff] %vm5440_vm1, %v6388_v0  ;;  %v3621_v42 = vcombine.high %v11203_v59, %v3179_v30  ;;  %v3552_v41 = vcombine.low %v11205_v9, %v3177_v21  ;;  %v3553_v56 = vcombine.high %v11205_v9, %v3177_v21  ;;  %v11403_v60 = vpop.permute.xlu1 %1854  ;;  %v11405_v0 = vpop.permute.xlu0 %1852 }
 0x2db   : > { %v11364_v6 = vrot.slane %v4148_v2, %v9485_v5  ;;  %v11367_v29 = vrot.slane %v4149_v13, %v9485_v5  ;;  %v11370_v45 = vrot.slane %v4080_v17, %v9485_v5  ;;  %v11373_v27 = vrot.slane %v4081_v62, %v9485_v5 }
 0x2dc   : > { %v3628_v39 = vrot.slane %v3620_v4, %v9485_v5  ;;  %v3635_v59 = vrot.slane %v3621_v42, %v9485_v5  ;;  %v3560_v8 = vrot.slane %v3552_v41, %v9485_v5  ;;  %v3567_v9 = vrot.slane %v3553_v56, %v9485_v5 }
 0x2dd   : > { %v4164_v55 = vcombine.low %v11219_v15, %v11339_v51  ;;  %v4165_v34 = vcombine.high %v11219_v15, %v11339_v51  ;;  %v4096_v43 = vcombine.low %v11221_v46, %v11341_v36  ;;  %v4097_v61 = vcombine.high %v11221_v46, %v11341_v36  ;;  %v12353_v15 = vld [vmem:[#allocation16_spill] sm:$0xff] }
 0x2de   : > { %v3636_v49 = vcombine.low %v3612_v1, %v3628_v39  ;;  %v3637_v26 = vcombine.high %v3612_v1, %v3628_v39  ;;  %v3652_v28 = vcombine.low %v3619_v40, %v3635_v59  ;;  %v3653_v10 = vcombine.high %v3619_v40, %v3635_v59 }
 0x2df   : > { %v3568_v50 = vcombine.low %v3544_v20, %v3560_v8  ;;  %v3569_v44 = vcombine.high %v3544_v20, %v3560_v8  ;;  %v3584_v63 = vcombine.low %v3551_v54, %v3567_v9  ;;  %v3585_v3 = vcombine.high %v3551_v54, %v3567_v9 }
 0x2e0   : > { %v3644_v30 = vrot.slane %v3636_v49, %v9507_v16  ;;  %v3651_v21 = vrot.slane %v3637_v26, %v9507_v16  ;;  %v3660_v33 = vrot.slane %v3652_v28, %v9507_v16  ;;  %v3667_v12 = vrot.slane %v3653_v10, %v9507_v16 }
 0x2e1   : > { %v3576_v38 = vrot.slane %v3568_v50, %v9507_v16  ;;  %v3583_v24 = vrot.slane %v3569_v44, %v9507_v16  ;;  %v3592_v57 = vrot.slane %v3584_v63, %v9507_v16  ;;  %v3599_v53 = vrot.slane %v3585_v3, %v9507_v16  ;;  %v11419_v63 = vpop.permute.xlu1 %1870  ;;  %v11421_v3 = vpop.permute.xlu0 %1868 }
 0x2e2   : > { %v6997_v19 = vcombine.low %v3644_v30, %v3651_v21  ;;  %v8932_v47 = vcombine.high %v3644_v30, %v3651_v21  ;;  %v7013_v58 = vcombine.low %v3660_v33, %v3667_v12  ;;  %v8933_v52 = vcombine.high %v3660_v33, %v3667_v12 }
 0x2e3   : > { %v6929_v23 = vcombine.low %v3576_v38, %v3583_v24  ;;  %v8930_v22 = vcombine.high %v3576_v38, %v3583_v24  ;;  %v6945_v48 = vcombine.low %v3592_v57, %v3599_v53  ;;  %v8931_v37 = vcombine.high %v3592_v57, %v3599_v53 }
 0x2e4   : > { %v7004_v18 = vrot.slane %v6997_v19, %v9485_v5  ;;  %v7012_v32 = vrot.slane %v8932_v47, %v9485_v5  ;;  %v7020_v31 = vrot.slane %v7013_v58, %v9485_v5  ;;  %v7028_v25 = vrot.slane %v8933_v52, %v9485_v5 }
 0x2e5   : > { %v6936_v1 = vrot.slane %v6929_v23, %v9485_v5  ;;  %v6944_v40 = vrot.slane %v8930_v22, %v9485_v5  ;;  %v6952_v20 = vrot.slane %v6945_v48, %v9485_v5  ;;  %v6960_v54 = vrot.slane %v8931_v37, %v9485_v5 }
 0x2e6   : > { %v7029_v14 = vcombine.low %v7004_v18, %v7012_v32  ;;  %v7030_v2 = vcombine.high %v7004_v18, %v7012_v32  ;;  %v7045_v13 = vcombine.low %v7020_v31, %v7028_v25  ;;  %v7046_v7 = vcombine.high %v7020_v31, %v7028_v25  ;;  %v11475_v32 = vpop.permute.xlu1 %1886  ;;  %v11477_v31 = vpop.permute.xlu0 %1884 }
 0x2e7   : > { %v6961_v17 = vcombine.low %v6936_v1, %v6944_v40  ;;  %v6962_v62 = vcombine.high %v6936_v1, %v6944_v40  ;;  %v6977_v4 = vcombine.low %v6952_v20, %v6960_v54  ;;  %v6978_v42 = vcombine.high %v6952_v20, %v6960_v54 }
 0x2e8   : > { %v7037_v41 = vrot.slane %v7029_v14, %v9507_v16  ;;  %v7044_v56 = vrot.slane %v7030_v2, %v9507_v16  ;;  %v7053_v39 = vrot.slane %v7045_v13, %v9507_v16  ;;  %v7060_v59 = vrot.slane %v7046_v7, %v9507_v16 }
 0x2e9   : > { %v6969_v8 = vrot.slane %v6961_v17, %v9507_v16  ;;  %v6976_v9 = vrot.slane %v6962_v62, %v9507_v16  ;;  %v6985_v49 = vrot.slane %v6977_v4, %v9507_v16  ;;  %v6992_v26 = vrot.slane %v6978_v42, %v9507_v16 }
 0x2ea   : > { %v7061_v28 = vcombine.low %v7037_v41, %v7053_v39  ;;  %v7062_v10 = vcombine.high %v7037_v41, %v7053_v39  ;;  %v7063_v50 = vcombine.low %v7044_v56, %v7060_v59  ;;  %v7064_v44 = vcombine.high %v7044_v56, %v7060_v59 }
 0x2eb   : > { %v6993_v30 = vcombine.low %v6969_v8, %v6985_v49  ;;  %v6994_v21 = vcombine.high %v6969_v8, %v6985_v49  ;;  %v6995_v33 = vcombine.low %v6976_v9, %v6992_v26  ;;  %v6996_v12 = vcombine.high %v6976_v9, %v6992_v26 }
 0x2ec   : > { %7750 = vst.msk [vmem:[%s10681_s12 + $0x28] sm:$0xff] %vm5440_vm1, %v7061_v28  ;;  %7766 = vst.msk [vmem:[%s10681_s12 + $0xa8] sm:$0xff] %vm5440_vm1, %v7062_v10  ;;  %v4172_v38 = vrot.slane %v4164_v55, %v9485_v5  ;;  %v4179_v24 = vrot.slane %v4165_v34, %v9485_v5  ;;  %v4104_v57 = vrot.slane %v4096_v43, %v9485_v5  ;;  %v12354_v34 = vld [vmem:[#allocation17_spill] sm:$0xff]  ;;  %v1903_v28 = vpop.permute.xlu1 %1902  ;;  %v1901_v10 = vpop.permute.xlu0 %1900 }
 0x2ed   : > { %7782 = vst.msk [vmem:[%s10681_s12 + $0x128] sm:$0xff] %vm5440_vm1, %v7063_v50  ;;  %7798 = vst.msk [vmem:[%s10681_s12 + $0x1a8] sm:$0xff] %vm5440_vm1, %v7064_v44  ;;  %v4111_v53 = vrot.slane %v4097_v61, %v9485_v5  ;;  %v2460_v51 = vcombine.low %v12353_v15, %v11419_v63  ;;  %v2461_v55 = vcombine.high %v12353_v15, %v11419_v63  ;;  %v12355_v63 = vld [vmem:[#allocation18_spill] sm:$0xff] }
 0x2ee   : > { %7749 = vst.msk [vmem:[%s10681_s12 + $0x20] sm:$0xff] %vm5440_vm1, %v6993_v30  ;;  %7765 = vst.msk [vmem:[%s10681_s12 + $0xa0] sm:$0xff] %vm5440_vm1, %v6994_v21  ;;  %v2392_v43 = vcombine.low %v12354_v34, %v11421_v3  ;;  %v2393_v46 = vcombine.high %v12354_v34, %v11421_v3  ;;  %v4180_v36 = vcombine.low %v11364_v6, %v4172_v38  ;;  %v12356_v3 = vld [vmem:[#allocation19_spill] sm:$0xff] }
 0x2ef   : > { %7781 = vst.msk [vmem:[%s10681_s12 + $0x120] sm:$0xff] %vm5440_vm1, %v6995_v33  ;;  %7797 = vst.msk [vmem:[%s10681_s12 + $0x1a0] sm:$0xff] %vm5440_vm1, %v6996_v12  ;;  %v4181_v61 = vcombine.high %v11364_v6, %v4172_v38  ;;  %v4196_v19 = vcombine.low %v11367_v29, %v4179_v24  ;;  %v4197_v47 = vcombine.high %v11367_v29, %v4179_v24 }
 0x2f0   : > { %v4112_v58 = vcombine.low %v11370_v45, %v4104_v57  ;;  %v4113_v52 = vcombine.high %v11370_v45, %v4104_v57  ;;  %v4128_v23 = vcombine.low %v11373_v27, %v4111_v53  ;;  %v4129_v22 = vcombine.high %v11373_v27, %v4111_v53 }
 0x2f1   : > { %v4188_v48 = vrot.slane %v4180_v36, %v9507_v16  ;;  %v4195_v37 = vrot.slane %v4181_v61, %v9507_v16  ;;  %v4204_v18 = vrot.slane %v4196_v19, %v9507_v16  ;;  %v4211_v6 = vrot.slane %v4197_v47, %v9507_v16 }
 0x2f2   : > { %v4120_v29 = vrot.slane %v4112_v58, %v9507_v16  ;;  %v4127_v45 = vrot.slane %v4113_v52, %v9507_v16  ;;  %v4136_v25 = vrot.slane %v4128_v23, %v9507_v16  ;;  %v4143_v27 = vrot.slane %v4129_v22, %v9507_v16 }
 0x2f3   : > { %v7541_v1 = vcombine.low %v4188_v48, %v4195_v37  ;;  %v8948_v40 = vcombine.high %v4188_v48, %v4195_v37  ;;  %v7557_v20 = vcombine.low %v4204_v18, %v4211_v6  ;;  %v8949_v54 = vcombine.high %v4204_v18, %v4211_v6 }
 0x2f4   : > { %v7473_v14 = vcombine.low %v4120_v29, %v4127_v45  ;;  %v8946_v2 = vcombine.high %v4120_v29, %v4127_v45  ;;  %v7489_v13 = vcombine.low %v4136_v25, %v4143_v27  ;;  %v8947_v7 = vcombine.high %v4136_v25, %v4143_v27  ;;  %v11523_v25 = vpop.permute.xlu1 %1918  ;;  %v11525_v27 = vpop.permute.xlu0 %1916 }
 0x2f5   : > { %v7548_v17 = vrot.slane %v7541_v1, %v9485_v5  ;;  %v7556_v62 = vrot.slane %v8948_v40, %v9485_v5  ;;  %v7564_v4 = vrot.slane %v7557_v20, %v9485_v5  ;;  %v7572_v42 = vrot.slane %v8949_v54, %v9485_v5 }
 0x2f6   : > { %v7480_v41 = vrot.slane %v7473_v14, %v9485_v5  ;;  %v7488_v56 = vrot.slane %v8946_v2, %v9485_v5  ;;  %v7496_v39 = vrot.slane %v7489_v13, %v9485_v5  ;;  %v7504_v59 = vrot.slane %v8947_v7, %v9485_v5 }
 0x2f7   : > { %v7573_v8 = vcombine.low %v7548_v17, %v7556_v62  ;;  %v7574_v9 = vcombine.high %v7548_v17, %v7556_v62  ;;  %v7589_v49 = vcombine.low %v7564_v4, %v7572_v42  ;;  %v7590_v26 = vcombine.high %v7564_v4, %v7572_v42 }
 0x2f8   : > { %v7505_v50 = vcombine.low %v7480_v41, %v7488_v56  ;;  %v7506_v44 = vcombine.high %v7480_v41, %v7488_v56  ;;  %v7521_v30 = vcombine.low %v7496_v39, %v7504_v59  ;;  %v7522_v21 = vcombine.high %v7496_v39, %v7504_v59  ;;  %v11571_v39 = vpop.permute.xlu1 %3118  ;;  %v11573_v59 = vpop.permute.xlu0 %3116 }
 0x2f9   : > { %v7581_v33 = vrot.slane %v7573_v8, %v9507_v16  ;;  %v7588_v12 = vrot.slane %v7574_v9, %v9507_v16  ;;  %v7597_v38 = vrot.slane %v7589_v49, %v9507_v16  ;;  %v7604_v24 = vrot.slane %v7590_v26, %v9507_v16 }
 0x2fa   : > { %v7513_v57 = vrot.slane %v7505_v50, %v9507_v16  ;;  %v7520_v53 = vrot.slane %v7506_v44, %v9507_v16  ;;  %v7529_v36 = vrot.slane %v7521_v30, %v9507_v16  ;;  %v7536_v61 = vrot.slane %v7522_v21, %v9507_v16 }
 0x2fb   : > { %v7605_v19 = vcombine.low %v7581_v33, %v7597_v38  ;;  %v7606_v47 = vcombine.high %v7581_v33, %v7597_v38  ;;  %v7607_v58 = vcombine.low %v7588_v12, %v7604_v24  ;;  %v7608_v52 = vcombine.high %v7588_v12, %v7604_v24 }
 0x2fc   : > { %v7537_v23 = vcombine.low %v7513_v57, %v7529_v36  ;;  %v7538_v22 = vcombine.high %v7513_v57, %v7529_v36  ;;  %v7539_v48 = vcombine.low %v7520_v53, %v7536_v61  ;;  %v7540_v37 = vcombine.high %v7520_v53, %v7536_v61 }
 0x2fd   : > { %7758 = vst.msk [vmem:[%s10681_s12 + $0x68] sm:$0xff] %vm5440_vm1, %v7605_v19  ;;  %7774 = vst.msk [vmem:[%s10681_s12 + $0xe8] sm:$0xff] %vm5440_vm1, %v7606_v47  ;;  %v2468_v18 = vrot.slane %v2460_v51, %v9485_v5  ;;  %v2475_v6 = vrot.slane %v2461_v55, %v9485_v5  ;;  %v2400_v29 = vrot.slane %v2392_v43, %v9485_v5 }
 0x2fe   : > { %7790 = vst.msk [vmem:[%s10681_s12 + $0x168] sm:$0xff] %vm5440_vm1, %v7607_v58  ;;  %7806 = vst.msk [vmem:[%s10681_s12 + $0x1e8] sm:$0xff] %vm5440_vm1, %v7608_v52  ;;  %v2407_v45 = vrot.slane %v2393_v46, %v9485_v5  ;;  %v3004_v15 = vcombine.low %v12355_v63, %v11475_v32  ;;  %v3005_v51 = vcombine.high %v12355_v63, %v11475_v32 }
 0x2ff   : > { %7757 = vst.msk [vmem:[%s10681_s12 + $0x60] sm:$0xff] %vm5440_vm1, %v7537_v23  ;;  %7773 = vst.msk [vmem:[%s10681_s12 + $0xe0] sm:$0xff] %vm5440_vm1, %v7538_v22  ;;  %v2936_v55 = vcombine.low %v12356_v3, %v11477_v31  ;;  %v2937_v34 = vcombine.high %v12356_v3, %v11477_v31  ;;  %v2476_v43 = vcombine.low %v11387_v11, %v1903_v28 }
 0x300   : > { %7789 = vst.msk [vmem:[%s10681_s12 + $0x160] sm:$0xff] %vm5440_vm1, %v7539_v48  ;;  %7805 = vst.msk [vmem:[%s10681_s12 + $0x1e0] sm:$0xff] %vm5440_vm1, %v7540_v37  ;;  %v2477_v46 = vcombine.high %v11387_v11, %v1903_v28  ;;  %v2408_v1 = vcombine.low %v11389_v35, %v1901_v10  ;;  %v2409_v40 = vcombine.high %v11389_v35, %v1901_v10  ;;  %v11587_v48 = vpop.permute.xlu1 %3134  ;;  %v11589_v37 = vpop.permute.xlu0 %3132 }
 0x301   : > { %v11548_v20 = vrot.slane %v3004_v15, %v9485_v5  ;;  %v11551_v54 = vrot.slane %v3005_v51, %v9485_v5  ;;  %v11554_v32 = vrot.slane %v2936_v55, %v9485_v5  ;;  %v11557_v14 = vrot.slane %v2937_v34, %v9485_v5 }
 0x302   : > { %v2484_v31 = vrot.slane %v2476_v43, %v9485_v5  ;;  %v2491_v11 = vrot.slane %v2477_v46, %v9485_v5  ;;  %v2416_v2 = vrot.slane %v2408_v1, %v9485_v5  ;;  %v2423_v35 = vrot.slane %v2409_v40, %v9485_v5 }
 0x303   : > { %v3020_v13 = vcombine.low %v11403_v60, %v11523_v25  ;;  %v3021_v7 = vcombine.high %v11403_v60, %v11523_v25  ;;  %v2952_v17 = vcombine.low %v11405_v0, %v11525_v27  ;;  %v2953_v62 = vcombine.high %v11405_v0, %v11525_v27  ;;  %v12357_v60 = vld [vmem:[#allocation20_spill] sm:$0xff] }
 0x304   : > { %v2492_v4 = vcombine.low %v2468_v18, %v2484_v31  ;;  %v2493_v42 = vcombine.high %v2468_v18, %v2484_v31  ;;  %v2508_v41 = vcombine.low %v2475_v6, %v2491_v11  ;;  %v2509_v56 = vcombine.high %v2475_v6, %v2491_v11 }
 0x305   : > { %v2424_v8 = vcombine.low %v2400_v29, %v2416_v2  ;;  %v2425_v9 = vcombine.high %v2400_v29, %v2416_v2  ;;  %v2440_v49 = vcombine.low %v2407_v45, %v2423_v35  ;;  %v2441_v26 = vcombine.high %v2407_v45, %v2423_v35 }
 0x306   : > { %v2500_v28 = vrot.slane %v2492_v4, %v9507_v16  ;;  %v2507_v10 = vrot.slane %v2493_v42, %v9507_v16  ;;  %v2516_v50 = vrot.slane %v2508_v41, %v9507_v16  ;;  %v2523_v44 = vrot.slane %v2509_v56, %v9507_v16 }
 0x307   : > { %v2432_v30 = vrot.slane %v2424_v8, %v9507_v16  ;;  %v2439_v21 = vrot.slane %v2425_v9, %v9507_v16  ;;  %v2448_v33 = vrot.slane %v2440_v49, %v9507_v16  ;;  %v2455_v12 = vrot.slane %v2441_v26, %v9507_v16  ;;  %v11603_v49 = vpop.permute.xlu1 %3150  ;;  %v11605_v26 = vpop.permute.xlu0 %3148 }
 0x308   : > { %v5981_v38 = vcombine.low %v2500_v28, %v2507_v10  ;;  %v8904_v24 = vcombine.high %v2500_v28, %v2507_v10  ;;  %v5997_v57 = vcombine.low %v2516_v50, %v2523_v44  ;;  %v8905_v53 = vcombine.high %v2516_v50, %v2523_v44 }
 0x309   : > { %v5913_v36 = vcombine.low %v2432_v30, %v2439_v21  ;;  %v8902_v61 = vcombine.high %v2432_v30, %v2439_v21  ;;  %v5929_v19 = vcombine.low %v2448_v33, %v2455_v12  ;;  %v8903_v47 = vcombine.high %v2448_v33, %v2455_v12 }
 0x30a   : > { %v5988_v58 = vrot.slane %v5981_v38, %v9485_v5  ;;  %v5996_v52 = vrot.slane %v8904_v24, %v9485_v5  ;;  %v6004_v23 = vrot.slane %v5997_v57, %v9485_v5  ;;  %v6012_v22 = vrot.slane %v8905_v53, %v9485_v5 }
 0x30b   : > { %v5920_v18 = vrot.slane %v5913_v36, %v9485_v5  ;;  %v5928_v6 = vrot.slane %v8902_v61, %v9485_v5  ;;  %v5936_v29 = vrot.slane %v5929_v19, %v9485_v5  ;;  %v5944_v45 = vrot.slane %v8903_v47, %v9485_v5 }
 0x30c   : > { %v6013_v63 = vcombine.low %v5988_v58, %v5996_v52  ;;  %v6014_v15 = vcombine.high %v5988_v58, %v5996_v52  ;;  %v6029_v51 = vcombine.low %v6004_v23, %v6012_v22  ;;  %v6030_v3 = vcombine.high %v6004_v23, %v6012_v22 }
 0x30d   : > { %v5945_v55 = vcombine.low %v5920_v18, %v5928_v6  ;;  %v5946_v34 = vcombine.high %v5920_v18, %v5928_v6  ;;  %v5961_v43 = vcombine.low %v5936_v29, %v5944_v45  ;;  %v5962_v46 = vcombine.high %v5936_v29, %v5944_v45  ;;  %v3167_v29 = vpop.permute.xlu1 %3166  ;;  %v11663_v45 = vpop.permute.xlu0 %3164 }
 0x30e   : > { %v6021_v1 = vrot.slane %v6013_v63, %v9507_v16  ;;  %v6028_v40 = vrot.slane %v6014_v15, %v9507_v16  ;;  %v6037_v31 = vrot.slane %v6029_v51, %v9507_v16  ;;  %v6044_v11 = vrot.slane %v6030_v3, %v9507_v16 }
 0x30f   : > { %v5953_v2 = vrot.slane %v5945_v55, %v9507_v16  ;;  %v5960_v35 = vrot.slane %v5946_v34, %v9507_v16  ;;  %v5969_v4 = vrot.slane %v5961_v43, %v9507_v16  ;;  %v5976_v42 = vrot.slane %v5962_v46, %v9507_v16 }
 0x310   : > { %v6045_v41 = vcombine.low %v6021_v1, %v6037_v31  ;;  %v6046_v56 = vcombine.high %v6021_v1, %v6037_v31  ;;  %v6047_v8 = vcombine.low %v6028_v40, %v6044_v11  ;;  %v6048_v9 = vcombine.high %v6028_v40, %v6044_v11 }
 0x311   : > { %v5977_v28 = vcombine.low %v5953_v2, %v5969_v4  ;;  %v5978_v10 = vcombine.high %v5953_v2, %v5969_v4  ;;  %v5979_v50 = vcombine.low %v5960_v35, %v5976_v42  ;;  %v5980_v44 = vcombine.high %v5960_v35, %v5976_v42 }
 0x312   : > { %6600 = vst.msk [vmem:[%s10460_s2 + $0x38] sm:$0xff] %vm5440_vm1, %v6045_v41  ;;  %6616 = vst.msk [vmem:[%s10460_s2 + $0xb8] sm:$0xff] %vm5440_vm1, %v6046_v56  ;;  %v3028_v30 = vrot.slane %v3020_v13, %v9485_v5  ;;  %v3035_v21 = vrot.slane %v3021_v7, %v9485_v5  ;;  %v2960_v33 = vrot.slane %v2952_v17, %v9485_v5  ;;  %v12358_v7 = vld [vmem:[#allocation21_spill] sm:$0xff] }
 0x313   : > { %6632 = vst.msk [vmem:[%s10460_s2 + $0x138] sm:$0xff] %vm5440_vm1, %v6047_v8  ;;  %6648 = vst.msk [vmem:[%s10460_s2 + $0x1b8] sm:$0xff] %vm5440_vm1, %v6048_v9  ;;  %v2967_v12 = vrot.slane %v2953_v62, %v9485_v5  ;;  %v3740_v25 = vcombine.low %v12357_v60, %v11603_v49  ;;  %v3741_v13 = vcombine.high %v12357_v60, %v11603_v49  ;;  %v12359_v49 = vld [vmem:[#allocation22_spill] sm:$0xff] }
 0x314   : > { %6599 = vst.msk [vmem:[%s10460_s2 + $0x30] sm:$0xff] %vm5440_vm1, %v5977_v28  ;;  %6615 = vst.msk [vmem:[%s10460_s2 + $0xb0] sm:$0xff] %vm5440_vm1, %v5978_v10  ;;  %v3672_v17 = vcombine.low %v12358_v7, %v11605_v26  ;;  %v3673_v0 = vcombine.high %v12358_v7, %v11605_v26  ;;  %v3036_v27 = vcombine.low %v11548_v20, %v3028_v30  ;;  %v12360_v7 = vld [vmem:[#allocation23_spill] sm:$0xff] }
 0x315   : > { %6631 = vst.msk [vmem:[%s10460_s2 + $0x130] sm:$0xff] %vm5440_vm1, %v5979_v50  ;;  %6647 = vst.msk [vmem:[%s10460_s2 + $0x1b0] sm:$0xff] %vm5440_vm1, %v5980_v44  ;;  %v3037_v62 = vcombine.high %v11548_v20, %v3028_v30  ;;  %v3052_v38 = vcombine.low %v11551_v54, %v3035_v21  ;;  %v3053_v24 = vcombine.high %v11551_v54, %v3035_v21  ;;  %v3183_v30 = vpop.permute.xlu1 %3182  ;;  %v3181_v21 = vpop.permute.xlu0 %3180 }
 0x316   : > { %v2968_v57 = vcombine.low %v11554_v32, %v2960_v33  ;;  %v2969_v53 = vcombine.high %v11554_v32, %v2960_v33  ;;  %v2984_v36 = vcombine.low %v11557_v14, %v2967_v12  ;;  %v2985_v61 = vcombine.high %v11557_v14, %v2967_v12 }
 0x317   : > { %v3044_v19 = vrot.slane %v3036_v27, %v9507_v16  ;;  %v3051_v47 = vrot.slane %v3037_v62, %v9507_v16  ;;  %v3060_v58 = vrot.slane %v3052_v38, %v9507_v16  ;;  %v3067_v20 = vrot.slane %v3053_v24, %v9507_v16 }
 0x318   : > { %v2976_v52 = vrot.slane %v2968_v57, %v9507_v16  ;;  %v2983_v54 = vrot.slane %v2969_v53, %v9507_v16  ;;  %v2992_v23 = vrot.slane %v2984_v36, %v9507_v16  ;;  %v2999_v32 = vrot.slane %v2985_v61, %v9507_v16 }
 0x319   : > { %v6525_v22 = vcombine.low %v3044_v19, %v3051_v47  ;;  %v8920_v18 = vcombine.high %v3044_v19, %v3051_v47  ;;  %v6541_v6 = vcombine.low %v3060_v58, %v3067_v20  ;;  %v8921_v14 = vcombine.high %v3060_v58, %v3067_v20 }
 0x31a   : > { %v6457_v63 = vcombine.low %v2976_v52, %v2983_v54  ;;  %v8918_v15 = vcombine.high %v2976_v52, %v2983_v54  ;;  %v6473_v51 = vcombine.low %v2992_v23, %v2999_v32  ;;  %v8919_v3 = vcombine.high %v2992_v23, %v2999_v32 }
 0x31b   : > { %v6532_v55 = vrot.slane %v6525_v22, %v9485_v5  ;;  %v6540_v34 = vrot.slane %v8920_v18, %v9485_v5  ;;  %v6548_v43 = vrot.slane %v6541_v6, %v9485_v5  ;;  %v6556_v46 = vrot.slane %v8921_v14, %v9485_v5  ;;  %v11719_v18 = vpop.permute.xlu1 %3198 }
 0x31c   : > { %v6464_v1 = vrot.slane %v6457_v63, %v9485_v5  ;;  %v6472_v40 = vrot.slane %v8918_v15, %v9485_v5  ;;  %v6480_v31 = vrot.slane %v6473_v51, %v9485_v5  ;;  %v6488_v11 = vrot.slane %v8919_v3, %v9485_v5 }
 0x31d   : > { %v6557_v2 = vcombine.low %v6532_v55, %v6540_v34  ;;  %v6558_v35 = vcombine.high %v6532_v55, %v6540_v34  ;;  %v6573_v4 = vcombine.low %v6548_v43, %v6556_v46  ;;  %v6574_v42 = vcombine.high %v6548_v43, %v6556_v46 }
 0x31e   : > { %v6489_v41 = vcombine.low %v6464_v1, %v6472_v40  ;;  %v6490_v56 = vcombine.high %v6464_v1, %v6472_v40  ;;  %v6505_v8 = vcombine.low %v6480_v31, %v6488_v11  ;;  %v6506_v9 = vcombine.high %v6480_v31, %v6488_v11 }
 0x31f   : > { %v6565_v28 = vrot.slane %v6557_v2, %v9507_v16  ;;  %v6572_v10 = vrot.slane %v6558_v35, %v9507_v16  ;;  %v6581_v50 = vrot.slane %v6573_v4, %v9507_v16  ;;  %v6588_v44 = vrot.slane %v6574_v42, %v9507_v16 }
 0x320   : > { %v6497_v33 = vrot.slane %v6489_v41, %v9507_v16  ;;  %v6504_v12 = vrot.slane %v6490_v56, %v9507_v16  ;;  %v6513_v27 = vrot.slane %v6505_v8, %v9507_v16  ;;  %v6520_v62 = vrot.slane %v6506_v9, %v9507_v16 }
 0x321   : > { %v6589_v38 = vcombine.low %v6565_v28, %v6581_v50  ;;  %v6590_v24 = vcombine.high %v6565_v28, %v6581_v50  ;;  %v6591_v57 = vcombine.low %v6572_v10, %v6588_v44  ;;  %v6592_v53 = vcombine.high %v6572_v10, %v6588_v44 }
 0x322   : > { %v6521_v36 = vcombine.low %v6497_v33, %v6513_v27  ;;  %v6522_v61 = vcombine.high %v6497_v33, %v6513_v27  ;;  %v6523_v19 = vcombine.low %v6504_v12, %v6520_v62  ;;  %v6524_v47 = vcombine.high %v6504_v12, %v6520_v62 }
 0x323   : > { %6608 = vst.msk [vmem:[%s10460_s2 + $0x78] sm:$0xff] %vm5440_vm1, %v6589_v38  ;;  %6624 = vst.msk [vmem:[%s10460_s2 + $0xf8] sm:$0xff] %vm5440_vm1, %v6590_v24  ;;  %v3748_v58 = vrot.slane %v3740_v25, %v9485_v5  ;;  %v3755_v20 = vrot.slane %v3741_v13, %v9485_v5  ;;  %v3680_v52 = vrot.slane %v3672_v17, %v9485_v5  ;;  %v11721_v17 = vpop.permute.xlu0 %3196 }
 0x324   : > { %6640 = vst.msk [vmem:[%s10460_s2 + $0x178] sm:$0xff] %vm5440_vm1, %v6591_v57  ;;  %6656 = vst.msk [vmem:[%s10460_s2 + $0x1f8] sm:$0xff] %vm5440_vm1, %v6592_v53  ;;  %v3687_v25 = vrot.slane %v3673_v0, %v9485_v5  ;;  %v4284_v60 = vcombine.low %v12359_v49, %v3167_v29  ;;  %v4285_v13 = vcombine.high %v12359_v49, %v3167_v29 }
 0x325   : > { %6607 = vst.msk [vmem:[%s10460_s2 + $0x70] sm:$0xff] %vm5440_vm1, %v6521_v36  ;;  %6623 = vst.msk [vmem:[%s10460_s2 + $0xf0] sm:$0xff] %vm5440_vm1, %v6522_v61  ;;  %v3756_v54 = vcombine.low %v11571_v39, %v3183_v30  ;;  %v3757_v23 = vcombine.high %v11571_v39, %v3183_v30  ;;  %v3688_v32 = vcombine.low %v11573_v59, %v3181_v21 }
 0x326   : > { %6639 = vst.msk [vmem:[%s10460_s2 + $0x170] sm:$0xff] %vm5440_vm1, %v6523_v19  ;;  %6655 = vst.msk [vmem:[%s10460_s2 + $0x1f0] sm:$0xff] %vm5440_vm1, %v6524_v47  ;;  %v3689_v22 = vcombine.high %v11573_v59, %v3181_v21  ;;  %v11724_v6 = vrot.slane %v4284_v60, %v9485_v5  ;;  %v11727_v26 = vrot.slane %v4285_v13, %v9485_v5 }
 0x327   : > { %v4216_v0 = vcombine.low %v12360_v7, %v11663_v45  ;;  %v4217_v39 = vcombine.high %v12360_v7, %v11663_v45  ;;  %v3764_v14 = vrot.slane %v3756_v54, %v9485_v5  ;;  %v3771_v59 = vrot.slane %v3757_v23, %v9485_v5 }
 0x328   : > { %v3696_v29 = vrot.slane %v3688_v32, %v9485_v5  ;;  %v3703_v63 = vrot.slane %v3689_v22, %v9485_v5  ;;  %v4300_v15 = vcombine.low %v11587_v48, %v11719_v18  ;;  %v4301_v51 = vcombine.high %v11587_v48, %v11719_v18 }
 0x329   : > { %v4232_v3 = vcombine.low %v11589_v37, %v11721_v17  ;;  %v4233_v55 = vcombine.high %v11589_v37, %v11721_v17  ;;  %v3772_v34 = vcombine.low %v3748_v58, %v3764_v14  ;;  %v3773_v43 = vcombine.high %v3748_v58, %v3764_v14 }
 0x32a   : > { %v3788_v46 = vcombine.low %v3755_v20, %v3771_v59  ;;  %v3789_v1 = vcombine.high %v3755_v20, %v3771_v59  ;;  %v3704_v40 = vcombine.low %v3680_v52, %v3696_v29  ;;  %v3705_v31 = vcombine.high %v3680_v52, %v3696_v29 }
 0x32b   : > { %v3720_v11 = vcombine.low %v3687_v25, %v3703_v63  ;;  %v3721_v2 = vcombine.high %v3687_v25, %v3703_v63  ;;  %v3780_v35 = vrot.slane %v3772_v34, %v9507_v16  ;;  %v3787_v4 = vrot.slane %v3773_v43, %v9507_v16 }
 0x32c   : > { %v3796_v42 = vrot.slane %v3788_v46, %v9507_v16  ;;  %v3803_v41 = vrot.slane %v3789_v1, %v9507_v16  ;;  %v3712_v56 = vrot.slane %v3704_v40, %v9507_v16  ;;  %v3719_v8 = vrot.slane %v3705_v31, %v9507_v16 }
 0x32d   : > { %v3728_v9 = vrot.slane %v3720_v11, %v9507_v16  ;;  %v3735_v28 = vrot.slane %v3721_v2, %v9507_v16  ;;  %v7133_v10 = vcombine.low %v3780_v35, %v3787_v4  ;;  %v8936_v50 = vcombine.high %v3780_v35, %v3787_v4 }
 0x32e   : > { %v7149_v44 = vcombine.low %v3796_v42, %v3803_v41  ;;  %v8937_v30 = vcombine.high %v3796_v42, %v3803_v41  ;;  %v7065_v21 = vcombine.low %v3712_v56, %v3719_v8  ;;  %v8934_v33 = vcombine.high %v3712_v56, %v3719_v8 }
 0x32f   : > { %v7081_v12 = vcombine.low %v3728_v9, %v3735_v28  ;;  %v8935_v27 = vcombine.high %v3728_v9, %v3735_v28  ;;  %v7140_v62 = vrot.slane %v7133_v10, %v9485_v5  ;;  %v7148_v38 = vrot.slane %v8936_v50, %v9485_v5 }
 0x330   : > { %v7156_v24 = vrot.slane %v7149_v44, %v9485_v5  ;;  %v7164_v57 = vrot.slane %v8937_v30, %v9485_v5  ;;  %v7072_v53 = vrot.slane %v7065_v21, %v9485_v5  ;;  %v7080_v36 = vrot.slane %v8934_v33, %v9485_v5 }
 0x331   : > { %v7088_v61 = vrot.slane %v7081_v12, %v9485_v5  ;;  %v7096_v19 = vrot.slane %v8935_v27, %v9485_v5  ;;  %v7165_v47 = vcombine.low %v7140_v62, %v7148_v38  ;;  %v7166_v58 = vcombine.high %v7140_v62, %v7148_v38 }
 0x332   : > { %v7181_v20 = vcombine.low %v7156_v24, %v7164_v57  ;;  %v7182_v52 = vcombine.high %v7156_v24, %v7164_v57  ;;  %v7097_v25 = vcombine.low %v7072_v53, %v7080_v36  ;;  %v7098_v49 = vcombine.high %v7072_v53, %v7080_v36 }
 0x333   : > { %v7113_v60 = vcombine.low %v7088_v61, %v7096_v19  ;;  %v7114_v13 = vcombine.high %v7088_v61, %v7096_v19  ;;  %v7173_v54 = vrot.slane %v7165_v47, %v9507_v16  ;;  %v7180_v23 = vrot.slane %v7166_v58, %v9507_v16 }
 0x334   : > { %v7189_v32 = vrot.slane %v7181_v20, %v9507_v16  ;;  %v7196_v22 = vrot.slane %v7182_v52, %v9507_v16  ;;  %v7105_v14 = vrot.slane %v7097_v25, %v9507_v16  ;;  %v7112_v59 = vrot.slane %v7098_v49, %v9507_v16 }
 0x335   : > { %v7121_v29 = vrot.slane %v7113_v60, %v9507_v16  ;;  %v7128_v63 = vrot.slane %v7114_v13, %v9507_v16  ;;  %v4308_v35 = vrot.slane %v4300_v15, %v9485_v5  ;;  %v4315_v4 = vrot.slane %v4301_v51, %v9485_v5 }
 0x336   : > { %v7197_v34 = vcombine.low %v7173_v54, %v7189_v32  ;;  %v7198_v43 = vcombine.high %v7173_v54, %v7189_v32  ;;  %v7199_v46 = vcombine.low %v7180_v23, %v7196_v22  ;;  %v7200_v1 = vcombine.high %v7180_v23, %v7196_v22 }
 0x337   : > { %v7129_v40 = vcombine.low %v7105_v14, %v7121_v29  ;;  %v7130_v31 = vcombine.high %v7105_v14, %v7121_v29  ;;  %v7131_v11 = vcombine.low %v7112_v59, %v7128_v63  ;;  %v7132_v2 = vcombine.high %v7112_v59, %v7128_v63 }
 0x338   : > { %7752 = vst.msk [vmem:[%s10681_s12 + $0x38] sm:$0xff] %vm5440_vm1, %v7197_v34  ;;  %7768 = vst.msk [vmem:[%s10681_s12 + $0xb8] sm:$0xff] %vm5440_vm1, %v7198_v43  ;;  %v4240_v42 = vrot.slane %v4232_v3, %v9485_v5  ;;  %v4247_v41 = vrot.slane %v4233_v55, %v9485_v5  ;;  %v4224_v15 = vrot.slane %v4216_v0, %v9485_v5 }
 0x339   : > { %7784 = vst.msk [vmem:[%s10681_s12 + $0x138] sm:$0xff] %vm5440_vm1, %v7199_v46  ;;  %7800 = vst.msk [vmem:[%s10681_s12 + $0x1b8] sm:$0xff] %vm5440_vm1, %v7200_v1  ;;  %v4231_v48 = vrot.slane %v4217_v39, %v9485_v5  ;;  %v4316_v37 = vcombine.low %v11724_v6, %v4308_v35  ;;  %v4317_v18 = vcombine.high %v11724_v6, %v4308_v35  ;;  %v7986_v35 = vld [vmem:[%s9595_s11 + $0x10] sm:$0xff] (%p9242_p5) }
 0x33a   : > { %7751 = vst.msk [vmem:[%s10681_s12 + $0x30] sm:$0xff] %vm5440_vm1, %v7129_v40  ;;  %7767 = vst.msk [vmem:[%s10681_s12 + $0xb0] sm:$0xff] %vm5440_vm1, %v7130_v31  ;;  %v4332_v17 = vcombine.low %v11727_v26, %v4315_v4  ;;  %v4333_v0 = vcombine.high %v11727_v26, %v4315_v4  ;;  %v4248_v51 = vcombine.low %v4224_v15, %v4240_v42  ;;  %v7988_v4 = vld [vmem:[%s9595_s11 + $0x18] sm:$0xff] (%p9242_p5) }
 0x33b   : > { %7783 = vst.msk [vmem:[%s10681_s12 + $0x130] sm:$0xff] %vm5440_vm1, %v7131_v11  ;;  %7799 = vst.msk [vmem:[%s10681_s12 + $0x1b0] sm:$0xff] %vm5440_vm1, %v7132_v2  ;;  %v4249_v3 = vcombine.high %v4224_v15, %v4240_v42  ;;  %v4264_v45 = vcombine.low %v4231_v48, %v4247_v41  ;;  %v4265_v7 = vcombine.high %v4231_v48, %v4247_v41  ;;  %v7984_v2 = vld [vmem:[%s9595_s11 + $0x8] sm:$0xff] (%p9242_p5)  ;;  %v7990_v42 = vld [vmem:[%s9595_s11 + $0x20] sm:$0xff] (%p9242_p5) }
 0x33c   : > { %v4324_v39 = vrot.slane %v4316_v37, %v9507_v16  ;;  %v4331_v55 = vrot.slane %v4317_v18, %v9507_v16  ;;  %v4340_v56 = vrot.slane %v4332_v17, %v9507_v16  ;;  %v4347_v8 = vrot.slane %v4333_v0, %v9507_v16  ;;  %v7992_v41 = vld [vmem:[%s9595_s11 + $0x28] sm:$0xff] (%p9242_p5)  ;;  %v7994_v15 = vld [vmem:[%s9595_s11 + $0x30] sm:$0xff] (%p9242_p5)  ;;  %v7996_v48 = vld [vmem:[%s9595_s11 + $0x38] sm:$0xff] (%p9242_p5)  ;;  %7985 = vst [vmem:[%s11869_s19 + $0x8] sm:$0xff] (%p9242_p5), %v7984_v2 }
 0x33d   : > { %v4256_v9 = vrot.slane %v4248_v51, %v9507_v16  ;;  %v4263_v6 = vrot.slane %v4249_v3, %v9507_v16  ;;  %v4272_v28 = vrot.slane %v4264_v45, %v9507_v16  ;;  %v4279_v26 = vrot.slane %v4265_v7, %v9507_v16  ;;  %v7998_v37 = vld [vmem:[%s9595_s11 + $0x40] sm:$0xff] (%p9242_p5)  ;;  %v8000_v18 = vld [vmem:[%s9595_s11 + $0x48] sm:$0xff] (%p9242_p5)  ;;  %v8002_v17 = vld [vmem:[%s9595_s11 + $0x50] sm:$0xff] (%p9242_p5)  ;;  %7987 = vst [vmem:[%s11869_s19 + $0x10] sm:$0xff] (%p9242_p5), %v7986_v35 }
 0x33e   : > { %v7677_v10 = vcombine.low %v4324_v39, %v4331_v55  ;;  %v8952_v50 = vcombine.high %v4324_v39, %v4331_v55  ;;  %v7693_v44 = vcombine.low %v4340_v56, %v4347_v8  ;;  %v8953_v30 = vcombine.high %v4340_v56, %v4347_v8  ;;  %v8004_v0 = vld [vmem:[%s9595_s11 + $0x58] sm:$0xff] (%p9242_p5)  ;;  %7989 = vst [vmem:[%s11869_s19 + $0x18] sm:$0xff] (%p9242_p5), %v7988_v4  ;;  %v8006_v51 = vld [vmem:[%s9595_s11 + $0x60] sm:$0xff] (%p9242_p5)  ;;  %v8008_v3 = vld [vmem:[%s9595_s11 + $0x68] sm:$0xff] (%p9242_p5) }
 0x33f   : > { %v7609_v21 = vcombine.low %v4256_v9, %v4263_v6  ;;  %v8950_v33 = vcombine.high %v4256_v9, %v4263_v6  ;;  %v7625_v12 = vcombine.low %v4272_v28, %v4279_v26  ;;  %v8951_v27 = vcombine.high %v4272_v28, %v4279_v26  ;;  %7991 = vst [vmem:[%s11869_s19 + $0x20] sm:$0xff] (%p9242_p5), %v7990_v42  ;;  %v8010_v45 = vld [vmem:[%s9595_s11 + $0x70] sm:$0xff] (%p9242_p5)  ;;  %v8012_v7 = vld [vmem:[%s9595_s11 + $0x78] sm:$0xff] (%p9242_p5)  ;;  %v8014_v39 = vld [vmem:[%s9595_s11 + $0x80] sm:$0xff] (%p9242_p5) }
 0x340   : > { %v7684_v62 = vrot.slane %v7677_v10, %v9485_v5  ;;  %v7692_v38 = vrot.slane %v8952_v50, %v9485_v5  ;;  %v7700_v24 = vrot.slane %v7693_v44, %v9485_v5  ;;  %v7708_v57 = vrot.slane %v8953_v30, %v9485_v5  ;;  %7993 = vst [vmem:[%s11869_s19 + $0x28] sm:$0xff] (%p9242_p5), %v7992_v41  ;;  %v8016_v55 = vld [vmem:[%s9595_s11 + $0x88] sm:$0xff] (%p9242_p5)  ;;  %v8018_v56 = vld [vmem:[%s9595_s11 + $0x90] sm:$0xff] (%p9242_p5)  ;;  %v8020_v8 = vld [vmem:[%s9595_s11 + $0x98] sm:$0xff] (%p9242_p5) }
 0x341   : > { %v7616_v53 = vrot.slane %v7609_v21, %v9485_v5  ;;  %v7624_v36 = vrot.slane %v8950_v33, %v9485_v5  ;;  %v7632_v61 = vrot.slane %v7625_v12, %v9485_v5  ;;  %v7640_v19 = vrot.slane %v8951_v27, %v9485_v5  ;;  %7995 = vst [vmem:[%s11869_s19 + $0x30] sm:$0xff] (%p9242_p5), %v7994_v15  ;;  %v8022_v9 = vld [vmem:[%s9595_s11 + $0xa0] sm:$0xff] (%p9242_p5)  ;;  %v8024_v6 = vld [vmem:[%s9595_s11 + $0xa8] sm:$0xff] (%p9242_p5)  ;;  %v8026_v28 = vld [vmem:[%s9595_s11 + $0xb0] sm:$0xff] (%p9242_p5) }
 0x342   : > { %v7709_v47 = vcombine.low %v7684_v62, %v7692_v38  ;;  %v7710_v58 = vcombine.high %v7684_v62, %v7692_v38  ;;  %v7725_v20 = vcombine.low %v7700_v24, %v7708_v57  ;;  %v7726_v52 = vcombine.high %v7700_v24, %v7708_v57  ;;  %7997 = vst [vmem:[%s11869_s19 + $0x38] sm:$0xff] (%p9242_p5), %v7996_v48  ;;  %v8028_v26 = vld [vmem:[%s9595_s11 + $0xb8] sm:$0xff] (%p9242_p5)  ;;  %v8030_v10 = vld [vmem:[%s9595_s11 + $0xc0] sm:$0xff] (%p9242_p5)  ;;  %v8032_v50 = vld [vmem:[%s9595_s11 + $0xc8] sm:$0xff] (%p9242_p5) }
 0x343   : > { %v7641_v25 = vcombine.low %v7616_v53, %v7624_v36  ;;  %v7642_v49 = vcombine.high %v7616_v53, %v7624_v36  ;;  %v7657_v60 = vcombine.low %v7632_v61, %v7640_v19  ;;  %v7658_v13 = vcombine.high %v7632_v61, %v7640_v19  ;;  %7999 = vst [vmem:[%s11869_s19 + $0x40] sm:$0xff] (%p9242_p5), %v7998_v37  ;;  %v8034_v44 = vld [vmem:[%s9595_s11 + $0xd0] sm:$0xff] (%p9242_p5)  ;;  %v8036_v30 = vld [vmem:[%s9595_s11 + $0xd8] sm:$0xff] (%p9242_p5)  ;;  %v8038_v21 = vld [vmem:[%s9595_s11 + $0xe0] sm:$0xff] (%p9242_p5) }
 0x344   : > { %v7717_v54 = vrot.slane %v7709_v47, %v9507_v16  ;;  %v7724_v23 = vrot.slane %v7710_v58, %v9507_v16  ;;  %v7733_v32 = vrot.slane %v7725_v20, %v9507_v16  ;;  %v7740_v22 = vrot.slane %v7726_v52, %v9507_v16  ;;  %8001 = vst [vmem:[%s11869_s19 + $0x48] sm:$0xff] (%p9242_p5), %v8000_v18  ;;  %v8040_v33 = vld [vmem:[%s9595_s11 + $0xe8] sm:$0xff] (%p9242_p5)  ;;  %v8042_v12 = vld [vmem:[%s9595_s11 + $0xf0] sm:$0xff] (%p9242_p5)  ;;  %v8044_v27 = vld [vmem:[%s9595_s11 + $0xf8] sm:$0xff] (%p9242_p5) }
 0x345   : > { %v7649_v5 = vrot.slane %v7641_v25, %v9507_v16  ;;  %v7656_v14 = vrot.slane %v7642_v49, %v9507_v16  ;;  %v7665_v59 = vrot.slane %v7657_v60, %v9507_v16  ;;  %v7672_v29 = vrot.slane %v7658_v13, %v9507_v16  ;;  %7823 = sbr.rel (!%p9242_p5) target bundleno = 870 (0x366), region = 44  ;;  %v7982_v16 = vld [vmem:[%s9595_s11] sm:$0xff] (%p9242_p5)  ;;  %8003 = vst [vmem:[%s11869_s19 + $0x50] sm:$0xff] (%p9242_p5), %v8002_v17  ;;  %v8048_v38 = vld [vmem:[%s9595_s11 + $0x108] sm:$0xff] (%p9242_p5)  ;;  %v8050_v24 = vld [vmem:[%s9595_s11 + $0x110] sm:$0xff] (%p9242_p5) }
 0x346   : > { %v7741_v63 = vcombine.low %v7717_v54, %v7733_v32  ;;  %v7742_v34 = vcombine.high %v7717_v54, %v7733_v32  ;;  %v7743_v43 = vcombine.low %v7724_v23, %v7740_v22  ;;  %v7744_v46 = vcombine.high %v7724_v23, %v7740_v22  ;;  %7983 = vst [vmem:[%s11869_s19] sm:$0xff] (%p9242_p5), %v7982_v16  ;;  %v8046_v62 = vld [vmem:[%s9595_s11 + $0x100] sm:$0xff] (%p9242_p5)  ;;  %v8052_v57 = vld [vmem:[%s9595_s11 + $0x118] sm:$0xff] (%p9242_p5)  ;;  %v8056_v36 = vld [vmem:[%s9595_s11 + $0x128] sm:$0xff] (%p9242_p5) }
 0x347   : > { %v7673_v1 = vcombine.low %v7649_v5, %v7665_v59  ;;  %v7674_v40 = vcombine.high %v7649_v5, %v7665_v59  ;;  %v7675_v31 = vcombine.low %v7656_v14, %v7672_v29  ;;  %v7676_v11 = vcombine.high %v7656_v14, %v7672_v29  ;;  %8005 = vst [vmem:[%s11869_s19 + $0x58] sm:$0xff] (%p9242_p5), %v8004_v0  ;;  %v8054_v53 = vld [vmem:[%s9595_s11 + $0x120] sm:$0xff] (%p9242_p5)  ;;  %v8058_v61 = vld [vmem:[%s9595_s11 + $0x130] sm:$0xff] (%p9242_p5)  ;;  %v8060_v19 = vld [vmem:[%s9595_s11 + $0x138] sm:$0xff] (%p9242_p5) }
 0x348   : > { %7760 = vst.msk [vmem:[%s10681_s12 + $0x78] sm:$0xff] %vm5440_vm1, %v7741_v63  ;;  %7776 = vst.msk [vmem:[%s10681_s12 + $0xf8] sm:$0xff] %vm5440_vm1, %v7742_v34  ;;  %v8062_v47 = vld [vmem:[%s9595_s11 + $0x140] sm:$0xff] (%p9242_p5)  ;;  %v8064_v58 = vld [vmem:[%s9595_s11 + $0x148] sm:$0xff] (%p9242_p5) }
 0x349   : > { %7792 = vst.msk [vmem:[%s10681_s12 + $0x178] sm:$0xff] %vm5440_vm1, %v7743_v43  ;;  %7808 = vst.msk [vmem:[%s10681_s12 + $0x1f8] sm:$0xff] %vm5440_vm1, %v7744_v46  ;;  %v8066_v20 = vld [vmem:[%s9595_s11 + $0x150] sm:$0xff] (%p9242_p5)  ;;  %v8068_v52 = vld [vmem:[%s9595_s11 + $0x158] sm:$0xff] (%p9242_p5) }
 0x34a   : > { %7759 = vst.msk [vmem:[%s10681_s12 + $0x70] sm:$0xff] %vm5440_vm1, %v7673_v1  ;;  %7775 = vst.msk [vmem:[%s10681_s12 + $0xf0] sm:$0xff] %vm5440_vm1, %v7674_v40  ;;  %v8070_v25 = vld [vmem:[%s9595_s11 + $0x160] sm:$0xff] (%p9242_p5)  ;;  %v8072_v49 = vld [vmem:[%s9595_s11 + $0x168] sm:$0xff] (%p9242_p5) }
 0x34b   : > { %7791 = vst.msk [vmem:[%s10681_s12 + $0x170] sm:$0xff] %vm5440_vm1, %v7675_v31  ;;  %7807 = vst.msk [vmem:[%s10681_s12 + $0x1f0] sm:$0xff] %vm5440_vm1, %v7676_v11  ;;  %v8074_v60 = vld [vmem:[%s9595_s11 + $0x170] sm:$0xff] (%p9242_p5)  ;;  %v8076_v13 = vld [vmem:[%s9595_s11 + $0x178] sm:$0xff] (%p9242_p5) }
 0x34c   : > { %8007 = vst [vmem:[%s11869_s19 + $0x60] sm:$0xff] %v8006_v51  ;;  %8009 = vst [vmem:[%s11869_s19 + $0x68] sm:$0xff] %v8008_v3  ;;  %v8078_v54 = vld [vmem:[%s9595_s11 + $0x180] sm:$0xff]  ;;  %v8080_v23 = vld [vmem:[%s9595_s11 + $0x188] sm:$0xff] }
 0x34d   : > { %8011 = vst [vmem:[%s11869_s19 + $0x70] sm:$0xff] %v8010_v45  ;;  %8013 = vst [vmem:[%s11869_s19 + $0x78] sm:$0xff] %v8012_v7  ;;  %v8082_v32 = vld [vmem:[%s9595_s11 + $0x190] sm:$0xff]  ;;  %v8084_v22 = vld [vmem:[%s9595_s11 + $0x198] sm:$0xff] }
 0x34e   : > { %8015 = vst [vmem:[%s11869_s19 + $0x100] sm:$0xff] %v8014_v39  ;;  %8017 = vst [vmem:[%s11869_s19 + $0x108] sm:$0xff] %v8016_v55  ;;  %v8086_v5 = vld [vmem:[%s9595_s11 + $0x1a0] sm:$0xff]  ;;  %v8088_v14 = vld [vmem:[%s9595_s11 + $0x1a8] sm:$0xff] }
 0x34f   : > { %8019 = vst [vmem:[%s11869_s19 + $0x110] sm:$0xff] %v8018_v56  ;;  %8021 = vst [vmem:[%s11869_s19 + $0x118] sm:$0xff] %v8020_v8  ;;  %v8090_v59 = vld [vmem:[%s9595_s11 + $0x1b0] sm:$0xff]  ;;  %v8092_v29 = vld [vmem:[%s9595_s11 + $0x1b8] sm:$0xff] }
 0x350   : > { %8023 = vst [vmem:[%s11869_s19 + $0x120] sm:$0xff] %v8022_v9  ;;  %8025 = vst [vmem:[%s11869_s19 + $0x128] sm:$0xff] %v8024_v6  ;;  %v8094_v63 = vld [vmem:[%s9595_s11 + $0x1c0] sm:$0xff]  ;;  %v8096_v34 = vld [vmem:[%s9595_s11 + $0x1c8] sm:$0xff] }
 0x351   : > { %8027 = vst [vmem:[%s11869_s19 + $0x130] sm:$0xff] %v8026_v28  ;;  %8029 = vst [vmem:[%s11869_s19 + $0x138] sm:$0xff] %v8028_v26  ;;  %v8098_v43 = vld [vmem:[%s9595_s11 + $0x1d0] sm:$0xff]  ;;  %v8100_v46 = vld [vmem:[%s9595_s11 + $0x1d8] sm:$0xff] }
 0x352   : > { %8031 = vst [vmem:[%s11869_s19 + $0x140] sm:$0xff] %v8030_v10  ;;  %8033 = vst [vmem:[%s11869_s19 + $0x148] sm:$0xff] %v8032_v50  ;;  %v8102_v1 = vld [vmem:[%s9595_s11 + $0x1e0] sm:$0xff]  ;;  %v8104_v40 = vld [vmem:[%s9595_s11 + $0x1e8] sm:$0xff] }
 0x353   : > { %8035 = vst [vmem:[%s11869_s19 + $0x150] sm:$0xff] %v8034_v44  ;;  %8037 = vst [vmem:[%s11869_s19 + $0x158] sm:$0xff] %v8036_v30  ;;  %v8106_v31 = vld [vmem:[%s9595_s11 + $0x1f0] sm:$0xff]  ;;  %v8108_v11 = vld [vmem:[%s9595_s11 + $0x1f8] sm:$0xff] }
 0x354   : > { %8039 = vst [vmem:[%s11869_s19 + $0x160] sm:$0xff] %v8038_v21  ;;  %8041 = vst [vmem:[%s11869_s19 + $0x168] sm:$0xff] %v8040_v33 }
 0x355   : > { %8043 = vst [vmem:[%s11869_s19 + $0x170] sm:$0xff] %v8042_v12  ;;  %8045 = vst [vmem:[%s11869_s19 + $0x178] sm:$0xff] %v8044_v27 }
 0x356   : > { %8047 = vst [vmem:[%s11869_s19 + $0x200] sm:$0xff] %v8046_v62  ;;  %8049 = vst [vmem:[%s11869_s19 + $0x208] sm:$0xff] %v8048_v38 }
 0x357   : > { %8051 = vst [vmem:[%s11869_s19 + $0x210] sm:$0xff] %v8050_v24  ;;  %8053 = vst [vmem:[%s11869_s19 + $0x218] sm:$0xff] %v8052_v57 }
 0x358   : > { %8055 = vst [vmem:[%s11869_s19 + $0x220] sm:$0xff] %v8054_v53  ;;  %8057 = vst [vmem:[%s11869_s19 + $0x228] sm:$0xff] %v8056_v36 }
 0x359   : > { %8059 = vst [vmem:[%s11869_s19 + $0x230] sm:$0xff] %v8058_v61  ;;  %8061 = vst [vmem:[%s11869_s19 + $0x238] sm:$0xff] %v8060_v19 }
 0x35a   : > { %8063 = vst [vmem:[%s11869_s19 + $0x240] sm:$0xff] %v8062_v47  ;;  %8065 = vst [vmem:[%s11869_s19 + $0x248] sm:$0xff] %v8064_v58 }
 0x35b   : > { %8067 = vst [vmem:[%s11869_s19 + $0x250] sm:$0xff] %v8066_v20  ;;  %8069 = vst [vmem:[%s11869_s19 + $0x258] sm:$0xff] %v8068_v52 }
 0x35c   : > { %8071 = vst [vmem:[%s11869_s19 + $0x260] sm:$0xff] %v8070_v25  ;;  %8073 = vst [vmem:[%s11869_s19 + $0x268] sm:$0xff] %v8072_v49 }
 0x35d   : > { %8075 = vst [vmem:[%s11869_s19 + $0x270] sm:$0xff] %v8074_v60  ;;  %8077 = vst [vmem:[%s11869_s19 + $0x278] sm:$0xff] %v8076_v13 }
 0x35e   : > { %8079 = vst [vmem:[%s11869_s19 + $0x300] sm:$0xff] %v8078_v54  ;;  %8081 = vst [vmem:[%s11869_s19 + $0x308] sm:$0xff] %v8080_v23 }
 0x35f   : > { %8083 = vst [vmem:[%s11869_s19 + $0x310] sm:$0xff] %v8082_v32  ;;  %8085 = vst [vmem:[%s11869_s19 + $0x318] sm:$0xff] %v8084_v22 }
 0x360   : > { %8087 = vst [vmem:[%s11869_s19 + $0x320] sm:$0xff] %v8086_v5  ;;  %8089 = vst [vmem:[%s11869_s19 + $0x328] sm:$0xff] %v8088_v14 }
 0x361   : > { %8091 = vst [vmem:[%s11869_s19 + $0x330] sm:$0xff] %v8090_v59  ;;  %8093 = vst [vmem:[%s11869_s19 + $0x338] sm:$0xff] %v8092_v29 }
 0x362   : > { %8095 = vst [vmem:[%s11869_s19 + $0x340] sm:$0xff] %v8094_v63  ;;  %8097 = vst [vmem:[%s11869_s19 + $0x348] sm:$0xff] %v8096_v34 }
 0x363   : > { %8099 = vst [vmem:[%s11869_s19 + $0x350] sm:$0xff] %v8098_v43  ;;  %8101 = vst [vmem:[%s11869_s19 + $0x358] sm:$0xff] %v8100_v46 }
 0x364   : > { %8103 = vst [vmem:[%s11869_s19 + $0x360] sm:$0xff] %v8102_v1  ;;  %8105 = vst [vmem:[%s11869_s19 + $0x368] sm:$0xff] %v8104_v40 }
 0x365   : > { %8107 = vst [vmem:[%s11869_s19 + $0x370] sm:$0xff] %v8106_v31  ;;  %8109 = vst [vmem:[%s11869_s19 + $0x378] sm:$0xff] %v8108_v11 }
 0x366 PF: > { %8115 = sbr.rel (!%p9242_p5) target bundleno = 906 (0x38a), region = 82  ;;  %s8961_s20 = sshll.u32 (%p9242_p5), %s9137_s25, 7  ;;  %v8274_v16 = vld [vmem:[%s10460_s2] sm:$0xff] (%p9242_p5)  ;;  %v8276_v2 = vld [vmem:[%s10460_s2 + $0x8] sm:$0xff] (%p9242_p5)  ;;  %v8278_v35 = vld [vmem:[%s10460_s2 + $0x10] sm:$0xff] (%p9242_p5) }
 0x367   : > { %s8118_s22 = sadd.s32 (%p9242_p5), %s8961_s20, %s9264_s21  ;;  %v8280_v4 = vld [vmem:[%s10460_s2 + $0x18] sm:$0xff] (%p9242_p5)  ;;  %v8282_v42 = vld [vmem:[%s10460_s2 + $0x20] sm:$0xff] (%p9242_p5)  ;;  %v8284_v41 = vld [vmem:[%s10460_s2 + $0x28] sm:$0xff] (%p9242_p5) }
 0x368   : > { %s8962_s23 = sshll.u32 (%p9242_p5), %s8118_s22, 3  ;;  %v8286_v15 = vld [vmem:[%s10460_s2 + $0x30] sm:$0xff] (%p9242_p5)  ;;  %v8288_v48 = vld [vmem:[%s10460_s2 + $0x38] sm:$0xff] (%p9242_p5)  ;;  %v8290_v37 = vld [vmem:[%s10460_s2 + $0x40] sm:$0xff] (%p9242_p5) }
 0x369   : > { %s12006_s24 = scalar_lea.vmem (%p9242_p5), %s12291_s6, %s8962_s23  ;;  %v8292_v18 = vld [vmem:[%s10460_s2 + $0x48] sm:$0xff] (%p9242_p5)  ;;  %v8294_v17 = vld [vmem:[%s10460_s2 + $0x50] sm:$0xff] (%p9242_p5)  ;;  %v8296_v0 = vld [vmem:[%s10460_s2 + $0x58] sm:$0xff] (%p9242_p5) }
 0x36a   : > { %8275 = vst [vmem:[%s12006_s24] sm:$0xff] (%p9242_p5), %v8274_v16  ;;  %8277 = vst [vmem:[%s12006_s24 + $0x8] sm:$0xff] (%p9242_p5), %v8276_v2  ;;  %v8298_v51 = vld [vmem:[%s10460_s2 + $0x60] sm:$0xff] (%p9242_p5)  ;;  %v8300_v3 = vld [vmem:[%s10460_s2 + $0x68] sm:$0xff] (%p9242_p5) }
 0x36b   : > { %8279 = vst [vmem:[%s12006_s24 + $0x10] sm:$0xff] (%p9242_p5), %v8278_v35  ;;  %8281 = vst [vmem:[%s12006_s24 + $0x18] sm:$0xff] (%p9242_p5), %v8280_v4  ;;  %v8302_v45 = vld [vmem:[%s10460_s2 + $0x70] sm:$0xff] (%p9242_p5)  ;;  %v8304_v7 = vld [vmem:[%s10460_s2 + $0x78] sm:$0xff] (%p9242_p5) }
 0x36c   : > { %8283 = vst [vmem:[%s12006_s24 + $0x20] sm:$0xff] (%p9242_p5), %v8282_v42  ;;  %8285 = vst [vmem:[%s12006_s24 + $0x28] sm:$0xff] (%p9242_p5), %v8284_v41  ;;  %v8306_v39 = vld [vmem:[%s10460_s2 + $0x80] sm:$0xff] (%p9242_p5)  ;;  %v8308_v55 = vld [vmem:[%s10460_s2 + $0x88] sm:$0xff] (%p9242_p5) }
 0x36d   : > { %8287 = vst [vmem:[%s12006_s24 + $0x30] sm:$0xff] %v8286_v15  ;;  %8289 = vst [vmem:[%s12006_s24 + $0x38] sm:$0xff] %v8288_v48  ;;  %v8310_v56 = vld [vmem:[%s10460_s2 + $0x90] sm:$0xff]  ;;  %v8312_v8 = vld [vmem:[%s10460_s2 + $0x98] sm:$0xff] }
 0x36e   : > { %8291 = vst [vmem:[%s12006_s24 + $0x40] sm:$0xff] %v8290_v37  ;;  %8293 = vst [vmem:[%s12006_s24 + $0x48] sm:$0xff] %v8292_v18  ;;  %v8314_v9 = vld [vmem:[%s10460_s2 + $0xa0] sm:$0xff]  ;;  %v8316_v6 = vld [vmem:[%s10460_s2 + $0xa8] sm:$0xff] }
 0x36f   : > { %8295 = vst [vmem:[%s12006_s24 + $0x50] sm:$0xff] %v8294_v17  ;;  %8297 = vst [vmem:[%s12006_s24 + $0x58] sm:$0xff] %v8296_v0  ;;  %v8318_v28 = vld [vmem:[%s10460_s2 + $0xb0] sm:$0xff]  ;;  %v8320_v26 = vld [vmem:[%s10460_s2 + $0xb8] sm:$0xff] }
 0x370   : > { %8299 = vst [vmem:[%s12006_s24 + $0x60] sm:$0xff] %v8298_v51  ;;  %8301 = vst [vmem:[%s12006_s24 + $0x68] sm:$0xff] %v8300_v3  ;;  %v8322_v10 = vld [vmem:[%s10460_s2 + $0xc0] sm:$0xff]  ;;  %v8324_v50 = vld [vmem:[%s10460_s2 + $0xc8] sm:$0xff] }
 0x371   : > { %8303 = vst [vmem:[%s12006_s24 + $0x70] sm:$0xff] %v8302_v45  ;;  %8305 = vst [vmem:[%s12006_s24 + $0x78] sm:$0xff] %v8304_v7  ;;  %v8326_v44 = vld [vmem:[%s10460_s2 + $0xd0] sm:$0xff]  ;;  %v8328_v30 = vld [vmem:[%s10460_s2 + $0xd8] sm:$0xff] }
 0x372   : > { %8307 = vst [vmem:[%s12006_s24 + $0x100] sm:$0xff] %v8306_v39  ;;  %8309 = vst [vmem:[%s12006_s24 + $0x108] sm:$0xff] %v8308_v55  ;;  %v8330_v21 = vld [vmem:[%s10460_s2 + $0xe0] sm:$0xff]  ;;  %v8332_v33 = vld [vmem:[%s10460_s2 + $0xe8] sm:$0xff] }
 0x373   : > { %8311 = vst [vmem:[%s12006_s24 + $0x110] sm:$0xff] %v8310_v56  ;;  %8313 = vst [vmem:[%s12006_s24 + $0x118] sm:$0xff] %v8312_v8  ;;  %v8334_v12 = vld [vmem:[%s10460_s2 + $0xf0] sm:$0xff]  ;;  %v8336_v27 = vld [vmem:[%s10460_s2 + $0xf8] sm:$0xff] }
 0x374   : > { %8315 = vst [vmem:[%s12006_s24 + $0x120] sm:$0xff] %v8314_v9  ;;  %8317 = vst [vmem:[%s12006_s24 + $0x128] sm:$0xff] %v8316_v6  ;;  %v8338_v62 = vld [vmem:[%s10460_s2 + $0x100] sm:$0xff]  ;;  %v8340_v38 = vld [vmem:[%s10460_s2 + $0x108] sm:$0xff] }
 0x375   : > { %8319 = vst [vmem:[%s12006_s24 + $0x130] sm:$0xff] %v8318_v28  ;;  %8321 = vst [vmem:[%s12006_s24 + $0x138] sm:$0xff] %v8320_v26  ;;  %v8342_v24 = vld [vmem:[%s10460_s2 + $0x110] sm:$0xff]  ;;  %v8344_v57 = vld [vmem:[%s10460_s2 + $0x118] sm:$0xff] }
 0x376   : > { %8323 = vst [vmem:[%s12006_s24 + $0x140] sm:$0xff] %v8322_v10  ;;  %8325 = vst [vmem:[%s12006_s24 + $0x148] sm:$0xff] %v8324_v50  ;;  %v8346_v53 = vld [vmem:[%s10460_s2 + $0x120] sm:$0xff]  ;;  %v8348_v36 = vld [vmem:[%s10460_s2 + $0x128] sm:$0xff] }
 0x377   : > { %8327 = vst [vmem:[%s12006_s24 + $0x150] sm:$0xff] %v8326_v44  ;;  %8329 = vst [vmem:[%s12006_s24 + $0x158] sm:$0xff] %v8328_v30  ;;  %v8350_v61 = vld [vmem:[%s10460_s2 + $0x130] sm:$0xff]  ;;  %v8352_v19 = vld [vmem:[%s10460_s2 + $0x138] sm:$0xff] }
 0x378   : > { %8331 = vst [vmem:[%s12006_s24 + $0x160] sm:$0xff] %v8330_v21  ;;  %8333 = vst [vmem:[%s12006_s24 + $0x168] sm:$0xff] %v8332_v33  ;;  %v8354_v47 = vld [vmem:[%s10460_s2 + $0x140] sm:$0xff]  ;;  %v8356_v58 = vld [vmem:[%s10460_s2 + $0x148] sm:$0xff] }
 0x379   : > { %8335 = vst [vmem:[%s12006_s24 + $0x170] sm:$0xff] %v8334_v12  ;;  %8337 = vst [vmem:[%s12006_s24 + $0x178] sm:$0xff] %v8336_v27  ;;  %v8358_v20 = vld [vmem:[%s10460_s2 + $0x150] sm:$0xff]  ;;  %v8360_v52 = vld [vmem:[%s10460_s2 + $0x158] sm:$0xff] }
 0x37a   : > { %8339 = vst [vmem:[%s12006_s24 + $0x200] sm:$0xff] %v8338_v62  ;;  %8341 = vst [vmem:[%s12006_s24 + $0x208] sm:$0xff] %v8340_v38  ;;  %v8362_v25 = vld [vmem:[%s10460_s2 + $0x160] sm:$0xff]  ;;  %v8364_v49 = vld [vmem:[%s10460_s2 + $0x168] sm:$0xff] }
 0x37b   : > { %8343 = vst [vmem:[%s12006_s24 + $0x210] sm:$0xff] %v8342_v24  ;;  %8345 = vst [vmem:[%s12006_s24 + $0x218] sm:$0xff] %v8344_v57  ;;  %v8366_v60 = vld [vmem:[%s10460_s2 + $0x170] sm:$0xff]  ;;  %v8368_v13 = vld [vmem:[%s10460_s2 + $0x178] sm:$0xff] }
 0x37c   : > { %8347 = vst [vmem:[%s12006_s24 + $0x220] sm:$0xff] %v8346_v53  ;;  %8349 = vst [vmem:[%s12006_s24 + $0x228] sm:$0xff] %v8348_v36  ;;  %v8370_v54 = vld [vmem:[%s10460_s2 + $0x180] sm:$0xff]  ;;  %v8372_v23 = vld [vmem:[%s10460_s2 + $0x188] sm:$0xff] }
 0x37d   : > { %8351 = vst [vmem:[%s12006_s24 + $0x230] sm:$0xff] %v8350_v61  ;;  %8353 = vst [vmem:[%s12006_s24 + $0x238] sm:$0xff] %v8352_v19  ;;  %v8374_v32 = vld [vmem:[%s10460_s2 + $0x190] sm:$0xff]  ;;  %v8376_v22 = vld [vmem:[%s10460_s2 + $0x198] sm:$0xff] }
 0x37e   : > { %8355 = vst [vmem:[%s12006_s24 + $0x240] sm:$0xff] %v8354_v47  ;;  %8357 = vst [vmem:[%s12006_s24 + $0x248] sm:$0xff] %v8356_v58  ;;  %v8378_v5 = vld [vmem:[%s10460_s2 + $0x1a0] sm:$0xff]  ;;  %v8380_v14 = vld [vmem:[%s10460_s2 + $0x1a8] sm:$0xff] }
 0x37f   : > { %8359 = vst [vmem:[%s12006_s24 + $0x250] sm:$0xff] %v8358_v20  ;;  %8361 = vst [vmem:[%s12006_s24 + $0x258] sm:$0xff] %v8360_v52  ;;  %v8382_v59 = vld [vmem:[%s10460_s2 + $0x1b0] sm:$0xff]  ;;  %v8384_v29 = vld [vmem:[%s10460_s2 + $0x1b8] sm:$0xff] }
 0x380   : > { %8363 = vst [vmem:[%s12006_s24 + $0x260] sm:$0xff] %v8362_v25  ;;  %8365 = vst [vmem:[%s12006_s24 + $0x268] sm:$0xff] %v8364_v49  ;;  %v8386_v63 = vld [vmem:[%s10460_s2 + $0x1c0] sm:$0xff]  ;;  %v8388_v34 = vld [vmem:[%s10460_s2 + $0x1c8] sm:$0xff] }
 0x381   : > { %8367 = vst [vmem:[%s12006_s24 + $0x270] sm:$0xff] %v8366_v60  ;;  %8369 = vst [vmem:[%s12006_s24 + $0x278] sm:$0xff] %v8368_v13  ;;  %v8390_v43 = vld [vmem:[%s10460_s2 + $0x1d0] sm:$0xff]  ;;  %v8392_v46 = vld [vmem:[%s10460_s2 + $0x1d8] sm:$0xff] }
 0x382   : > { %8371 = vst [vmem:[%s12006_s24 + $0x300] sm:$0xff] %v8370_v54  ;;  %8373 = vst [vmem:[%s12006_s24 + $0x308] sm:$0xff] %v8372_v23  ;;  %v8394_v1 = vld [vmem:[%s10460_s2 + $0x1e0] sm:$0xff]  ;;  %v8396_v40 = vld [vmem:[%s10460_s2 + $0x1e8] sm:$0xff] }
 0x383   : > { %8375 = vst [vmem:[%s12006_s24 + $0x310] sm:$0xff] %v8374_v32  ;;  %8377 = vst [vmem:[%s12006_s24 + $0x318] sm:$0xff] %v8376_v22  ;;  %v8398_v31 = vld [vmem:[%s10460_s2 + $0x1f0] sm:$0xff]  ;;  %v8400_v11 = vld [vmem:[%s10460_s2 + $0x1f8] sm:$0xff] }
 0x384   : > { %8379 = vst [vmem:[%s12006_s24 + $0x320] sm:$0xff] %v8378_v5  ;;  %8381 = vst [vmem:[%s12006_s24 + $0x328] sm:$0xff] %v8380_v14 }
 0x385   : > { %8383 = vst [vmem:[%s12006_s24 + $0x330] sm:$0xff] %v8382_v59  ;;  %8385 = vst [vmem:[%s12006_s24 + $0x338] sm:$0xff] %v8384_v29 }
 0x386   : > { %8387 = vst [vmem:[%s12006_s24 + $0x340] sm:$0xff] %v8386_v63  ;;  %8389 = vst [vmem:[%s12006_s24 + $0x348] sm:$0xff] %v8388_v34 }
 0x387   : > { %8391 = vst [vmem:[%s12006_s24 + $0x350] sm:$0xff] %v8390_v43  ;;  %8393 = vst [vmem:[%s12006_s24 + $0x358] sm:$0xff] %v8392_v46 }
 0x388   : > { %8395 = vst [vmem:[%s12006_s24 + $0x360] sm:$0xff] %v8394_v1  ;;  %8397 = vst [vmem:[%s12006_s24 + $0x368] sm:$0xff] %v8396_v40 }
 0x389   : > { %8399 = vst [vmem:[%s12006_s24 + $0x370] sm:$0xff] %v8398_v31  ;;  %8401 = vst [vmem:[%s12006_s24 + $0x378] sm:$0xff] %v8400_v11 }
 0x38a PF: > { %8407 = sbr.rel (!%p9242_p5) target bundleno = 942 (0x3ae), region = 120  ;;  %s8964_s11 = sshll.u32 (%p9242_p5), %s9137_s25, 7  ;;  %v8566_v16 = vld [vmem:[%s10681_s12] sm:$0xff] (%p9242_p5)  ;;  %v8568_v2 = vld [vmem:[%s10681_s12 + $0x8] sm:$0xff] (%p9242_p5)  ;;  %v8570_v35 = vld [vmem:[%s10681_s12 + $0x10] sm:$0xff] (%p9242_p5) }
 0x38b   : > { %s8410_s10 = sadd.s32 (%p9242_p5), %s8964_s11, %s9264_s21  ;;  %v8572_v4 = vld [vmem:[%s10681_s12 + $0x18] sm:$0xff] (%p9242_p5)  ;;  %v8574_v42 = vld [vmem:[%s10681_s12 + $0x20] sm:$0xff] (%p9242_p5)  ;;  %v8576_v41 = vld [vmem:[%s10681_s12 + $0x28] sm:$0xff] (%p9242_p5) }
 0x38c   : > { %s8965_s2 = sshll.u32 (%p9242_p5), %s8410_s10, 3  ;;  %v8578_v15 = vld [vmem:[%s10681_s12 + $0x30] sm:$0xff] (%p9242_p5)  ;;  %v8580_v48 = vld [vmem:[%s10681_s12 + $0x38] sm:$0xff] (%p9242_p5)  ;;  %v8582_v37 = vld [vmem:[%s10681_s12 + $0x40] sm:$0xff] (%p9242_p5) }
 0x38d   : > { %s12143_s16 = scalar_lea.vmem (%p9242_p5), %s12292_s7, %s8965_s2  ;;  %v8584_v18 = vld [vmem:[%s10681_s12 + $0x48] sm:$0xff] (%p9242_p5)  ;;  %v8586_v17 = vld [vmem:[%s10681_s12 + $0x50] sm:$0xff] (%p9242_p5)  ;;  %v8588_v0 = vld [vmem:[%s10681_s12 + $0x58] sm:$0xff] (%p9242_p5) }
 0x38e   : > { %8567 = vst [vmem:[%s12143_s16] sm:$0xff] (%p9242_p5), %v8566_v16  ;;  %8569 = vst [vmem:[%s12143_s16 + $0x8] sm:$0xff] (%p9242_p5), %v8568_v2  ;;  %v8590_v51 = vld [vmem:[%s10681_s12 + $0x60] sm:$0xff] (%p9242_p5)  ;;  %v8592_v3 = vld [vmem:[%s10681_s12 + $0x68] sm:$0xff] (%p9242_p5) }
 0x38f   : > { %8571 = vst [vmem:[%s12143_s16 + $0x10] sm:$0xff] (%p9242_p5), %v8570_v35  ;;  %8573 = vst [vmem:[%s12143_s16 + $0x18] sm:$0xff] (%p9242_p5), %v8572_v4  ;;  %v8594_v45 = vld [vmem:[%s10681_s12 + $0x70] sm:$0xff] (%p9242_p5)  ;;  %v8596_v7 = vld [vmem:[%s10681_s12 + $0x78] sm:$0xff] (%p9242_p5) }
 0x390   : > { %8575 = vst [vmem:[%s12143_s16 + $0x20] sm:$0xff] (%p9242_p5), %v8574_v42  ;;  %8577 = vst [vmem:[%s12143_s16 + $0x28] sm:$0xff] (%p9242_p5), %v8576_v41  ;;  %v8598_v39 = vld [vmem:[%s10681_s12 + $0x80] sm:$0xff] (%p9242_p5)  ;;  %v8600_v55 = vld [vmem:[%s10681_s12 + $0x88] sm:$0xff] (%p9242_p5) }
 0x391   : > { %8579 = vst [vmem:[%s12143_s16 + $0x30] sm:$0xff] %v8578_v15  ;;  %8581 = vst [vmem:[%s12143_s16 + $0x38] sm:$0xff] %v8580_v48  ;;  %v8602_v56 = vld [vmem:[%s10681_s12 + $0x90] sm:$0xff]  ;;  %v8604_v8 = vld [vmem:[%s10681_s12 + $0x98] sm:$0xff] }
 0x392   : > { %8583 = vst [vmem:[%s12143_s16 + $0x40] sm:$0xff] %v8582_v37  ;;  %8585 = vst [vmem:[%s12143_s16 + $0x48] sm:$0xff] %v8584_v18  ;;  %v8606_v9 = vld [vmem:[%s10681_s12 + $0xa0] sm:$0xff]  ;;  %v8608_v6 = vld [vmem:[%s10681_s12 + $0xa8] sm:$0xff] }
 0x393   : > { %8587 = vst [vmem:[%s12143_s16 + $0x50] sm:$0xff] %v8586_v17  ;;  %8589 = vst [vmem:[%s12143_s16 + $0x58] sm:$0xff] %v8588_v0  ;;  %v8610_v28 = vld [vmem:[%s10681_s12 + $0xb0] sm:$0xff]  ;;  %v8612_v26 = vld [vmem:[%s10681_s12 + $0xb8] sm:$0xff] }
 0x394   : > { %8591 = vst [vmem:[%s12143_s16 + $0x60] sm:$0xff] %v8590_v51  ;;  %8593 = vst [vmem:[%s12143_s16 + $0x68] sm:$0xff] %v8592_v3  ;;  %v8614_v10 = vld [vmem:[%s10681_s12 + $0xc0] sm:$0xff]  ;;  %v8616_v50 = vld [vmem:[%s10681_s12 + $0xc8] sm:$0xff] }
 0x395   : > { %8595 = vst [vmem:[%s12143_s16 + $0x70] sm:$0xff] %v8594_v45  ;;  %8597 = vst [vmem:[%s12143_s16 + $0x78] sm:$0xff] %v8596_v7  ;;  %v8618_v44 = vld [vmem:[%s10681_s12 + $0xd0] sm:$0xff]  ;;  %v8620_v30 = vld [vmem:[%s10681_s12 + $0xd8] sm:$0xff] }
 0x396   : > { %8599 = vst [vmem:[%s12143_s16 + $0x100] sm:$0xff] %v8598_v39  ;;  %8601 = vst [vmem:[%s12143_s16 + $0x108] sm:$0xff] %v8600_v55  ;;  %v8622_v21 = vld [vmem:[%s10681_s12 + $0xe0] sm:$0xff]  ;;  %v8624_v33 = vld [vmem:[%s10681_s12 + $0xe8] sm:$0xff] }
 0x397   : > { %8603 = vst [vmem:[%s12143_s16 + $0x110] sm:$0xff] %v8602_v56  ;;  %8605 = vst [vmem:[%s12143_s16 + $0x118] sm:$0xff] %v8604_v8  ;;  %v8626_v12 = vld [vmem:[%s10681_s12 + $0xf0] sm:$0xff]  ;;  %v8628_v27 = vld [vmem:[%s10681_s12 + $0xf8] sm:$0xff] }
 0x398   : > { %8607 = vst [vmem:[%s12143_s16 + $0x120] sm:$0xff] %v8606_v9  ;;  %8609 = vst [vmem:[%s12143_s16 + $0x128] sm:$0xff] %v8608_v6  ;;  %v8630_v62 = vld [vmem:[%s10681_s12 + $0x100] sm:$0xff]  ;;  %v8632_v38 = vld [vmem:[%s10681_s12 + $0x108] sm:$0xff] }
 0x399   : > { %8611 = vst [vmem:[%s12143_s16 + $0x130] sm:$0xff] %v8610_v28  ;;  %8613 = vst [vmem:[%s12143_s16 + $0x138] sm:$0xff] %v8612_v26  ;;  %v8634_v24 = vld [vmem:[%s10681_s12 + $0x110] sm:$0xff]  ;;  %v8636_v57 = vld [vmem:[%s10681_s12 + $0x118] sm:$0xff] }
 0x39a   : > { %8615 = vst [vmem:[%s12143_s16 + $0x140] sm:$0xff] %v8614_v10  ;;  %8617 = vst [vmem:[%s12143_s16 + $0x148] sm:$0xff] %v8616_v50  ;;  %v8638_v53 = vld [vmem:[%s10681_s12 + $0x120] sm:$0xff]  ;;  %v8640_v36 = vld [vmem:[%s10681_s12 + $0x128] sm:$0xff] }
 0x39b   : > { %8619 = vst [vmem:[%s12143_s16 + $0x150] sm:$0xff] %v8618_v44  ;;  %8621 = vst [vmem:[%s12143_s16 + $0x158] sm:$0xff] %v8620_v30  ;;  %v8642_v61 = vld [vmem:[%s10681_s12 + $0x130] sm:$0xff]  ;;  %v8644_v19 = vld [vmem:[%s10681_s12 + $0x138] sm:$0xff] }
 0x39c   : > { %8623 = vst [vmem:[%s12143_s16 + $0x160] sm:$0xff] %v8622_v21  ;;  %8625 = vst [vmem:[%s12143_s16 + $0x168] sm:$0xff] %v8624_v33  ;;  %v8646_v47 = vld [vmem:[%s10681_s12 + $0x140] sm:$0xff]  ;;  %v8648_v58 = vld [vmem:[%s10681_s12 + $0x148] sm:$0xff] }
 0x39d   : > { %8627 = vst [vmem:[%s12143_s16 + $0x170] sm:$0xff] %v8626_v12  ;;  %8629 = vst [vmem:[%s12143_s16 + $0x178] sm:$0xff] %v8628_v27  ;;  %v8650_v20 = vld [vmem:[%s10681_s12 + $0x150] sm:$0xff]  ;;  %v8652_v52 = vld [vmem:[%s10681_s12 + $0x158] sm:$0xff] }
 0x39e   : > { %8631 = vst [vmem:[%s12143_s16 + $0x200] sm:$0xff] %v8630_v62  ;;  %8633 = vst [vmem:[%s12143_s16 + $0x208] sm:$0xff] %v8632_v38  ;;  %v8654_v25 = vld [vmem:[%s10681_s12 + $0x160] sm:$0xff]  ;;  %v8656_v49 = vld [vmem:[%s10681_s12 + $0x168] sm:$0xff] }
 0x39f   : > { %8635 = vst [vmem:[%s12143_s16 + $0x210] sm:$0xff] %v8634_v24  ;;  %8637 = vst [vmem:[%s12143_s16 + $0x218] sm:$0xff] %v8636_v57  ;;  %v8658_v60 = vld [vmem:[%s10681_s12 + $0x170] sm:$0xff]  ;;  %v8660_v13 = vld [vmem:[%s10681_s12 + $0x178] sm:$0xff] }
 0x3a0   : > { %8639 = vst [vmem:[%s12143_s16 + $0x220] sm:$0xff] %v8638_v53  ;;  %8641 = vst [vmem:[%s12143_s16 + $0x228] sm:$0xff] %v8640_v36  ;;  %v8662_v54 = vld [vmem:[%s10681_s12 + $0x180] sm:$0xff]  ;;  %v8664_v23 = vld [vmem:[%s10681_s12 + $0x188] sm:$0xff] }
 0x3a1   : > { %8643 = vst [vmem:[%s12143_s16 + $0x230] sm:$0xff] %v8642_v61  ;;  %8645 = vst [vmem:[%s12143_s16 + $0x238] sm:$0xff] %v8644_v19  ;;  %v8666_v32 = vld [vmem:[%s10681_s12 + $0x190] sm:$0xff]  ;;  %v8668_v22 = vld [vmem:[%s10681_s12 + $0x198] sm:$0xff] }
 0x3a2   : > { %8647 = vst [vmem:[%s12143_s16 + $0x240] sm:$0xff] %v8646_v47  ;;  %8649 = vst [vmem:[%s12143_s16 + $0x248] sm:$0xff] %v8648_v58  ;;  %v8670_v5 = vld [vmem:[%s10681_s12 + $0x1a0] sm:$0xff]  ;;  %v8672_v14 = vld [vmem:[%s10681_s12 + $0x1a8] sm:$0xff] }
 0x3a3   : > { %8651 = vst [vmem:[%s12143_s16 + $0x250] sm:$0xff] %v8650_v20  ;;  %8653 = vst [vmem:[%s12143_s16 + $0x258] sm:$0xff] %v8652_v52  ;;  %v8674_v59 = vld [vmem:[%s10681_s12 + $0x1b0] sm:$0xff]  ;;  %v8676_v29 = vld [vmem:[%s10681_s12 + $0x1b8] sm:$0xff] }
 0x3a4   : > { %8655 = vst [vmem:[%s12143_s16 + $0x260] sm:$0xff] %v8654_v25  ;;  %8657 = vst [vmem:[%s12143_s16 + $0x268] sm:$0xff] %v8656_v49  ;;  %v8678_v63 = vld [vmem:[%s10681_s12 + $0x1c0] sm:$0xff]  ;;  %v8680_v34 = vld [vmem:[%s10681_s12 + $0x1c8] sm:$0xff] }
 0x3a5   : > { %8659 = vst [vmem:[%s12143_s16 + $0x270] sm:$0xff] %v8658_v60  ;;  %8661 = vst [vmem:[%s12143_s16 + $0x278] sm:$0xff] %v8660_v13  ;;  %v8682_v43 = vld [vmem:[%s10681_s12 + $0x1d0] sm:$0xff]  ;;  %v8684_v46 = vld [vmem:[%s10681_s12 + $0x1d8] sm:$0xff] }
 0x3a6   : > { %8663 = vst [vmem:[%s12143_s16 + $0x300] sm:$0xff] %v8662_v54  ;;  %8665 = vst [vmem:[%s12143_s16 + $0x308] sm:$0xff] %v8664_v23  ;;  %v8686_v1 = vld [vmem:[%s10681_s12 + $0x1e0] sm:$0xff]  ;;  %v8688_v40 = vld [vmem:[%s10681_s12 + $0x1e8] sm:$0xff] }
 0x3a7   : > { %8667 = vst [vmem:[%s12143_s16 + $0x310] sm:$0xff] %v8666_v32  ;;  %8669 = vst [vmem:[%s12143_s16 + $0x318] sm:$0xff] %v8668_v22  ;;  %v8690_v31 = vld [vmem:[%s10681_s12 + $0x1f0] sm:$0xff]  ;;  %v8692_v11 = vld [vmem:[%s10681_s12 + $0x1f8] sm:$0xff] }
 0x3a8   : > { %8671 = vst [vmem:[%s12143_s16 + $0x320] sm:$0xff] %v8670_v5  ;;  %8673 = vst [vmem:[%s12143_s16 + $0x328] sm:$0xff] %v8672_v14 }
 0x3a9   : > { %8675 = vst [vmem:[%s12143_s16 + $0x330] sm:$0xff] %v8674_v59  ;;  %8677 = vst [vmem:[%s12143_s16 + $0x338] sm:$0xff] %v8676_v29 }
 0x3aa   : > { %8679 = vst [vmem:[%s12143_s16 + $0x340] sm:$0xff] %v8678_v63  ;;  %8681 = vst [vmem:[%s12143_s16 + $0x348] sm:$0xff] %v8680_v34 }
 0x3ab   : > { %8683 = vst [vmem:[%s12143_s16 + $0x350] sm:$0xff] %v8682_v43  ;;  %8685 = vst [vmem:[%s12143_s16 + $0x358] sm:$0xff] %v8684_v46 }
 0x3ac   : > { %8687 = vst [vmem:[%s12143_s16 + $0x360] sm:$0xff] %v8686_v1  ;;  %8689 = vst [vmem:[%s12143_s16 + $0x368] sm:$0xff] %v8688_v40 }
 0x3ad   : > { %8691 = vst [vmem:[%s12143_s16 + $0x370] sm:$0xff] %v8690_v31  ;;  %8693 = vst [vmem:[%s12143_s16 + $0x378] sm:$0xff] %v8692_v11 }
 0x3ae PF: > { %s18_s28 = sadd.s32 1, %s9149_s28   ;;  %s12361_s24 = smov %s9129_s1 }
 0x3af   : > { %p15_p11 = scmp.ge.s32.totalorder %s18_s28, 6   ;;  %s12362_s1 = smov %s9253_s14 }
 0x3b0   : > { %s12363_s2 = smov %s9141_s26  ;;  %s12364_s25 = smov %s9145_s27 }
 0x3b1   : > { %s12365_s26 = smov %s12368_s29  ;;  %s12366_s27 = smov %s12372_s30 }
 0x3b2   :  { %17 = sbr.rel (!%p15_p11) target bundleno = 4 (0x4), region = 208 }

</bundles_post_ra>
